<compile_context>
chip_gen: v6e
topology: v6e:2x2x1
jax: 0.10.0
libtpu: 0.0.40
codegen_flags: <defaults>
</compile_context>

<pallas_src>
import functools
import math

import jax
import jax.numpy as jnp
from jax.experimental import pallas as pl
from jax.experimental.pallas import tpu as pltpu


# ----------------------------------------------------------------------------
# helpers traced both inside kernels and in the pure-JAX reference
# ----------------------------------------------------------------------------
def _layernorm(x, gamma, beta, eps=1e-5):
    mean = jnp.mean(x, axis=-1, keepdims=True)
    var = jnp.mean((x - mean) ** 2, axis=-1, keepdims=True)
    return (x - mean) * jax.lax.rsqrt(var + eps) * gamma + beta


def _gelu_tanh(x):
    # matches the reference GELU: 0.5*x*(1+tanh(sqrt(2/pi)*(x+0.044715*x^3)))
    return 0.5 * x * (1.0 + jnp.tanh(math.sqrt(2.0 / math.pi) * (x + 0.044715 * x * x * x)))


def img_to_patch(x, patch_size):
    """[B, C, H, W] -> [B, T, C*p*p], mirrors the torch reference exactly."""
    B, C, H, W = x.shape
    p = patch_size
    x = x.reshape(B, C, H // p, p, W // p, p)
    x = jnp.transpose(x, (0, 2, 4, 1, 3, 5))
    return x.reshape(B, (H // p) * (W // p), C * p * p)


def _nbytes(a):
    return int(a.size) * a.dtype.itemsize


_VSPEC = pl.BlockSpec(memory_space=pltpu.MemorySpace.VMEM)


# ----------------------------------------------------------------------------
# kernel 1: fused patch-embedding linear + CLS token + positional embedding
# ----------------------------------------------------------------------------
def embed_pallas(patches_pad, in_w_bf16, addterm_full):
    """patches_pad: [B*S_pad, P] f32 with zero rows at each block's CLS slot and
    pad slots; in_w_bf16: [P, E] bf16; addterm_full: [B*S_pad, E] f32 (CLS rows
    = cls+pos[0], real rows = pos+in_b, pad rows = 0).  The kernel body is one
    matmul + add + full unmasked slab store; zero input rows guarantee the pad
    rows of the output are exactly 0."""
    M, P = patches_pad.shape
    E = in_w_bf16.shape[1]

    def kernel(p_ref, w_ref, add_ref, o_ref):
        o_ref[...] = jnp.dot(p_ref[...].astype(jnp.bfloat16), w_ref[...],
                             preferred_element_type=jnp.float32) + add_ref[...]

    cost = pl.CostEstimate(
        flops=2 * M * P * E,
        transcendentals=0,
        bytes_accessed=_nbytes(patches_pad) + _nbytes(in_w_bf16)
        + _nbytes(addterm_full) + M * E * 4)

    return pl.pallas_call(
        kernel,
        out_shape=jax.ShapeDtypeStruct((M, E), jnp.float32),
        in_specs=[_VSPEC, _VSPEC, _VSPEC],
        out_specs=_VSPEC,
        cost_estimate=cost,
    )(patches_pad, in_w_bf16, addterm_full)


# ----------------------------------------------------------------------------
# kernel 2: all encoder layers + classification head in ONE pallas_call
# ----------------------------------------------------------------------------
def transformer_pallas(z0, stacked, head, *, B, S_pad, S_real, num_heads):
    """grid=(num_layers,): layer weights stream through VMEM (double-buffered by
    BlockSpec auto-pipelining); the [B*S_pad, E] activation slab stays in a VMEM
    scratch across the whole grid; lane-padded logits written on the last step."""
    M, E = z0.shape
    L = stacked["wqkv"].shape[0]
    Cp = head["w"].shape[1]
    Hd = stacked["w1"].shape[2]
    Dh = E // num_heads
    scale = 1.0 / math.sqrt(Dh)

    def kernel(z0_ref, wqkv_ref, bqkv_ref, wo_ref, bo_ref,
               g1_ref, be1_ref, w1_ref, bf1_ref, w2_ref, bf2_ref,
               g2_ref, be2_ref, gh_ref, beh_ref, wh_ref, bh_ref,
               logits_ref, z_scr, qkv_scr):
        l = pl.program_id(0)

        @pl.when(l == 0)
        def _init():
            z_scr[...] = z0_ref[...]

        z = z_scr[...]                                       # [M, E] f32

        # ---- fused QKV projection, batch folded into the M dimension.  The
        # result is parked in VMEM so the unrolled attention loop reloads only
        # one per-batch block at a time (bounded vreg live range). ----
        qkv_scr[...] = jnp.dot(z.astype(jnp.bfloat16), wqkv_ref[...],
                               preferred_element_type=jnp.float32) + bqkv_ref[...]

        # key-padding mask: built ONCE per kernel body, full [S_pad, S_pad]
        # (hoisted out of the per-(batch, head) loop).
        key_ids = jax.lax.broadcasted_iota(jnp.int32, (S_pad, S_pad), 1)
        key_mask = jnp.where(key_ids < S_real, 0.0, -1e30).astype(jnp.float32)

        # ---- per-(batch, head) attention; heads are concatenated along the
        # lane axis in-register (lane-dense), one [S_pad, E] slab per batch,
        # and the full [M, E] value feeds wo directly (no scratch round-trip,
        # no masked 32-lane stores). ----
        batch_slabs = []
        for b in range(B):                                   # B tiny & static
            r0 = b * S_pad
            qkv_b = qkv_scr[r0:r0 + S_pad, :]                # [S_pad, 3E], just in time
            head_outs = []
            for h in range(num_heads):
                c0 = h * Dh
                qh = qkv_b[:, c0:c0 + Dh].astype(jnp.bfloat16)
                kh = qkv_b[:, E + c0:E + c0 + Dh].astype(jnp.bfloat16)
                vh = qkv_b[:, 2 * E + c0:2 * E + c0 + Dh].astype(jnp.bfloat16)
                s = jax.lax.dot_general(qh, kh, (((1,), (1,)), ((), ())),
                                        preferred_element_type=jnp.float32)
                s = s * scale + key_mask                     # [S_pad, S_pad]
                m = jnp.max(s, axis=-1, keepdims=True)
                e = jnp.exp(s - m)
                p = e * pl.reciprocal(jnp.sum(e, axis=-1, keepdims=True),
                                      approx=True)
                head_outs.append(jnp.dot(p.astype(jnp.bfloat16), vh,
                                         preferred_element_type=jnp.float32))
            batch_slabs.append(jnp.concatenate(head_outs, axis=-1))  # [S_pad, E]
        attn_val = jnp.concatenate(batch_slabs, axis=0)               # [M, E]

        # ---- output projection + residual + LN1 (whole slab) ----
        attn = jnp.dot(attn_val.astype(jnp.bfloat16), wo_ref[...],
                       preferred_element_type=jnp.float32) + bo_ref[...]
        x1 = _layernorm(z + attn, g1_ref[...], be1_ref[...])

        # ---- feed-forward (Linear -> GELU -> Linear) + residual + LN2 ----
        h1 = _gelu_tanh(jnp.dot(x1.astype(jnp.bfloat16), w1_ref[...],
                                preferred_element_type=jnp.float32) + bf1_ref[...])
        y = jnp.dot(h1.astype(jnp.bfloat16), w2_ref[...],
                    preferred_element_type=jnp.float32) + bf2_ref[...]
        z_new = _layernorm(x1 + y, g2_ref[...], be2_ref[...])
        z_scr[...] = z_new

        # ---- classification head fused into the last grid step: gather all
        # CLS rows once, one LayerNorm, one [B,E]x[E,Cp] matmul, one unmasked
        # lane-dense [B, Cp] store. ----
        @pl.when(l == pl.num_programs(0) - 1)
        def _head():
            cls = jnp.concatenate(
                [z_new[b * S_pad:b * S_pad + 1, :] for b in range(B)], axis=0)
            cn = _layernorm(cls, gh_ref[...], beh_ref[...])
            logits_ref[...] = jnp.dot(cn.astype(jnp.bfloat16), wh_ref[...],
                                      preferred_element_type=jnp.float32) + bh_ref[...]

    def lspec(a):   # per-layer stacked param: stream block l, squeeze layer axis
        return pl.BlockSpec((None,) + a.shape[1:], lambda l: (l, 0, 0))

    def cspec(a):   # layer-invariant param: constant block
        return pl.BlockSpec(a.shape, lambda l: (0, 0))

    args = (z0,
            stacked["wqkv"], stacked["bqkv"], stacked["wo"], stacked["bo"],
            stacked["g1"], stacked["be1"], stacked["w1"], stacked["bf1"],
            stacked["w2"], stacked["bf2"], stacked["g2"], stacked["be2"],
            head["g"], head["be"], head["w"], head["b"])
    in_specs = ([cspec(z0)]
                + [lspec(a) for a in args[1:13]]
                + [cspec(a) for a in args[13:]])

    # advisory cost estimate for XLA scheduling around the custom call
    flops_layer = (2 * M * E * 3 * E + 2 * M * E * E
                   + 2 * M * E * Hd + 2 * M * Hd * E
                   + B * num_heads * 4 * S_pad * S_pad * Dh)
    cost = pl.CostEstimate(
        flops=L * flops_layer + 2 * B * E * Cp,
        transcendentals=L * (B * num_heads * S_pad * S_pad + M * Hd),
        bytes_accessed=sum(_nbytes(a) for a in args) + B * Cp * 4)

    # VMEM budget derived from the actual footprint (double-buffered per-layer
    # weight blocks + constants + resident scratch) with 2x headroom, instead
    # of a flat 48 MiB (keeps plenty of compiler headroom on v7x's 64 MiB VMEM).
    layer_block_bytes = sum(_nbytes(v) // L for v in stacked.values())
    const_bytes = _nbytes(z0) + sum(_nbytes(v) for v in head.values()) + B * Cp * 4
    scratch_bytes = M * E * 4 + M * 3 * E * 4
    vmem_limit = int(min(96 * 1024 * 1024,
                         max(8 * 1024 * 1024,
                             2 * (2 * layer_block_bytes + 2 * const_bytes
                                  + scratch_bytes))))

    # NOTE(v7x): at real ViT sizes add a leading "parallel" grid axis over
    # batch / M tiles (grid=(B_tiles, L), dimension_semantics=("parallel",
    # "arbitrary")) so both TensorCores are used and the per-core resident
    # activation slab shrinks; at this toy size the whole activation stays
    # VMEM-resident on one core across layers.
    return pl.pallas_call(
        kernel,
        out_shape=jax.ShapeDtypeStruct((B, Cp), jnp.float32),
        grid_spec=pltpu.PrefetchScalarGridSpec(
            num_scalar_prefetch=0,
            grid=(L,),
            in_specs=in_specs,
            out_specs=pl.BlockSpec((B, Cp), lambda l: (0, 0)),
            scratch_shapes=[pltpu.VMEM((M, E), jnp.float32),        # resident activation
                            pltpu.VMEM((M, 3 * E), jnp.float32)]),  # per-layer QKV
        compiler_params=pltpu.CompilerParams(
            dimension_semantics=("arbitrary",),
            vmem_limit_bytes=vmem_limit),
        cost_estimate=cost,
    )(*args)


# ----------------------------------------------------------------------------
# wrapper
# ----------------------------------------------------------------------------
@functools.partial(jax.jit,
                   static_argnames=("patch_size", "num_heads", "S_pad", "num_classes"))
def vit_forward(x, kparams, *, patch_size, num_heads, S_pad, num_classes):
    patches = img_to_patch(x, patch_size)                    # [B, T, P]
    B, T, P = patches.shape
    # host-side layout plumbing: place each batch's patch rows at their final
    # sublane slots (CLS row 0 and pad rows stay zero) and tile the additive
    # term, so the embed kernel is one full-slab matmul + add + unmasked store.
    patches_pad = jnp.zeros((B, S_pad, P), jnp.float32).at[:, 1:T + 1, :].set(patches)
    addterm_full = jnp.tile(kparams["addterm"], (B, 1))      # [B*S_pad, E]
    z0 = embed_pallas(patches_pad.reshape(B * S_pad, P), kparams["in_w"], addterm_full)
    logits_pad = transformer_pallas(z0, kparams["stacked"], kparams["head"],
                                    B=B, S_pad=S_pad, S_real=T + 1,
                                    num_heads=num_heads)
    return logits_pad[:, :num_classes]


# ----------------------------------------------------------------------------
# parameter init (f32, torch-like semantics) + kernel-side preparation
# ----------------------------------------------------------------------------
def init_params(key, embed_dim, hidden_dim, num_channels, num_layers,
                num_classes, patch_size, num_patches):
    P = num_channels * patch_size ** 2
    keys = jax.random.split(key, 4 + num_layers)

    def nrm(k, shape, scale=0.02):
        return (scale * jax.random.normal(k, shape)).astype(jnp.float32)

    k_in, k_cls, k_pos, k_head = keys[0], keys[1], keys[2], keys[3]
    params = {
        "in_w": nrm(k_in, (P, embed_dim)),
        "in_b": jnp.zeros((1, embed_dim), jnp.float32),
        "cls_token": nrm(k_cls, (1, 1, embed_dim), 1.0),
        "pos_embedding": nrm(k_pos, (1, 1 + num_patches, embed_dim), 1.0),
    }
    hk = jax.random.split(k_head, 2)
    params["head"] = dict(
        g=jnp.ones((1, embed_dim), jnp.float32),
        be=jnp.zeros((1, embed_dim), jnp.float32),
        w=nrm(hk[0], (embed_dim, num_classes)),
        b=jnp.zeros((1, num_classes), jnp.float32),
    )
    layers = []
    for li in range(num_layers):
        lk = jax.random.split(keys[4 + li], 4)
        layers.append(dict(
            wqkv=nrm(lk[0], (embed_dim, 3 * embed_dim)),
            bqkv=jnp.zeros((1, 3 * embed_dim), jnp.float32),
            wo=nrm(lk[1], (embed_dim, embed_dim)),
            bo=jnp.zeros((1, embed_dim), jnp.float32),
            g1=jnp.ones((1, embed_dim), jnp.float32),
            be1=jnp.zeros((1, embed_dim), jnp.float32),
            w1=nrm(lk[2], (embed_dim, hidden_dim)),
            bf1=jnp.zeros((1, hidden_dim), jnp.float32),
            w2=nrm(lk[3], (hidden_dim, embed_dim)),
            bf2=jnp.zeros((1, embed_dim), jnp.float32),
            g2=jnp.ones((1, embed_dim), jnp.float32),
            be2=jnp.zeros((1, embed_dim), jnp.float32),
        ))
    params["layers"] = layers
    return params


def prepare_kernel_params(params, *, num_classes, S_pad):
    """Stack per-layer weights on a leading layer axis, cast MXU operands to
    bf16, fold cls/pos/in_b into one additive term, lane-pad the head."""
    E = params["in_w"].shape[1]
    S = params["pos_embedding"].shape[1]             # 1 + num_patches

    addterm = jnp.zeros((S_pad, E), jnp.float32)
    addterm = addterm.at[0].set(params["cls_token"][0, 0] + params["pos_embedding"][0, 0])
    addterm = addterm.at[1:S].set(params["pos_embedding"][0, 1:S] + params["in_b"][0])

    def stack(name, dtype):
        return jnp.stack([lp[name] for lp in params["layers"]]).astype(dtype)

    stacked = dict(
        wqkv=stack("wqkv", jnp.bfloat16), bqkv=stack("bqkv", jnp.float32),
        wo=stack("wo", jnp.bfloat16), bo=stack("bo", jnp.float32),
        g1=stack("g1", jnp.float32), be1=stack("be1", jnp.float32),
        w1=stack("w1", jnp.bfloat16), bf1=stack("bf1", jnp.float32),
        w2=stack("w2", jnp.bfloat16), bf2=stack("bf2", jnp.float32),
        g2=stack("g2", jnp.float32), be2=stack("be2", jnp.float32),
    )

    c_pad = ((num_classes + 127) // 128) * 128       # lane-dense head output
    hw = jnp.zeros((E, c_pad), jnp.float32).at[:, :num_classes].set(params["head"]["w"])
    hb = jnp.zeros((1, c_pad), jnp.float32).at[:, :num_classes].set(params["head"]["b"])
    head = dict(g=params["head"]["g"], be=params["head"]["be"],
                w=hw.astype(jnp.bfloat16), b=hb)

    return dict(in_w=params["in_w"].astype(jnp.bfloat16),
                addterm=addterm, stacked=stacked, head=head)


# ----------------------------------------------------------------------------
# pure-JAX f32 reference (same math as the PyTorch module) for validation
# ----------------------------------------------------------------------------
def vit_reference(x, params, patch_size, num_heads):
    patches = img_to_patch(x, patch_size)
    B, T, _ = patches.shape
    z = patches @ params["in_w"] + params["in_b"]             # [B, T, E]
    E = z.shape[-1]
    cls = jnp.broadcast_to(params["cls_token"], (B, 1, E))
    z = jnp.concatenate([cls, z], axis=1) + params["pos_embedding"][:, :T + 1]
    Dh = E // num_heads
    for p in params["layers"]:
        qkv = z @ p["wqkv"] + p["bqkv"]
        q, k, v = jnp.split(qkv, 3, axis=-1)

        def heads(t):
            return t.reshape(B, -1, num_heads, Dh).transpose(0, 2, 1, 3)

        qh, kh, vh = heads(q), heads(k), heads(v)
        s = jnp.einsum("bhqd,bhkd->bhqk", qh, kh) / math.sqrt(Dh)
        a = jax.nn.softmax(s, axis=-1)
        o = jnp.einsum("bhqk,bhkd->bhqd", a, vh).transpose(0, 2, 1, 3).reshape(B, -1, E)
        attn = o @ p["wo"] + p["bo"]
        x1 = _layernorm(z + attn, p["g1"], p["be1"])
        h1 = _gelu_tanh(x1 @ p["w1"] + p["bf1"])
        y = h1 @ p["w2"] + p["bf2"]                           # (bugfix: h1, not x1)
        z = _layernorm(x1 + y, p["g2"], p["be2"])
    cls_out = z[:, 0, :]
    cn = _layernorm(cls_out, params["head"]["g"], params["head"]["be"])
    return cn @ params["head"]["w"] + params["head"]["b"]


# ----------------------------------------------------------------------------
if __name__ == "__main__":
    # small ViT config, lane/sublane friendly (E=128 lanes, Dh=32, hidden=256)
    embed_dim, hidden_dim = 128, 256
    num_channels, num_heads, num_layers = 4, 4, 2
    num_classes, patch_size = 10, 4
    B, H, W = 2, 16, 16
    num_patches = (H // patch_size) * (W // patch_size)      # 16 -> seq len 17
    S_pad = 24                                               # pad seq 17 -> 24 (x8 sublanes)

    key = jax.random.PRNGKey(0)
    kx, kp = jax.random.split(key)
    x = jax.random.normal(kx, (B, num_channels, H, W), dtype=jnp.float32)

    params = init_params(kp, embed_dim, hidden_dim, num_channels, num_layers,
                         num_classes, patch_size, num_patches)
    kparams = prepare_kernel_params(params, num_classes=num_classes, S_pad=S_pad)

    out = vit_forward(x, kparams, patch_size=patch_size, num_heads=num_heads,
                      S_pad=S_pad, num_classes=num_classes)
    out = jax.block_until_ready(out)
    assert out.shape == (B, num_classes), out.shape
    assert bool(jnp.all(jnp.isfinite(out)))

    # loose-tolerance check vs. a pure-JAX f32 reference (bf16 MXU operands +
    # approx reciprocal give a small, expected numerical deviation)
    ref = vit_reference(x, params, patch_size, num_heads)
    err = float(jnp.max(jnp.abs(out - ref)))
    assert err < 1e-1, f"kernel/reference mismatch: max abs err {err}"

    print("KERNEL_OK")
</pallas_src>

<mosaic_0001>
module attributes {stable_mosaic.version = 11 : i64} {
  func.func @kernel(%arg0: memref<48x64xf32, #tpu.memory_space<vmem>>, %arg1: memref<64x128xbf16, #tpu.memory_space<vmem>>, %arg2: memref<48x128xf32, #tpu.memory_space<vmem>>, %arg3: memref<48x128xf32, #tpu.memory_space<vmem>>) attributes {dimension_semantics = [], scalar_prefetch = 0 : i64, scratch_operands = 0 : i64, tpu.core_type = #tpu.core_type<tc>} {
    %c0 = arith.constant 0 : index
    %c0_0 = arith.constant 0 : index
    %0 = vector.load %arg0[%c0, %c0_0] : memref<48x64xf32, #tpu.memory_space<vmem>>, vector<48x64xf32>
    %1 = arith.truncf %0 : vector<48x64xf32> to vector<48x64xbf16>
    %c0_1 = arith.constant 0 : index
    %c0_2 = arith.constant 0 : index
    %2 = vector.load %arg1[%c0_1, %c0_2] : memref<64x128xbf16, #tpu.memory_space<vmem>>, vector<64x128xbf16>
    %cst = arith.constant dense<0.000000e+00> : vector<48x128xf32>
    %3 = tpu.matmul %1, %2, %cst {dimension_numbers = #tpu.dot_dimension_numbers<[1], [0], [0], [1], [0, 0, 1, 1], [], []>} : vector<48x64xbf16>, vector<64x128xbf16>, vector<48x128xf32> -> vector<48x128xf32>
    %c0_3 = arith.constant 0 : index
    %c0_4 = arith.constant 0 : index
    %4 = vector.load %arg2[%c0_3, %c0_4] : memref<48x128xf32, #tpu.memory_space<vmem>>, vector<48x128xf32>
    %5 = arith.addf %3, %4 : vector<48x128xf32>
    %c0_5 = arith.constant 0 : index
    %c0_6 = arith.constant 0 : index
    %6 = vector.load %arg3[%c0_5, %c0_6] : memref<48x128xf32, #tpu.memory_space<vmem>>, vector<48x128xf32>
    tpu.vector_store %arg3[%c0_5, %c0_6], %5 {strides = array<i32>} : memref<48x128xf32, #tpu.memory_space<vmem>>, vector<48x128xf32>,
    return
  }
}

module attributes {stable_mosaic.version = 11 : i64} {
  func.func @kernel(%arg0: i32, %arg1: memref<48x128xf32, #tpu.memory_space<vmem>>, %arg2: memref<1x128x384xbf16, #tpu.memory_space<vmem>>, %arg3: memref<1x1x384xf32, #tpu.memory_space<vmem>>, %arg4: memref<1x128x128xbf16, #tpu.memory_space<vmem>>, %arg5: memref<1x1x128xf32, #tpu.memory_space<vmem>>, %arg6: memref<1x1x128xf32, #tpu.memory_space<vmem>>, %arg7: memref<1x1x128xf32, #tpu.memory_space<vmem>>, %arg8: memref<1x128x256xbf16, #tpu.memory_space<vmem>>, %arg9: memref<1x1x256xf32, #tpu.memory_space<vmem>>, %arg10: memref<1x256x128xbf16, #tpu.memory_space<vmem>>, %arg11: memref<1x1x128xf32, #tpu.memory_space<vmem>>, %arg12: memref<1x1x128xf32, #tpu.memory_space<vmem>>, %arg13: memref<1x1x128xf32, #tpu.memory_space<vmem>>, %arg14: memref<1x128xf32, #tpu.memory_space<vmem>>, %arg15: memref<1x128xf32, #tpu.memory_space<vmem>>, %arg16: memref<128x128xbf16, #tpu.memory_space<vmem>>, %arg17: memref<1x128xf32, #tpu.memory_space<vmem>>, %arg18: memref<2x128xf32, #tpu.memory_space<vmem>>, %arg19: memref<48x128xf32, #tpu.memory_space<vmem>>, %arg20: memref<48x384xf32, #tpu.memory_space<vmem>>) attributes {dimension_semantics = [#tpu.dimension_semantics<arbitrary>], iteration_bounds = array<i64: 2>, scalar_prefetch = 0 : i64, scratch_operands = 2 : i64, tpu.core_type = #tpu.core_type<tc>, window_params = [{pipeline_mode = #tpu.pipeline_mode<synchronous>, transform_indices = @transform_0, window_bounds = array<i64: 48, 128>}, {transform_indices = @transform_1, window_bounds = array<i64: 1, 128, 384>}, {transform_indices = @transform_2, window_bounds = array<i64: 1, 1, 384>}, {transform_indices = @transform_3, window_bounds = array<i64: 1, 128, 128>}, {transform_indices = @transform_4, window_bounds = array<i64: 1, 1, 128>}, {transform_indices = @transform_5, window_bounds = array<i64: 1, 1, 128>}, {transform_indices = @transform_6, window_bounds = array<i64: 1, 1, 128>}, {transform_indices = @transform_7, window_bounds = array<i64: 1, 128, 256>}, {transform_indices = @transform_8, window_bounds = array<i64: 1, 1, 256>}, {transform_indices = @transform_9, window_bounds = array<i64: 1, 256, 128>}, {transform_indices = @transform_10, window_bounds = array<i64: 1, 1, 128>}, {transform_indices = @transform_11, window_bounds = array<i64: 1, 1, 128>}, {transform_indices = @transform_12, window_bounds = array<i64: 1, 1, 128>}, {pipeline_mode = #tpu.pipeline_mode<synchronous>, transform_indices = @transform_13, window_bounds = array<i64: 1, 128>}, {pipeline_mode = #tpu.pipeline_mode<synchronous>, transform_indices = @transform_14, window_bounds = array<i64: 1, 128>}, {pipeline_mode = #tpu.pipeline_mode<synchronous>, transform_indices = @transform_15, window_bounds = array<i64: 128, 128>}, {pipeline_mode = #tpu.pipeline_mode<synchronous>, transform_indices = @transform_16, window_bounds = array<i64: 1, 128>}, {pipeline_mode = #tpu.pipeline_mode<synchronous>, transform_indices = @transform_17, window_bounds = array<i64: 2, 128>}]} {
    %c0_i32 = arith.constant 0 : i32
    %0 = arith.cmpi eq, %arg0, %c0_i32 : i32
    %1 = arith.extui %0 : i1 to i32
    %c0_i32_0 = arith.constant 0 : i32
    %2 = arith.cmpi ne, %1, %c0_i32_0 : i32
    scf.if %2 {
      %c0_105 = arith.constant 0 : index
      %c0_106 = arith.constant 0 : index
      %295 = vector.load %arg1[%c0_105, %c0_106] : memref<48x128xf32, #tpu.memory_space<vmem>>, vector<48x128xf32>
      %c0_107 = arith.constant 0 : index
      %c0_108 = arith.constant 0 : index
      %296 = vector.load %arg19[%c0_107, %c0_108] : memref<48x128xf32, #tpu.memory_space<vmem>>, vector<48x128xf32>
      tpu.vector_store %arg19[%c0_107, %c0_108], %295 {strides = array<i32>} : memref<48x128xf32, #tpu.memory_space<vmem>>, vector<48x128xf32>,
    } else {
    }
    %c0 = arith.constant 0 : index
    %c0_1 = arith.constant 0 : index
    %3 = vector.load %arg19[%c0, %c0_1] : memref<48x128xf32, #tpu.memory_space<vmem>>, vector<48x128xf32>
    %4 = arith.truncf %3 : vector<48x128xf32> to vector<48x128xbf16>
    %c0_2 = arith.constant 0 : index
    %c0_3 = arith.constant 0 : index
    %c0_4 = arith.constant 0 : index
    %5 = vector.load %arg2[%c0_2, %c0_3, %c0_4] : memref<1x128x384xbf16, #tpu.memory_space<vmem>>, vector<1x128x384xbf16>
    %6 = vector.shape_cast %5 : vector<1x128x384xbf16> to vector<128x384xbf16>
    %cst = arith.constant dense<0.000000e+00> : vector<48x384xf32>
    %7 = tpu.matmul %4, %6, %cst {dimension_numbers = #tpu.dot_dimension_numbers<[1], [0], [0], [1], [0, 0, 1, 1], [], []>} : vector<48x128xbf16>, vector<128x384xbf16>, vector<48x384xf32> -> vector<48x384xf32>
    %c0_5 = arith.constant 0 : index
    %c0_6 = arith.constant 0 : index
    %c0_7 = arith.constant 0 : index
    %8 = vector.load %arg3[%c0_5, %c0_6, %c0_7] : memref<1x1x384xf32, #tpu.memory_space<vmem>>, vector<1x1x384xf32>
    %9 = vector.shape_cast %8 : vector<1x1x384xf32> to vector<1x384xf32>
    %10 = vector.broadcast %9 : vector<1x384xf32> to vector<48x384xf32>
    %11 = arith.addf %7, %10 : vector<48x384xf32>
    %c0_8 = arith.constant 0 : index
    %c0_9 = arith.constant 0 : index
    %12 = vector.load %arg20[%c0_8, %c0_9] : memref<48x384xf32, #tpu.memory_space<vmem>>, vector<48x384xf32>
    tpu.vector_store %arg20[%c0_8, %c0_9], %11 {strides = array<i32>} : memref<48x384xf32, #tpu.memory_space<vmem>>, vector<48x384xf32>,
    %13 = tpu.iota {dimensions = array<i32: 1>} : vector<24x24xi32>
    %c17_i32 = arith.constant 17 : i32
    %14 = vector.broadcast %c17_i32 : i32 to vector<24x24xi32>
    %15 = arith.cmpi slt, %13, %14 : vector<24x24xi32>
    %cst_10 = arith.constant 0.000000e+00 : f32
    %cst_11 = arith.constant -1.000000e+30 : f32
    %16 = vector.broadcast %cst_10 : f32 to vector<24x24xf32>
    %17 = vector.broadcast %cst_11 : f32 to vector<24x24xf32>
    %18 = arith.select %15, %16, %17 : vector<24x24xi1>, vector<24x24xf32>
    %c0_12 = arith.constant 0 : index
    %c0_13 = arith.constant 0 : index
    %19 = vector.load %arg20[%c0_12, %c0_13] : memref<48x384xf32, #tpu.memory_space<vmem>>, vector<24x384xf32>
    %20 = vector.extract_strided_slice %19 {offsets = [0, 0], sizes = [24, 32], strides = [1, 1]} : vector<24x384xf32> to vector<24x32xf32>
    %21 = arith.truncf %20 : vector<24x32xf32> to vector<24x32xbf16>
    %22 = vector.extract_strided_slice %19 {offsets = [0, 128], sizes = [24, 32], strides = [1, 1]} : vector<24x384xf32> to vector<24x32xf32>
    %23 = arith.truncf %22 : vector<24x32xf32> to vector<24x32xbf16>
    %24 = vector.extract_strided_slice %19 {offsets = [0, 256], sizes = [24, 32], strides = [1, 1]} : vector<24x384xf32> to vector<24x32xf32>
    %25 = arith.truncf %24 : vector<24x32xf32> to vector<24x32xbf16>
    %cst_14 = arith.constant dense<0.000000e+00> : vector<24x24xf32>
    %26 = tpu.matmul %21, %23, %cst_14 {dimension_numbers = #tpu.dot_dimension_numbers<[1], [1], [0], [0], [0, 0, 1, 0], [], []>} : vector<24x32xbf16>, vector<24x32xbf16>, vector<24x24xf32> -> vector<24x24xf32>
    %cst_15 = arith.constant 0.176776692 : f32
    %27 = vector.broadcast %cst_15 : f32 to vector<24x24xf32>
    %28 = arith.mulf %26, %27 : vector<24x24xf32>
    %29 = arith.addf %28, %18 : vector<24x24xf32>
    %cst_16 = arith.constant dense<0xFF800000> : vector<24xf32>
    %30 = vector.multi_reduction <maximumf>, %29, %cst_16 [1] : vector<24x24xf32> to vector<24xf32>
    %31 = vector.shape_cast %30 : vector<24xf32> to vector<24x1xf32>
    %32 = vector.broadcast %31 : vector<24x1xf32> to vector<24x24xf32>
    %33 = arith.subf %29, %32 : vector<24x24xf32>
    %34 = math.exp %33 : vector<24x24xf32>
    %cst_17 = arith.constant dense<0.000000e+00> : vector<24xf32>
    %35 = vector.multi_reduction <add>, %34, %cst_17 [1] : vector<24x24xf32> to vector<24xf32>
    %36 = vector.shape_cast %35 : vector<24xf32> to vector<24x1xf32>
    %37 = tpu.reciprocal %36 {approx = true} : vector<24x1xf32> -> vector<24x1xf32>
    %38 = vector.broadcast %37 : vector<24x1xf32> to vector<24x24xf32>
    %39 = arith.mulf %34, %38 : vector<24x24xf32>
    %40 = arith.truncf %39 : vector<24x24xf32> to vector<24x24xbf16>
    %cst_18 = arith.constant dense<0.000000e+00> : vector<24x32xf32>
    %41 = tpu.matmul %40, %25, %cst_18 {dimension_numbers = #tpu.dot_dimension_numbers<[1], [0], [0], [1], [0, 0, 1, 1], [], []>} : vector<24x24xbf16>, vector<24x32xbf16>, vector<24x32xf32> -> vector<24x32xf32>
    %42 = vector.extract_strided_slice %19 {offsets = [0, 32], sizes = [24, 32], strides = [1, 1]} : vector<24x384xf32> to vector<24x32xf32>
    %43 = arith.truncf %42 : vector<24x32xf32> to vector<24x32xbf16>
    %44 = vector.extract_strided_slice %19 {offsets = [0, 160], sizes = [24, 32], strides = [1, 1]} : vector<24x384xf32> to vector<24x32xf32>
    %45 = arith.truncf %44 : vector<24x32xf32> to vector<24x32xbf16>
    %46 = vector.extract_strided_slice %19 {offsets = [0, 288], sizes = [24, 32], strides = [1, 1]} : vector<24x384xf32> to vector<24x32xf32>
    %47 = arith.truncf %46 : vector<24x32xf32> to vector<24x32xbf16>
    %cst_19 = arith.constant dense<0.000000e+00> : vector<24x24xf32>
    %48 = tpu.matmul %43, %45, %cst_19 {dimension_numbers = #tpu.dot_dimension_numbers<[1], [1], [0], [0], [0, 0, 1, 0], [], []>} : vector<24x32xbf16>, vector<24x32xbf16>, vector<24x24xf32> -> vector<24x24xf32>
    %cst_20 = arith.constant 0.176776692 : f32
    %49 = vector.broadcast %cst_20 : f32 to vector<24x24xf32>
    %50 = arith.mulf %48, %49 : vector<24x24xf32>
    %51 = arith.addf %50, %18 : vector<24x24xf32>
    %cst_21 = arith.constant dense<0xFF800000> : vector<24xf32>
    %52 = vector.multi_reduction <maximumf>, %51, %cst_21 [1] : vector<24x24xf32> to vector<24xf32>
    %53 = vector.shape_cast %52 : vector<24xf32> to vector<24x1xf32>
    %54 = vector.broadcast %53 : vector<24x1xf32> to vector<24x24xf32>
    %55 = arith.subf %51, %54 : vector<24x24xf32>
    %56 = math.exp %55 : vector<24x24xf32>
    %cst_22 = arith.constant dense<0.000000e+00> : vector<24xf32>
    %57 = vector.multi_reduction <add>, %56, %cst_22 [1] : vector<24x24xf32> to vector<24xf32>
    %58 = vector.shape_cast %57 : vector<24xf32> to vector<24x1xf32>
    %59 = tpu.reciprocal %58 {approx = true} : vector<24x1xf32> -> vector<24x1xf32>
    %60 = vector.broadcast %59 : vector<24x1xf32> to vector<24x24xf32>
    %61 = arith.mulf %56, %60 : vector<24x24xf32>
    %62 = arith.truncf %61 : vector<24x24xf32> to vector<24x24xbf16>
    %cst_23 = arith.constant dense<0.000000e+00> : vector<24x32xf32>
    %63 = tpu.matmul %62, %47, %cst_23 {dimension_numbers = #tpu.dot_dimension_numbers<[1], [0], [0], [1], [0, 0, 1, 1], [], []>} : vector<24x24xbf16>, vector<24x32xbf16>, vector<24x32xf32> -> vector<24x32xf32>
    %64 = vector.extract_strided_slice %19 {offsets = [0, 64], sizes = [24, 32], strides = [1, 1]} : vector<24x384xf32> to vector<24x32xf32>
    %65 = arith.truncf %64 : vector<24x32xf32> to vector<24x32xbf16>
    %66 = vector.extract_strided_slice %19 {offsets = [0, 192], sizes = [24, 32], strides = [1, 1]} : vector<24x384xf32> to vector<24x32xf32>
    %67 = arith.truncf %66 : vector<24x32xf32> to vector<24x32xbf16>
    %68 = vector.extract_strided_slice %19 {offsets = [0, 320], sizes = [24, 32], strides = [1, 1]} : vector<24x384xf32> to vector<24x32xf32>
    %69 = arith.truncf %68 : vector<24x32xf32> to vector<24x32xbf16>
    %cst_24 = arith.constant dense<0.000000e+00> : vector<24x24xf32>
    %70 = tpu.matmul %65, %67, %cst_24 {dimension_numbers = #tpu.dot_dimension_numbers<[1], [1], [0], [0], [0, 0, 1, 0], [], []>} : vector<24x32xbf16>, vector<24x32xbf16>, vector<24x24xf32> -> vector<24x24xf32>
    %cst_25 = arith.constant 0.176776692 : f32
    %71 = vector.broadcast %cst_25 : f32 to vector<24x24xf32>
    %72 = arith.mulf %70, %71 : vector<24x24xf32>
    %73 = arith.addf %72, %18 : vector<24x24xf32>
    %cst_26 = arith.constant dense<0xFF800000> : vector<24xf32>
    %74 = vector.multi_reduction <maximumf>, %73, %cst_26 [1] : vector<24x24xf32> to vector<24xf32>
    %75 = vector.shape_cast %74 : vector<24xf32> to vector<24x1xf32>
    %76 = vector.broadcast %75 : vector<24x1xf32> to vector<24x24xf32>
    %77 = arith.subf %73, %76 : vector<24x24xf32>
    %78 = math.exp %77 : vector<24x24xf32>
    %cst_27 = arith.constant dense<0.000000e+00> : vector<24xf32>
    %79 = vector.multi_reduction <add>, %78, %cst_27 [1] : vector<24x24xf32> to vector<24xf32>
    %80 = vector.shape_cast %79 : vector<24xf32> to vector<24x1xf32>
    %81 = tpu.reciprocal %80 {approx = true} : vector<24x1xf32> -> vector<24x1xf32>
    %82 = vector.broadcast %81 : vector<24x1xf32> to vector<24x24xf32>
    %83 = arith.mulf %78, %82 : vector<24x24xf32>
    %84 = arith.truncf %83 : vector<24x24xf32> to vector<24x24xbf16>
    %cst_28 = arith.constant dense<0.000000e+00> : vector<24x32xf32>
    %85 = tpu.matmul %84, %69, %cst_28 {dimension_numbers = #tpu.dot_dimension_numbers<[1], [0], [0], [1], [0, 0, 1, 1], [], []>} : vector<24x24xbf16>, vector<24x32xbf16>, vector<24x32xf32> -> vector<24x32xf32>
    %86 = vector.extract_strided_slice %19 {offsets = [0, 96], sizes = [24, 32], strides = [1, 1]} : vector<24x384xf32> to vector<24x32xf32>
    %87 = arith.truncf %86 : vector<24x32xf32> to vector<24x32xbf16>
    %88 = vector.extract_strided_slice %19 {offsets = [0, 224], sizes = [24, 32], strides = [1, 1]} : vector<24x384xf32> to vector<24x32xf32>
    %89 = arith.truncf %88 : vector<24x32xf32> to vector<24x32xbf16>
    %90 = vector.extract_strided_slice %19 {offsets = [0, 352], sizes = [24, 32], strides = [1, 1]} : vector<24x384xf32> to vector<24x32xf32>
    %91 = arith.truncf %90 : vector<24x32xf32> to vector<24x32xbf16>
    %cst_29 = arith.constant dense<0.000000e+00> : vector<24x24xf32>
    %92 = tpu.matmul %87, %89, %cst_29 {dimension_numbers = #tpu.dot_dimension_numbers<[1], [1], [0], [0], [0, 0, 1, 0], [], []>} : vector<24x32xbf16>, vector<24x32xbf16>, vector<24x24xf32> -> vector<24x24xf32>
    %cst_30 = arith.constant 0.176776692 : f32
    %93 = vector.broadcast %cst_30 : f32 to vector<24x24xf32>
    %94 = arith.mulf %92, %93 : vector<24x24xf32>
    %95 = arith.addf %94, %18 : vector<24x24xf32>
    %cst_31 = arith.constant dense<0xFF800000> : vector<24xf32>
    %96 = vector.multi_reduction <maximumf>, %95, %cst_31 [1] : vector<24x24xf32> to vector<24xf32>
    %97 = vector.shape_cast %96 : vector<24xf32> to vector<24x1xf32>
    %98 = vector.broadcast %97 : vector<24x1xf32> to vector<24x24xf32>
    %99 = arith.subf %95, %98 : vector<24x24xf32>
    %100 = math.exp %99 : vector<24x24xf32>
    %cst_32 = arith.constant dense<0.000000e+00> : vector<24xf32>
    %101 = vector.multi_reduction <add>, %100, %cst_32 [1] : vector<24x24xf32> to vector<24xf32>
    %102 = vector.shape_cast %101 : vector<24xf32> to vector<24x1xf32>
    %103 = tpu.reciprocal %102 {approx = true} : vector<24x1xf32> -> vector<24x1xf32>
    %104 = vector.broadcast %103 : vector<24x1xf32> to vector<24x24xf32>
    %105 = arith.mulf %100, %104 : vector<24x24xf32>
    %106 = arith.truncf %105 : vector<24x24xf32> to vector<24x24xbf16>
    %cst_33 = arith.constant dense<0.000000e+00> : vector<24x32xf32>
    %107 = tpu.matmul %106, %91, %cst_33 {dimension_numbers = #tpu.dot_dimension_numbers<[1], [0], [0], [1], [0, 0, 1, 1], [], []>} : vector<24x24xbf16>, vector<24x32xbf16>, vector<24x32xf32> -> vector<24x32xf32>
    %108 = tpu.concatenate %41, %63, %85, %107 in 1 : vector<24x32xf32>, vector<24x32xf32>, vector<24x32xf32>, vector<24x32xf32> -> vector<24x128xf32>
    %c24 = arith.constant 24 : index
    %c0_34 = arith.constant 0 : index
    %109 = vector.load %arg20[%c24, %c0_34] : memref<48x384xf32, #tpu.memory_space<vmem>>, vector<24x384xf32>
    %110 = vector.extract_strided_slice %109 {offsets = [0, 0], sizes = [24, 32], strides = [1, 1]} : vector<24x384xf32> to vector<24x32xf32>
    %111 = arith.truncf %110 : vector<24x32xf32> to vector<24x32xbf16>
    %112 = vector.extract_strided_slice %109 {offsets = [0, 128], sizes = [24, 32], strides = [1, 1]} : vector<24x384xf32> to vector<24x32xf32>
    %113 = arith.truncf %112 : vector<24x32xf32> to vector<24x32xbf16>
    %114 = vector.extract_strided_slice %109 {offsets = [0, 256], sizes = [24, 32], strides = [1, 1]} : vector<24x384xf32> to vector<24x32xf32>
    %115 = arith.truncf %114 : vector<24x32xf32> to vector<24x32xbf16>
    %cst_35 = arith.constant dense<0.000000e+00> : vector<24x24xf32>
    %116 = tpu.matmul %111, %113, %cst_35 {dimension_numbers = #tpu.dot_dimension_numbers<[1], [1], [0], [0], [0, 0, 1, 0], [], []>} : vector<24x32xbf16>, vector<24x32xbf16>, vector<24x24xf32> -> vector<24x24xf32>
    %cst_36 = arith.constant 0.176776692 : f32
    %117 = vector.broadcast %cst_36 : f32 to vector<24x24xf32>
    %118 = arith.mulf %116, %117 : vector<24x24xf32>
    %119 = arith.addf %118, %18 : vector<24x24xf32>
    %cst_37 = arith.constant dense<0xFF800000> : vector<24xf32>
    %120 = vector.multi_reduction <maximumf>, %119, %cst_37 [1] : vector<24x24xf32> to vector<24xf32>
    %121 = vector.shape_cast %120 : vector<24xf32> to vector<24x1xf32>
    %122 = vector.broadcast %121 : vector<24x1xf32> to vector<24x24xf32>
    %123 = arith.subf %119, %122 : vector<24x24xf32>
    %124 = math.exp %123 : vector<24x24xf32>
    %cst_38 = arith.constant dense<0.000000e+00> : vector<24xf32>
    %125 = vector.multi_reduction <add>, %124, %cst_38 [1] : vector<24x24xf32> to vector<24xf32>
    %126 = vector.shape_cast %125 : vector<24xf32> to vector<24x1xf32>
    %127 = tpu.reciprocal %126 {approx = true} : vector<24x1xf32> -> vector<24x1xf32>
    %128 = vector.broadcast %127 : vector<24x1xf32> to vector<24x24xf32>
    %129 = arith.mulf %124, %128 : vector<24x24xf32>
    %130 = arith.truncf %129 : vector<24x24xf32> to vector<24x24xbf16>
    %cst_39 = arith.constant dense<0.000000e+00> : vector<24x32xf32>
    %131 = tpu.matmul %130, %115, %cst_39 {dimension_numbers = #tpu.dot_dimension_numbers<[1], [0], [0], [1], [0, 0, 1, 1], [], []>} : vector<24x24xbf16>, vector<24x32xbf16>, vector<24x32xf32> -> vector<24x32xf32>
    %132 = vector.extract_strided_slice %109 {offsets = [0, 32], sizes = [24, 32], strides = [1, 1]} : vector<24x384xf32> to vector<24x32xf32>
    %133 = arith.truncf %132 : vector<24x32xf32> to vector<24x32xbf16>
    %134 = vector.extract_strided_slice %109 {offsets = [0, 160], sizes = [24, 32], strides = [1, 1]} : vector<24x384xf32> to vector<24x32xf32>
    %135 = arith.truncf %134 : vector<24x32xf32> to vector<24x32xbf16>
    %136 = vector.extract_strided_slice %109 {offsets = [0, 288], sizes = [24, 32], strides = [1, 1]} : vector<24x384xf32> to vector<24x32xf32>
    %137 = arith.truncf %136 : vector<24x32xf32> to vector<24x32xbf16>
    %cst_40 = arith.constant dense<0.000000e+00> : vector<24x24xf32>
    %138 = tpu.matmul %133, %135, %cst_40 {dimension_numbers = #tpu.dot_dimension_numbers<[1], [1], [0], [0], [0, 0, 1, 0], [], []>} : vector<24x32xbf16>, vector<24x32xbf16>, vector<24x24xf32> -> vector<24x24xf32>
    %cst_41 = arith.constant 0.176776692 : f32
    %139 = vector.broadcast %cst_41 : f32 to vector<24x24xf32>
    %140 = arith.mulf %138, %139 : vector<24x24xf32>
    %141 = arith.addf %140, %18 : vector<24x24xf32>
    %cst_42 = arith.constant dense<0xFF800000> : vector<24xf32>
    %142 = vector.multi_reduction <maximumf>, %141, %cst_42 [1] : vector<24x24xf32> to vector<24xf32>
    %143 = vector.shape_cast %142 : vector<24xf32> to vector<24x1xf32>
    %144 = vector.broadcast %143 : vector<24x1xf32> to vector<24x24xf32>
    %145 = arith.subf %141, %144 : vector<24x24xf32>
    %146 = math.exp %145 : vector<24x24xf32>
    %cst_43 = arith.constant dense<0.000000e+00> : vector<24xf32>
    %147 = vector.multi_reduction <add>, %146, %cst_43 [1] : vector<24x24xf32> to vector<24xf32>
    %148 = vector.shape_cast %147 : vector<24xf32> to vector<24x1xf32>
    %149 = tpu.reciprocal %148 {approx = true} : vector<24x1xf32> -> vector<24x1xf32>
    %150 = vector.broadcast %149 : vector<24x1xf32> to vector<24x24xf32>
    %151 = arith.mulf %146, %150 : vector<24x24xf32>
    %152 = arith.truncf %151 : vector<24x24xf32> to vector<24x24xbf16>
    %cst_44 = arith.constant dense<0.000000e+00> : vector<24x32xf32>
    %153 = tpu.matmul %152, %137, %cst_44 {dimension_numbers = #tpu.dot_dimension_numbers<[1], [0], [0], [1], [0, 0, 1, 1], [], []>} : vector<24x24xbf16>, vector<24x32xbf16>, vector<24x32xf32> -> vector<24x32xf32>
    %154 = vector.extract_strided_slice %109 {offsets = [0, 64], sizes = [24, 32], strides = [1, 1]} : vector<24x384xf32> to vector<24x32xf32>
    %155 = arith.truncf %154 : vector<24x32xf32> to vector<24x32xbf16>
    %156 = vector.extract_strided_slice %109 {offsets = [0, 192], sizes = [24, 32], strides = [1, 1]} : vector<24x384xf32> to vector<24x32xf32>
    %157 = arith.truncf %156 : vector<24x32xf32> to vector<24x32xbf16>
    %158 = vector.extract_strided_slice %109 {offsets = [0, 320], sizes = [24, 32], strides = [1, 1]} : vector<24x384xf32> to vector<24x32xf32>
    %159 = arith.truncf %158 : vector<24x32xf32> to vector<24x32xbf16>
    %cst_45 = arith.constant dense<0.000000e+00> : vector<24x24xf32>
    %160 = tpu.matmul %155, %157, %cst_45 {dimension_numbers = #tpu.dot_dimension_numbers<[1], [1], [0], [0], [0, 0, 1, 0], [], []>} : vector<24x32xbf16>, vector<24x32xbf16>, vector<24x24xf32> -> vector<24x24xf32>
    %cst_46 = arith.constant 0.176776692 : f32
    %161 = vector.broadcast %cst_46 : f32 to vector<24x24xf32>
    %162 = arith.mulf %160, %161 : vector<24x24xf32>
    %163 = arith.addf %162, %18 : vector<24x24xf32>
    %cst_47 = arith.constant dense<0xFF800000> : vector<24xf32>
    %164 = vector.multi_reduction <maximumf>, %163, %cst_47 [1] : vector<24x24xf32> to vector<24xf32>
    %165 = vector.shape_cast %164 : vector<24xf32> to vector<24x1xf32>
    %166 = vector.broadcast %165 : vector<24x1xf32> to vector<24x24xf32>
    %167 = arith.subf %163, %166 : vector<24x24xf32>
    %168 = math.exp %167 : vector<24x24xf32>
    %cst_48 = arith.constant dense<0.000000e+00> : vector<24xf32>
    %169 = vector.multi_reduction <add>, %168, %cst_48 [1] : vector<24x24xf32> to vector<24xf32>
    %170 = vector.shape_cast %169 : vector<24xf32> to vector<24x1xf32>
    %171 = tpu.reciprocal %170 {approx = true} : vector<24x1xf32> -> vector<24x1xf32>
    %172 = vector.broadcast %171 : vector<24x1xf32> to vector<24x24xf32>
    %173 = arith.mulf %168, %172 : vector<24x24xf32>
    %174 = arith.truncf %173 : vector<24x24xf32> to vector<24x24xbf16>
    %cst_49 = arith.constant dense<0.000000e+00> : vector<24x32xf32>
    %175 = tpu.matmul %174, %159, %cst_49 {dimension_numbers = #tpu.dot_dimension_numbers<[1], [0], [0], [1], [0, 0, 1, 1], [], []>} : vector<24x24xbf16>, vector<24x32xbf16>, vector<24x32xf32> -> vector<24x32xf32>
    %176 = vector.extract_strided_slice %109 {offsets = [0, 96], sizes = [24, 32], strides = [1, 1]} : vector<24x384xf32> to vector<24x32xf32>
    %177 = arith.truncf %176 : vector<24x32xf32> to vector<24x32xbf16>
    %178 = vector.extract_strided_slice %109 {offsets = [0, 224], sizes = [24, 32], strides = [1, 1]} : vector<24x384xf32> to vector<24x32xf32>
    %179 = arith.truncf %178 : vector<24x32xf32> to vector<24x32xbf16>
    %180 = vector.extract_strided_slice %109 {offsets = [0, 352], sizes = [24, 32], strides = [1, 1]} : vector<24x384xf32> to vector<24x32xf32>
    %181 = arith.truncf %180 : vector<24x32xf32> to vector<24x32xbf16>
    %cst_50 = arith.constant dense<0.000000e+00> : vector<24x24xf32>
    %182 = tpu.matmul %177, %179, %cst_50 {dimension_numbers = #tpu.dot_dimension_numbers<[1], [1], [0], [0], [0, 0, 1, 0], [], []>} : vector<24x32xbf16>, vector<24x32xbf16>, vector<24x24xf32> -> vector<24x24xf32>
    %cst_51 = arith.constant 0.176776692 : f32
    %183 = vector.broadcast %cst_51 : f32 to vector<24x24xf32>
    %184 = arith.mulf %182, %183 : vector<24x24xf32>
    %185 = arith.addf %184, %18 : vector<24x24xf32>
    %cst_52 = arith.constant dense<0xFF800000> : vector<24xf32>
    %186 = vector.multi_reduction <maximumf>, %185, %cst_52 [1] : vector<24x24xf32> to vector<24xf32>
    %187 = vector.shape_cast %186 : vector<24xf32> to vector<24x1xf32>
    %188 = vector.broadcast %187 : vector<24x1xf32> to vector<24x24xf32>
    %189 = arith.subf %185, %188 : vector<24x24xf32>
    %190 = math.exp %189 : vector<24x24xf32>
    %cst_53 = arith.constant dense<0.000000e+00> : vector<24xf32>
    %191 = vector.multi_reduction <add>, %190, %cst_53 [1] : vector<24x24xf32> to vector<24xf32>
    %192 = vector.shape_cast %191 : vector<24xf32> to vector<24x1xf32>
    %193 = tpu.reciprocal %192 {approx = true} : vector<24x1xf32> -> vector<24x1xf32>
    %194 = vector.broadcast %193 : vector<24x1xf32> to vector<24x24xf32>
    %195 = arith.mulf %190, %194 : vector<24x24xf32>
    %196 = arith.truncf %195 : vector<24x24xf32> to vector<24x24xbf16>
    %cst_54 = arith.constant dense<0.000000e+00> : vector<24x32xf32>
    %197 = tpu.matmul %196, %181, %cst_54 {dimension_numbers = #tpu.dot_dimension_numbers<[1], [0], [0], [1], [0, 0, 1, 1], [], []>} : vector<24x24xbf16>, vector<24x32xbf16>, vector<24x32xf32> -> vector<24x32xf32>
    %198 = tpu.concatenate %131, %153, %175, %197 in 1 : vector<24x32xf32>, vector<24x32xf32>, vector<24x32xf32>, vector<24x32xf32> -> vector<24x128xf32>
    %199 = tpu.concatenate %108, %198 in 0 : vector<24x128xf32>, vector<24x128xf32> -> vector<48x128xf32>
    %200 = arith.truncf %199 : vector<48x128xf32> to vector<48x128xbf16>
    %c0_55 = arith.constant 0 : index
    %c0_56 = arith.constant 0 : index
    %c0_57 = arith.constant 0 : index
    %201 = vector.load %arg4[%c0_55, %c0_56, %c0_57] : memref<1x128x128xbf16, #tpu.memory_space<vmem>>, vector<1x128x128xbf16>
    %202 = vector.shape_cast %201 : vector<1x128x128xbf16> to vector<128x128xbf16>
    %cst_58 = arith.constant dense<0.000000e+00> : vector<48x128xf32>
    %203 = tpu.matmul %200, %202, %cst_58 {dimension_numbers = #tpu.dot_dimension_numbers<[1], [0], [0], [1], [0, 0, 1, 1], [], []>} : vector<48x128xbf16>, vector<128x128xbf16>, vector<48x128xf32> -> vector<48x128xf32>
    %c0_59 = arith.constant 0 : index
    %c0_60 = arith.constant 0 : index
    %c0_61 = arith.constant 0 : index
    %204 = vector.load %arg5[%c0_59, %c0_60, %c0_61] : memref<1x1x128xf32, #tpu.memory_space<vmem>>, vector<1x1x128xf32>
    %205 = vector.shape_cast %204 : vector<1x1x128xf32> to vector<1x128xf32>
    %206 = vector.broadcast %205 : vector<1x128xf32> to vector<48x128xf32>
    %207 = arith.addf %203, %206 : vector<48x128xf32>
    %208 = arith.addf %3, %207 : vector<48x128xf32>
    %c0_62 = arith.constant 0 : index
    %c0_63 = arith.constant 0 : index
    %c0_64 = arith.constant 0 : index
    %209 = vector.load %arg6[%c0_62, %c0_63, %c0_64] : memref<1x1x128xf32, #tpu.memory_space<vmem>>, vector<1x1x128xf32>
    %210 = vector.shape_cast %209 : vector<1x1x128xf32> to vector<1x128xf32>
    %c0_65 = arith.constant 0 : index
    %c0_66 = arith.constant 0 : index
    %c0_67 = arith.constant 0 : index
    %211 = vector.load %arg7[%c0_65, %c0_66, %c0_67] : memref<1x1x128xf32, #tpu.memory_space<vmem>>, vector<1x1x128xf32>
    %212 = vector.shape_cast %211 : vector<1x1x128xf32> to vector<1x128xf32>
    %cst_68 = arith.constant dense<0.000000e+00> : vector<48xf32>
    %213 = vector.multi_reduction <add>, %208, %cst_68 [1] : vector<48x128xf32> to vector<48xf32>
    %214 = vector.shape_cast %213 : vector<48xf32> to vector<48x1xf32>
    %cst_69 = arith.constant 1.280000e+02 : f32
    %215 = vector.broadcast %cst_69 : f32 to vector<48x1xf32>
    %216 = arith.divf %214, %215 : vector<48x1xf32>
    %217 = vector.broadcast %216 : vector<48x1xf32> to vector<48x128xf32>
    %218 = arith.subf %208, %217 : vector<48x128xf32>
    %219 = arith.mulf %218, %218 : vector<48x128xf32>
    %cst_70 = arith.constant dense<0.000000e+00> : vector<48xf32>
    %220 = vector.multi_reduction <add>, %219, %cst_70 [1] : vector<48x128xf32> to vector<48xf32>
    %221 = vector.shape_cast %220 : vector<48xf32> to vector<48x1xf32>
    %cst_71 = arith.constant 1.280000e+02 : f32
    %222 = vector.broadcast %cst_71 : f32 to vector<48x1xf32>
    %223 = arith.divf %221, %222 : vector<48x1xf32>
    %224 = vector.broadcast %216 : vector<48x1xf32> to vector<48x128xf32>
    %225 = arith.subf %208, %224 : vector<48x128xf32>
    %cst_72 = arith.constant 9.99999974E-6 : f32
    %226 = vector.broadcast %cst_72 : f32 to vector<48x1xf32>
    %227 = arith.addf %223, %226 : vector<48x1xf32>
    %228 = math.rsqrt %227 : vector<48x1xf32>
    %229 = vector.broadcast %228 : vector<48x1xf32> to vector<48x128xf32>
    %230 = arith.mulf %225, %229 : vector<48x128xf32>
    %231 = vector.broadcast %210 : vector<1x128xf32> to vector<48x128xf32>
    %232 = arith.mulf %230, %231 : vector<48x128xf32>
    %233 = vector.broadcast %212 : vector<1x128xf32> to vector<48x128xf32>
    %234 = arith.addf %232, %233 : vector<48x128xf32>
    %235 = arith.truncf %234 : vector<48x128xf32> to vector<48x128xbf16>
    %c0_73 = arith.constant 0 : index
    %c0_74 = arith.constant 0 : index
    %c0_75 = arith.constant 0 : index
    %236 = vector.load %arg8[%c0_73, %c0_74, %c0_75] : memref<1x128x256xbf16, #tpu.memory_space<vmem>>, vector<1x128x256xbf16>
    %237 = vector.shape_cast %236 : vector<1x128x256xbf16> to vector<128x256xbf16>
    %cst_76 = arith.constant dense<0.000000e+00> : vector<48x256xf32>
    %238 = tpu.matmul %235, %237, %cst_76 {dimension_numbers = #tpu.dot_dimension_numbers<[1], [0], [0], [1], [0, 0, 1, 1], [], []>} : vector<48x128xbf16>, vector<128x256xbf16>, vector<48x256xf32> -> vector<48x256xf32>
    %c0_77 = arith.constant 0 : index
    %c0_78 = arith.constant 0 : index
    %c0_79 = arith.constant 0 : index
    %239 = vector.load %arg9[%c0_77, %c0_78, %c0_79] : memref<1x1x256xf32, #tpu.memory_space<vmem>>, vector<1x1x256xf32>
    %240 = vector.shape_cast %239 : vector<1x1x256xf32> to vector<1x256xf32>
    %241 = vector.broadcast %240 : vector<1x256xf32> to vector<48x256xf32>
    %242 = arith.addf %238, %241 : vector<48x256xf32>
    %cst_80 = arith.constant 5.000000e-01 : f32
    %243 = vector.broadcast %cst_80 : f32 to vector<48x256xf32>
    %244 = arith.mulf %243, %242 : vector<48x256xf32>
    %cst_81 = arith.constant 4.471500e-02 : f32
    %245 = vector.broadcast %cst_81 : f32 to vector<48x256xf32>
    %246 = arith.mulf %245, %242 : vector<48x256xf32>
    %247 = arith.mulf %246, %242 : vector<48x256xf32>
    %248 = arith.mulf %247, %242 : vector<48x256xf32>
    %249 = arith.addf %242, %248 : vector<48x256xf32>
    %cst_82 = arith.constant 0.797884583 : f32
    %250 = vector.broadcast %cst_82 : f32 to vector<48x256xf32>
    %251 = arith.mulf %250, %249 : vector<48x256xf32>
    %252 = math.tanh %251 : vector<48x256xf32>
    %cst_83 = arith.constant 1.000000e+00 : f32
    %253 = vector.broadcast %cst_83 : f32 to vector<48x256xf32>
    %254 = arith.addf %253, %252 : vector<48x256xf32>
    %255 = arith.mulf %244, %254 : vector<48x256xf32>
    %256 = arith.truncf %255 : vector<48x256xf32> to vector<48x256xbf16>
    %c0_84 = arith.constant 0 : index
    %c0_85 = arith.constant 0 : index
    %c0_86 = arith.constant 0 : index
    %257 = vector.load %arg10[%c0_84, %c0_85, %c0_86] : memref<1x256x128xbf16, #tpu.memory_space<vmem>>, vector<1x256x128xbf16>
    %258 = vector.shape_cast %257 : vector<1x256x128xbf16> to vector<256x128xbf16>
    %cst_87 = arith.constant dense<0.000000e+00> : vector<48x128xf32>
    %259 = tpu.matmul %256, %258, %cst_87 {dimension_numbers = #tpu.dot_dimension_numbers<[1], [0], [0], [1], [0, 0, 1, 1], [], []>} : vector<48x256xbf16>, vector<256x128xbf16>, vector<48x128xf32> -> vector<48x128xf32>
    %c0_88 = arith.constant 0 : index
    %c0_89 = arith.constant 0 : index
    %c0_90 = arith.constant 0 : index
    %260 = vector.load %arg11[%c0_88, %c0_89, %c0_90] : memref<1x1x128xf32, #tpu.memory_space<vmem>>, vector<1x1x128xf32>
    %261 = vector.shape_cast %260 : vector<1x1x128xf32> to vector<1x128xf32>
    %262 = vector.broadcast %261 : vector<1x128xf32> to vector<48x128xf32>
    %263 = arith.addf %259, %262 : vector<48x128xf32>
    %264 = arith.addf %234, %263 : vector<48x128xf32>
    %c0_91 = arith.constant 0 : index
    %c0_92 = arith.constant 0 : index
    %c0_93 = arith.constant 0 : index
    %265 = vector.load %arg12[%c0_91, %c0_92, %c0_93] : memref<1x1x128xf32, #tpu.memory_space<vmem>>, vector<1x1x128xf32>
    %266 = vector.shape_cast %265 : vector<1x1x128xf32> to vector<1x128xf32>
    %c0_94 = arith.constant 0 : index
    %c0_95 = arith.constant 0 : index
    %c0_96 = arith.constant 0 : index
    %267 = vector.load %arg13[%c0_94, %c0_95, %c0_96] : memref<1x1x128xf32, #tpu.memory_space<vmem>>, vector<1x1x128xf32>
    %268 = vector.shape_cast %267 : vector<1x1x128xf32> to vector<1x128xf32>
    %cst_97 = arith.constant dense<0.000000e+00> : vector<48xf32>
    %269 = vector.multi_reduction <add>, %264, %cst_97 [1] : vector<48x128xf32> to vector<48xf32>
    %270 = vector.shape_cast %269 : vector<48xf32> to vector<48x1xf32>
    %cst_98 = arith.constant 1.280000e+02 : f32
    %271 = vector.broadcast %cst_98 : f32 to vector<48x1xf32>
    %272 = arith.divf %270, %271 : vector<48x1xf32>
    %273 = vector.broadcast %272 : vector<48x1xf32> to vector<48x128xf32>
    %274 = arith.subf %264, %273 : vector<48x128xf32>
    %275 = arith.mulf %274, %274 : vector<48x128xf32>
    %cst_99 = arith.constant dense<0.000000e+00> : vector<48xf32>
    %276 = vector.multi_reduction <add>, %275, %cst_99 [1] : vector<48x128xf32> to vector<48xf32>
    %277 = vector.shape_cast %276 : vector<48xf32> to vector<48x1xf32>
    %cst_100 = arith.constant 1.280000e+02 : f32
    %278 = vector.broadcast %cst_100 : f32 to vector<48x1xf32>
    %279 = arith.divf %277, %278 : vector<48x1xf32>
    %280 = vector.broadcast %272 : vector<48x1xf32> to vector<48x128xf32>
    %281 = arith.subf %264, %280 : vector<48x128xf32>
    %cst_101 = arith.constant 9.99999974E-6 : f32
    %282 = vector.broadcast %cst_101 : f32 to vector<48x1xf32>
    %283 = arith.addf %279, %282 : vector<48x1xf32>
    %284 = math.rsqrt %283 : vector<48x1xf32>
    %285 = vector.broadcast %284 : vector<48x1xf32> to vector<48x128xf32>
    %286 = arith.mulf %281, %285 : vector<48x128xf32>
    %287 = vector.broadcast %266 : vector<1x128xf32> to vector<48x128xf32>
    %288 = arith.mulf %286, %287 : vector<48x128xf32>
    %289 = vector.broadcast %268 : vector<1x128xf32> to vector<48x128xf32>
    %290 = arith.addf %288, %289 : vector<48x128xf32>
    %c0_102 = arith.constant 0 : index
    %c0_103 = arith.constant 0 : index
    %291 = vector.load %arg19[%c0_102, %c0_103] : memref<48x128xf32, #tpu.memory_space<vmem>>, vector<48x128xf32>
    tpu.vector_store %arg19[%c0_102, %c0_103], %290 {strides = array<i32>} : memref<48x128xf32, #tpu.memory_space<vmem>>, vector<48x128xf32>,
    %c1_i32 = arith.constant 1 : i32
    %292 = arith.cmpi eq, %arg0, %c1_i32 : i32
    %293 = arith.extui %292 : i1 to i32
    %c0_i32_104 = arith.constant 0 : i32
    %294 = arith.cmpi ne, %293, %c0_i32_104 : i32
    scf.if %294 {
      %295 = vector.extract_strided_slice %290 {offsets = [0, 0], sizes = [1, 128], strides = [1, 1]} : vector<48x128xf32> to vector<1x128xf32>
      %296 = vector.extract_strided_slice %290 {offsets = [24, 0], sizes = [1, 128], strides = [1, 1]} : vector<48x128xf32> to vector<1x128xf32>
      %297 = tpu.concatenate %295, %296 in 0 : vector<1x128xf32>, vector<1x128xf32> -> vector<2x128xf32>
      %c0_105 = arith.constant 0 : index
      %c0_106 = arith.constant 0 : index
      %298 = vector.load %arg14[%c0_105, %c0_106] : memref<1x128xf32, #tpu.memory_space<vmem>>, vector<1x128xf32>
      %c0_107 = arith.constant 0 : index
      %c0_108 = arith.constant 0 : index
      %299 = vector.load %arg15[%c0_107, %c0_108] : memref<1x128xf32, #tpu.memory_space<vmem>>, vector<1x128xf32>
      %cst_109 = arith.constant dense<0.000000e+00> : vector<2xf32>
      %300 = vector.multi_reduction <add>, %297, %cst_109 [1] : vector<2x128xf32> to vector<2xf32>
      %301 = vector.shape_cast %300 : vector<2xf32> to vector<2x1xf32>
      %cst_110 = arith.constant 1.280000e+02 : f32
      %302 = vector.broadcast %cst_110 : f32 to vector<2x1xf32>
      %303 = arith.divf %301, %302 : vector<2x1xf32>
      %304 = vector.broadcast %303 : vector<2x1xf32> to vector<2x128xf32>
      %305 = arith.subf %297, %304 : vector<2x128xf32>
      %306 = arith.mulf %305, %305 : vector<2x128xf32>
      %cst_111 = arith.constant dense<0.000000e+00> : vector<2xf32>
      %307 = vector.multi_reduction <add>, %306, %cst_111 [1] : vector<2x128xf32> to vector<2xf32>
      %308 = vector.shape_cast %307 : vector<2xf32> to vector<2x1xf32>
      %cst_112 = arith.constant 1.280000e+02 : f32
      %309 = vector.broadcast %cst_112 : f32 to vector<2x1xf32>
      %310 = arith.divf %308, %309 : vector<2x1xf32>
      %311 = vector.broadcast %303 : vector<2x1xf32> to vector<2x128xf32>
      %312 = arith.subf %297, %311 : vector<2x128xf32>
      %cst_113 = arith.constant 9.99999974E-6 : f32
      %313 = vector.broadcast %cst_113 : f32 to vector<2x1xf32>
      %314 = arith.addf %310, %313 : vector<2x1xf32>
      %315 = math.rsqrt %314 : vector<2x1xf32>
      %316 = vector.broadcast %315 : vector<2x1xf32> to vector<2x128xf32>
      %317 = arith.mulf %312, %316 : vector<2x128xf32>
      %318 = vector.broadcast %298 : vector<1x128xf32> to vector<2x128xf32>
      %319 = arith.mulf %317, %318 : vector<2x128xf32>
      %320 = vector.broadcast %299 : vector<1x128xf32> to vector<2x128xf32>
      %321 = arith.addf %319, %320 : vector<2x128xf32>
      %322 = arith.truncf %321 : vector<2x128xf32> to vector<2x128xbf16>
      %c0_114 = arith.constant 0 : index
      %c0_115 = arith.constant 0 : index
      %323 = vector.load %arg16[%c0_114, %c0_115] : memref<128x128xbf16, #tpu.memory_space<vmem>>, vector<128x128xbf16>
      %cst_116 = arith.constant dense<0.000000e+00> : vector<2x128xf32>
      %324 = tpu.matmul %322, %323, %cst_116 {dimension_numbers = #tpu.dot_dimension_numbers<[1], [0], [0], [1], [0, 0, 1, 1], [], []>} : vector<2x128xbf16>, vector<128x128xbf16>, vector<2x128xf32> -> vector<2x128xf32>
      %c0_117 = arith.constant 0 : index
      %c0_118 = arith.constant 0 : index
      %325 = vector.load %arg17[%c0_117, %c0_118] : memref<1x128xf32, #tpu.memory_space<vmem>>, vector<1x128xf32>
      %326 = vector.broadcast %325 : vector<1x128xf32> to vector<2x128xf32>
      %327 = arith.addf %324, %326 : vector<2x128xf32>
      %c0_119 = arith.constant 0 : index
      %c0_120 = arith.constant 0 : index
      %328 = vector.load %arg18[%c0_119, %c0_120] : memref<2x128xf32, #tpu.memory_space<vmem>>, vector<2x128xf32>
      tpu.vector_store %arg18[%c0_119, %c0_120], %327 {strides = array<i32>} : memref<2x128xf32, #tpu.memory_space<vmem>>, vector<2x128xf32>,
    } else {
    }
    return
  }
  func.func @transform_0(%arg0: i32) -> (i32, i32) {
    %c0_i32 = arith.constant 0 : i32
    %c0_i32_0 = arith.constant 0 : i32
    %c0_i32_1 = arith.constant 0 : i32
    return %c0_i32, %c0_i32_0 : i32, i32
  }
  func.func @transform_1(%arg0: i32) -> (i32, i32, i32) {
    %c0_i32 = arith.constant 0 : i32
    %c0_i32_0 = arith.constant 0 : i32
    %c0_i32_1 = arith.constant 0 : i32
    return %arg0, %c0_i32, %c0_i32_0 : i32, i32, i32
  }
  func.func @transform_2(%arg0: i32) -> (i32, i32, i32) {
    %c0_i32 = arith.constant 0 : i32
    %c0_i32_0 = arith.constant 0 : i32
    %c0_i32_1 = arith.constant 0 : i32
    return %arg0, %c0_i32, %c0_i32_0 : i32, i32, i32
  }
  func.func @transform_3(%arg0: i32) -> (i32, i32, i32) {
    %c0_i32 = arith.constant 0 : i32
    %c0_i32_0 = arith.constant 0 : i32
    %c0_i32_1 = arith.constant 0 : i32
    return %arg0, %c0_i32, %c0_i32_0 : i32, i32, i32
  }
  func.func @transform_4(%arg0: i32) -> (i32, i32, i32) {
    %c0_i32 = arith.constant 0 : i32
    %c0_i32_0 = arith.constant 0 : i32
    %c0_i32_1 = arith.constant 0 : i32
    return %arg0, %c0_i32, %c0_i32_0 : i32, i32, i32
  }
  func.func @transform_5(%arg0: i32) -> (i32, i32, i32) {
    %c0_i32 = arith.constant 0 : i32
    %c0_i32_0 = arith.constant 0 : i32
    %c0_i32_1 = arith.constant 0 : i32
    return %arg0, %c0_i32, %c0_i32_0 : i32, i32, i32
  }
  func.func @transform_6(%arg0: i32) -> (i32, i32, i32) {
    %c0_i32 = arith.constant 0 : i32
    %c0_i32_0 = arith.constant 0 : i32
    %c0_i32_1 = arith.constant 0 : i32
    return %arg0, %c0_i32, %c0_i32_0 : i32, i32, i32
  }
  func.func @transform_7(%arg0: i32) -> (i32, i32, i32) {
    %c0_i32 = arith.constant 0 : i32
    %c0_i32_0 = arith.constant 0 : i32
    %c0_i32_1 = arith.constant 0 : i32
    return %arg0, %c0_i32, %c0_i32_0 : i32, i32, i32
  }
  func.func @transform_8(%arg0: i32) -> (i32, i32, i32) {
    %c0_i32 = arith.constant 0 : i32
    %c0_i32_0 = arith.constant 0 : i32
    %c0_i32_1 = arith.constant 0 : i32
    return %arg0, %c0_i32, %c0_i32_0 : i32, i32, i32
  }
  func.func @transform_9(%arg0: i32) -> (i32, i32, i32) {
    %c0_i32 = arith.constant 0 : i32
    %c0_i32_0 = arith.constant 0 : i32
    %c0_i32_1 = arith.constant 0 : i32
    return %arg0, %c0_i32, %c0_i32_0 : i32, i32, i32
  }
  func.func @transform_10(%arg0: i32) -> (i32, i32, i32) {
    %c0_i32 = arith.constant 0 : i32
    %c0_i32_0 = arith.constant 0 : i32
    %c0_i32_1 = arith.constant 0 : i32
    return %arg0, %c0_i32, %c0_i32_0 : i32, i32, i32
  }
  func.func @transform_11(%arg0: i32) -> (i32, i32, i32) {
    %c0_i32 = arith.constant 0 : i32
    %c0_i32_0 = arith.constant 0 : i32
    %c0_i32_1 = arith.constant 0 : i32
    return %arg0, %c0_i32, %c0_i32_0 : i32, i32, i32
  }
  func.func @transform_12(%arg0: i32) -> (i32, i32, i32) {
    %c0_i32 = arith.constant 0 : i32
    %c0_i32_0 = arith.constant 0 : i32
    %c0_i32_1 = arith.constant 0 : i32
    return %arg0, %c0_i32, %c0_i32_0 : i32, i32, i32
  }
  func.func @transform_13(%arg0: i32) -> (i32, i32) {
    %c0_i32 = arith.constant 0 : i32
    %c0_i32_0 = arith.constant 0 : i32
    %c0_i32_1 = arith.constant 0 : i32
    return %c0_i32, %c0_i32_0 : i32, i32
  }
  func.func @transform_14(%arg0: i32) -> (i32, i32) {
    %c0_i32 = arith.constant 0 : i32
    %c0_i32_0 = arith.constant 0 : i32
    %c0_i32_1 = arith.constant 0 : i32
    return %c0_i32, %c0_i32_0 : i32, i32
  }
  func.func @transform_15(%arg0: i32) -> (i32, i32) {
    %c0_i32 = arith.constant 0 : i32
    %c0_i32_0 = arith.constant 0 : i32
    %c0_i32_1 = arith.constant 0 : i32
    return %c0_i32, %c0_i32_0 : i32, i32
  }
  func.func @transform_16(%arg0: i32) -> (i32, i32) {
    %c0_i32 = arith.constant 0 : i32
    %c0_i32_0 = arith.constant 0 : i32
    %c0_i32_1 = arith.constant 0 : i32
    return %c0_i32, %c0_i32_0 : i32, i32
  }
  func.func @transform_17(%arg0: i32) -> (i32, i32) {
    %c0_i32 = arith.constant 0 : i32
    %c0_i32_0 = arith.constant 0 : i32
    %c0_i32_1 = arith.constant 0 : i32
    return %c0_i32, %c0_i32_0 : i32, i32
  }
}

</mosaic_0001>

<bundles_post_ra>
// kernel: vit_forward.2
= control target key start
LH: loop header
LB: loop body
LE: loop exit
PB: predicated region body
PF: predicated region fallthrough
CT: control target
= control target key end

     0   :  { %v187_v0 = vmov 0.0   ;;  %vm188_vm0 = vmmov 0   ;;  %vm62_vm1 = vcmask 523264   ;;  %s278_s1 = inlined_call_operand.vmem [shape: bf16[64,128], index: 1, kind: input, shape index: {}]   ;;  %s279_s0 = inlined_call_operand.vmem [shape: f32[48,64], index: 0, kind: input, shape index: {}]   ;;  %s280_s2 = inlined_call_operand.vmem [shape: f32[48,128], index: 2, kind: input, shape index: {}]   ;;  %s281_s3 = inlined_call_operand.vmem [shape: f32[48,128], index: 3, kind: output, shape index: {}]  }
   0x1   :  { %173 = vmatprep.subr.bf16.mxu1 %v187_v0  ;;  %v183_v1 = vld [vmem:[%s278_s1 + $0x18] sm:$0xff]   ;;  %153 = vmatprep.subr.bf16.mxu0 %v187_v0  ;;  %v184_v2 = vld [vmem:[%s278_s1 + $0x10] sm:$0xff]   ;;  %v185_v3 = vld [vmem:[%s278_s1 + $0x8] sm:$0xff]  }
   0x2   :  { %165 = vmatprep.mubr.msk.bf16.mxu1 %vm188_vm0, %v187_v0  ;;  %161 = vmatprep.mubr.msk.bf16.mxu0 %vm188_vm0, %v187_v0  ;;  %v186_v4 = vld [vmem:[%s278_s1] sm:$0xff]   ;;  %v17_v5 = vld [vmem:[%s279_s0 + $0x10] sm:$0xff]  ;;  %v18_v6 = vld [vmem:[%s279_s0 + $0x18] sm:$0xff] }
   0x3   :  { %177 = vmatpush3.bf16.msra.mxu1 %v183_v1  ;;  %154 = vmatpush3.bf16.msra.mxu0 %v183_v1  ;;  %v15_v7 = vld [vmem:[%s279_s0] sm:$0xff]  ;;  %v16_v8 = vld [vmem:[%s279_s0 + $0x8] sm:$0xff]  ;;  %v22_v9 = vpack.c.bf16 %v18_v6, %v17_v5  ;;  %v34_v14 = vld [vmem:[%s280_s2 + $0x10] sm:$0xff] }
   0x4   :  { %174 = vmatprep.subr.bf16.mxu1 %v187_v0  ;;  %155 = vmatprep.subr.bf16.mxu0 %v187_v0  ;;  %v21_v10 = vpack.c.bf16 %v16_v8, %v15_v7  ;;  %v19_v11 = vld [vmem:[%s279_s0 + $0x20] sm:$0xff]  ;;  %v20_v12 = vld [vmem:[%s279_s0 + $0x28] sm:$0xff]  ;;  %v35_v22 = vld [vmem:[%s280_s2 + $0x18] sm:$0xff] }
   0x5   :  { %v23_v13 = vpack.c.bf16 %v20_v12, %v19_v11  ;;  %v32_v15 = vld [vmem:[%s280_s2] sm:$0xff]  ;;  %v33_v23 = vld [vmem:[%s280_s2 + $0x8] sm:$0xff] }
   0x6   :  { %v36_v30 = vld [vmem:[%s280_s2 + $0x20] sm:$0xff]  ;;  %v37_v34 = vld [vmem:[%s280_s2 + $0x28] sm:$0xff] }
   0x7   :  { %178 = vmatpush3.bf16.msra.mxu1 %v184_v2  ;;  %156 = vmatpush3.bf16.msra.mxu0 %v184_v2 }
   0x8   :  { %175 = vmatprep.subr.bf16.mxu1 %v187_v0  ;;  %157 = vmatprep.subr.bf16.mxu0 %v187_v0 }
   0xb   :  { %179 = vmatpush3.bf16.msra.mxu1 %v185_v3  ;;  %158 = vmatpush3.bf16.msra.mxu0 %v185_v3 }
   0xc   :  { %176 = vmatprep.subr.bf16.mxu1 %v187_v0  ;;  %159 = vmatprep.subr.bf16.mxu0 %v187_v0 }
   0xf   :  { %180 = vmatpush3.bf16.msra.mxu1 %v186_v4  ;;  %160 = vmatpush3.bf16.msra.mxu0 %v186_v4 }
  0x12   :  { %166 = vmatmul.mubr.msk.bf16.vlgmr.msra.gmra.mxu1 %vm62_vm1, %v22_v9  ;;  %162 = vmatmul.mubr.msk.bf16.vlgmr.msra.gmra.mxu0 %vm62_vm1, %v21_v10 }
  0x13   :  { %169 = vmatprep.mubr.msk.bf16.mxu1 %vm188_vm0, %v187_v0 }
  0x1a   :  { %170 = vmatmul.mubr.msk.bf16.gmra.mxu1 %vm62_vm1, %v23_v13 }
  0xd2   :  { %v114_v16 = vpop.f32.mrf.mxu1  ;;  %v106_v17 = vpop.f32.mrf.mxu0 }
  0xd3   :  { %v115_v18 = vadd.f32 %v114_v16, %v34_v14  ;;  %v107_v19 = vadd.f32 %v106_v17, %v32_v15 }
  0xd4   :  { %v167_v20 = vpop.f32.mrf.mxu1  ;;  %v163_v21 = vpop.f32.mrf.mxu0 }
  0xd5   :  { %131 = vst [vmem:[%s281_s3 + $0x10] sm:$0xff] %v115_v18  ;;  %129 = vst [vmem:[%s281_s3] sm:$0xff] %v107_v19 }
  0xd6   :  { %v117_v24 = vpop.f32.mrf.mxu1  ;;  %v109_v25 = vpop.f32.mrf.mxu0 }
  0xd7   :  { %v118_v26 = vadd.f32 %v117_v24, %v35_v22  ;;  %v110_v27 = vadd.f32 %v109_v25, %v33_v23 }
  0xd8   :  { %v168_v28 = vpop.f32.mrf.mxu1  ;;  %v164_v29 = vpop.f32.mrf.mxu0 }
  0xd9   :  { %132 = vst [vmem:[%s281_s3 + $0x18] sm:$0xff] %v118_v26  ;;  %130 = vst [vmem:[%s281_s3 + $0x8] sm:$0xff] %v110_v27 }
  0xda   :  { %v122_v31 = vpop.f32.mrf.mxu1 }
  0xdb   :  { %v123_v32 = vadd.f32 %v122_v31, %v36_v30 }
  0xdc   :  { %v171_v33 = vpop.f32.mrf.mxu1 }
  0xdd   :  { %133 = vst [vmem:[%s281_s3 + $0x20] sm:$0xff] %v123_v32 }
  0xde   :  { %v125_v35 = vpop.f32.mrf.mxu1 }
  0xdf   :  { %v126_v36 = vadd.f32 %v125_v35, %v37_v34 }
  0xe0   :  { %v172_v37 = vpop.f32.mrf.mxu1 }
  0xe1   :  { %134 = vst [vmem:[%s281_s3 + $0x28] sm:$0xff] %v126_v36 }

// kernel: vit_forward.3
= control target key start
LH: loop header
LB: loop body
LE: loop exit
PB: predicated region body
PF: predicated region fallthrough
CT: control target
= control target key end

     0   :  { %s5434_s0 = inlined_call_operand.vmem [shape: f32[48,128], index: 0, kind: input, shape index: {}]   ;;  %s5435_s1 = inlined_call_operand.vmem [shape: bf16[2,128,384], index: 1, kind: input, shape index: {}]   ;;  %s5436_s2 = inlined_call_operand.vmem [shape: f32[2,1,384], index: 2, kind: input, shape index: {}]   ;;  %s5437_s3 = inlined_call_operand.vmem [shape: bf16[2,128,128], index: 3, kind: input, shape index: {}]   ;;  %s5438_s4 = inlined_call_operand.vmem [shape: f32[2,1,128], index: 4, kind: input, shape index: {}]   ;;  %s5439_s5 = inlined_call_operand.vmem [shape: f32[2,1,128], index: 5, kind: input, shape index: {}]   ;;  %s5440_s6 = inlined_call_operand.vmem [shape: f32[2,1,128], index: 6, kind: input, shape index: {}]   ;;  %s5441_s7 = inlined_call_operand.vmem [shape: bf16[2,128,256], index: 7, kind: input, shape index: {}]   ;;  %s5442_s8 = inlined_call_operand.vmem [shape: f32[2,1,256], index: 8, kind: input, shape index: {}]   ;;  %s5443_s9 = inlined_call_operand.vmem [shape: bf16[2,256,128], index: 9, kind: input, shape index: {}]   ;;  %s5444_s10 = inlined_call_operand.vmem [shape: f32[2,1,128], index: 10, kind: input, shape index: {}]   ;;  %s5445_s11 = inlined_call_operand.vmem [shape: f32[2,1,128], index: 11, kind: input, shape index: {}]   ;;  %s5446_s12 = inlined_call_operand.vmem [shape: f32[2,1,128], index: 12, kind: input, shape index: {}]   ;;  %s5447_s13 = inlined_call_operand.vmem [shape: f32[1,128], index: 13, kind: input, shape index: {}]   ;;  %s5448_s14 = inlined_call_operand.vmem [shape: f32[1,128], index: 14, kind: input, shape index: {}]   ;;  %s5449_s15 = inlined_call_operand.vmem [shape: bf16[128,128], index: 15, kind: input, shape index: {}]   ;;  %s5450_s16 = inlined_call_operand.vmem [shape: f32[1,128], index: 16, kind: input, shape index: {}]   ;;  %s5451_s17 = inlined_call_operand.hbm [shape: f32[2,128], index: 17, kind: output, shape index: {}]  }
   0x1   :  { %5455 = sst [smem:[#allocation8_spill]] %s5434_s0 }
   0x2   :  { %5456 = sst [smem:[#allocation9_spill]] %s5435_s1 }
   0x3   :  { %5457 = sst [smem:[#allocation10_spill]] %s5436_s2 }
   0x4   :  { %5458 = sst [smem:[#allocation11_spill]] %s5437_s3 }
   0x5   :  { %5459 = sst [smem:[#allocation12_spill]] %s5441_s7 }
   0x6   :  { %5460 = sst [smem:[#allocation13_spill]] %s5447_s13 }
   0x7   :  { %5461 = sst [smem:[#allocation14_spill]] %s5448_s14 }
   0x8   :  { %5462 = sst [smem:[#allocation15_spill]] %s5449_s15 }
   0x9   :  { %5463 = sst [smem:[#allocation16_spill]] %s5450_s16 }
   0xa   :  { %5464 = sst [smem:[#allocation17_spill]] %s5451_s17 }
   0xb   :  { %22 = vsyncpa [#allocation5], 0  ;;  %s4601_s24 = smov 0  }
   0xc LB: > { %5465 = sst [smem:[#allocation7_spill]] %s4499_s24  ;;  %s4607_s25 = sadd.s32 4294967295, %s4499_s24   ;;  %s4499_s24 = sphi %s4601_s24, %s28_s24  }
   0xd   : > { %p3666_p0 = scmp.ge.s32.totalorder %s4499_s24, 1  ;;  %p579_p1 = scmp.lt.s32.totalorder %s4499_s24, 3 }
   0xf   : > { %p580_p2 = pnand %p3666_p0, %p579_p1 }
  0x10   : > { %p667_p3 = scmp.lt.s32.totalorder (!%p580_p2), %s4607_s25, 1  ;;  %s5466_s3 = sld [smem:[#allocation11_spill]] (!%p580_p2) }
  0x11   : > { %583 = sbr.rel (%p580_p2) target bundleno = 6674 (0x1a12), region = 88  ;;  %s5467_s20 = sld [smem:[#allocation9_spill]] (!%p580_p2) }
  0x12   : > { %s5468_s2 = sld [smem:[#allocation10_spill]] (!%p580_p2)  ;;  %p3675_p4 = scmp.ne.s32.totalorder (!%p580_p2), %s4607_s25, 0 }
  0x13   : > { %s5469_s7 = sld [smem:[#allocation12_spill]] (!%p580_p2) }
  0x16   : > { %s4613_s26 = scalar_select %p667_p3, %s4607_s25, 1 }
  0x17   : > { %s5470_s23 = sld [smem:[#allocation8_spill]] (!%p3675_p4) }
  0x18   : > { %s4154_s27 = smul.u32 192, %s4613_s26  ;;  %s3794_s28 = sshll.u32 %s4613_s26, 6 }
  0x19   : > { %s4155_s29 = smul.u32 3, %s4613_s26  ;;  %s4621_s18 = scalar_lea.vmem %s5466_s3, %s3794_s28 }
  0x1a   : > { %s4626_s21 = scalar_lea.vmem %s5467_s20, %s4154_s27  ;;  %s3795_s19 = sshll.u32 %s4613_s26, 7 }
  0x1b   : > { %s4635_s14 = scalar_lea.vmem %s5468_s2, %s4155_s29  ;;  %s4649_s20 = scalar_lea.vmem %s5469_s7, %s3795_s19 }
  0x1c   : > { %s3672_s22 = sshll.u32 %s4613_s26, 1  ;;  %s4660_s13 = scalar_lea.vmem %s5443_s9, %s3795_s19 }
  0x1d   : > { %s4655_s16 = scalar_lea.vmem %s5442_s8, %s3672_s22  ;;  %s706_s30 = scalar_lea.vmem %s5444_s10, %s4613_s26 }
  0x1e   : > { %s709_s27 = scalar_lea.vmem %s5445_s11, %s4613_s26  ;;  %s712_s7 = scalar_lea.vmem %s5446_s12, %s4613_s26 }
  0x1f   : > { %717 = sbr.rel (%p3675_p4) target bundleno = 40 (0x28), region = 92 }
  0x24   : > { %v718_v0 = vld [vmem:[%s5470_s23] sm:$0xff]  ;;  %v719_v1 = vld [vmem:[%s5470_s23 + $0x8] sm:$0xff]  ;;  %v720_v2 = vld [vmem:[%s5470_s23 + $0x10] sm:$0xff] }
  0x25   : > { %724 = vst [vmem:[#allocation2 + $0x28] sm:$0xff] %v718_v0  ;;  %725 = vst [vmem:[#allocation2 + $0x10] sm:$0xff] %v719_v1  ;;  %v721_v3 = vld [vmem:[%s5470_s23 + $0x18] sm:$0xff]  ;;  %v722_v4 = vld [vmem:[%s5470_s23 + $0x20] sm:$0xff] }
  0x26   : > { %726 = vst [vmem:[#allocation2 + $0x8] sm:$0xff] %v720_v2  ;;  %v723_v5 = vld [vmem:[%s5470_s23 + $0x28] sm:$0xff]  ;;  %727 = vst [vmem:[#allocation2] sm:$0xff] %v721_v3 }
  0x27   : > { %728 = vst [vmem:[#allocation2 + $0x18] sm:$0xff] %v722_v4  ;;  %729 = vst [vmem:[#allocation2 + $0x20] sm:$0xff] %v723_v5 }
  0x28 PF: > { %v4225_v6 = vld [vmem:[%s4626_s21 + $0xac] ss:$12 sps:$4 sm:$0xff]   ;;  %v4227_v7 = vld [vmem:[%s4626_s21 + $0xa8] ss:$12 sps:$4 sm:$0xff]   ;;  %v4501_v8 = vmov 0   ;;  %v773_v32 = vlaneseq  ;;  %vm1073_vm0 = vcmask 261120   ;;  %s5471_s17 = scalar_lea.vmem %s5438_s4, %s4613_s26  ;;  %s5472_s15 = scalar_lea.vmem %s5439_s5, %s4613_s26 }
  0x29   : > { %948 = vmatprep.mubr.bf16.mxu0 %v4501_v8  ;;  %916 = vmatprep.subr.bf16.mxu0 %v4225_v6  ;;  %v4228_v9 = vld [vmem:[%s4626_s21 + $0x94] ss:$12 sps:$4 sm:$0xff]   ;;  %v4230_v10 = vld [vmem:[%s4626_s21 + $0x90] ss:$12 sps:$4 sm:$0xff]   ;;  %v4233_v12 = vld [vmem:[%s4626_s21 + $0x78] ss:$12 sps:$4 sm:$0xff]   ;;  %s5473_s0 = scalar_lea.vmem %s5440_s6, %s4613_s26 }
  0x2a   : > { %917 = vmatpush1.bf16.msra.mxu0 %v4227_v7  ;;  %v4231_v11 = vld [vmem:[%s4626_s21 + $0x7c] ss:$12 sps:$4 sm:$0xff]   ;;  %v4234_v13 = vld [vmem:[%s4626_s21 + $0x64] ss:$12 sps:$4 sm:$0xff]   ;;  %v4236_v14 = vld [vmem:[%s4626_s21 + $0x60] ss:$12 sps:$4 sm:$0xff]  }
  0x2b   : > { %918 = vmatprep.subr.bf16.mxu0 %v4228_v9  ;;  %v4237_v15 = vld [vmem:[%s4626_s21 + $0x4c] ss:$12 sps:$4 sm:$0xff]   ;;  %v4239_v16 = vld [vmem:[%s4626_s21 + $0x48] ss:$12 sps:$4 sm:$0xff]   ;;  %v4242_v18 = vld [vmem:[%s4626_s21 + $0x30] ss:$12 sps:$4 sm:$0xff]  }
  0x2c   : > { %v4240_v17 = vld [vmem:[%s4626_s21 + $0x34] ss:$12 sps:$4 sm:$0xff]   ;;  %v4243_v19 = vld [vmem:[%s4626_s21 + $0x1c] ss:$12 sps:$4 sm:$0xff]   ;;  %v4245_v20 = vld [vmem:[%s4626_s21 + $0x18] ss:$12 sps:$4 sm:$0xff]  }
  0x2d   : > { %v4246_v21 = vld [vmem:[%s4626_s21 + $0x4] ss:$12 sps:$4 sm:$0xff]   ;;  %v4248_v22 = vld [vmem:[%s4626_s21] ss:$12 sps:$4 sm:$0xff]   ;;  %v4722_v33 = vshrl.u32 %v773_v32, 7  ;;  %v4502_v6 = vmov 0.0  }
  0x2e   : > { %919 = vmatpush1.bf16.msra.mxu0 %v4230_v10  ;;  %v730_v23 = vld [vmem:[#allocation2 + $0x28] sm:$0xff]  ;;  %v731_v24 = vld [vmem:[#allocation2 + $0x10] sm:$0xff]  ;;  %v733_v27 = vld [vmem:[#allocation2] sm:$0xff]  ;;  %3926 = vmatprep.subr.bf16.mxu1 %v4502_v6  ;;  %vm4503_vm1 = vmmov 0   ;;  %vm1140_vm3 = vcmask 195584   ;;  %vm1182_vm4 = vcmask 1043456  }
  0x2f   : > { %920 = vmatprep.subr.bf16.mxu0 %v4231_v11  ;;  %v4710_v25 = vpack.c.bf16 %v731_v24, %v730_v23  ;;  %v732_v26 = vld [vmem:[#allocation2 + $0x8] sm:$0xff]  ;;  %v734_v29 = vld [vmem:[#allocation2 + $0x18] sm:$0xff]  ;;  %v735_v30 = vld [vmem:[#allocation2 + $0x20] sm:$0xff]  ;;  %v775_v34 = vsub.s32 0, %v4722_v33  ;;  %v779_v41 = vsub.s32 1, %v4722_v33  ;;  %3942 = vmatprep.mubr.msk.bf16.mxu1 %vm4503_vm1, %v4502_v6  ;;  %s4507_s22 = smov 32  }
  0x30   : > { %v4714_v28 = vpack.c.bf16 %v733_v27, %v732_v26  ;;  %v4718_v31 = vpack.c.bf16 %v735_v30, %v734_v29  ;;  %v4726_v35 = vld [vmem:[%s4635_s14] sm:$0x7]  ;;  %v4249_v5 = vld [vmem:[%s4626_s21 + $0xb0] ss:$12 sps:$4 sm:$0xff]   ;;  %v4250_v7 = vld [vmem:[%s4626_s21 + $0x98] ss:$12 sps:$4 sm:$0xff]  }
  0x31   : > { %v776_v37 = vrot.slane %v4726_v35, %v775_v34  ;;  %v4737_v46 = vrot.slane %v4726_v35, %v779_v41  ;;  %3927 = vmatpush3.bf16.msra.mxu1 %v4249_v5  ;;  %v4251_v9 = vld [vmem:[%s4626_s21 + $0x80] ss:$12 sps:$4 sm:$0xff]   ;;  %v4252_v10 = vld [vmem:[%s4626_s21 + $0x68] ss:$12 sps:$4 sm:$0xff]   ;;  %v4253_v11 = vld [vmem:[%s4626_s21 + $0x50] ss:$12 sps:$4 sm:$0xff]  }
  0x32   : > { %921 = vmatpush1.bf16.msra.mxu0 %v4233_v12  ;;  %3928 = vmatprep.subr.bf16.mxu1 %v4502_v6  ;;  %v4254_v12 = vld [vmem:[%s4626_s21 + $0x38] ss:$12 sps:$4 sm:$0xff]   ;;  %s4505_s14 = smov 96   ;;  %vm1792_vm5 = vcmask 523264   ;;  %vm1796_vm6 = vcmask 785408   ;;  %p3778_p5 = scmp.ne.s32.totalorder %s4607_s25, 1 }
  0x33   : > { %922 = vmatprep.subr.bf16.mxu0 %v4234_v13  ;;  %v4255_v13 = vld [vmem:[%s4626_s21 + $0x20] ss:$12 sps:$4 sm:$0xff]   ;;  %s5475_s1 = sld [smem:[#allocation13_spill]] (!%p3778_p5) }
  0x34   : > { %s5476_s26 = sld [smem:[#allocation14_spill]] (!%p3778_p5) }
  0x35   : > { %3929 = vmatpush3.bf16.msra.mxu1 %v4250_v7 }
  0x36   : > { %923 = vmatpush1.bf16.msra.mxu0 %v4236_v14  ;;  %3930 = vmatprep.subr.bf16.mxu1 %v4502_v6  ;;  %v4256_v14 = vld [vmem:[%s4626_s21 + $0x8] ss:$12 sps:$4 sm:$0xff]   ;;  %s4506_s21 = smov 64  }
  0x37   : > { %924 = vmatprep.subr.bf16.mxu0 %v4237_v15  ;;  %v1055_v15 = vand.u32 127, %v773_v32 }
  0x39   : > { %3931 = vmatpush3.bf16.msra.mxu1 %v4251_v9  ;;  %vm1056_vm2 = vcmp.lt.s32.totalorder %v1055_v15, 17 }
  0x3a   : > { %925 = vmatpush1.bf16.msra.mxu0 %v4239_v16  ;;  %3932 = vmatprep.subr.bf16.mxu1 %v4502_v6 }
  0x3b   : > { %926 = vmatprep.subr.bf16.mxu0 %v4240_v17  ;;  %v4504_v17 = vmov -1e+30  }
  0x3d   : > { %3933 = vmatpush3.bf16.msra.mxu1 %v4252_v10 }
  0x3e   : > { %927 = vmatpush1.bf16.msra.mxu0 %v4242_v18  ;;  %3934 = vmatprep.subr.bf16.mxu1 %v4502_v6  ;;  %v4796_v18 = vsel %vm1056_vm2, 0.0, %v4504_v17 }
  0x3f   : > { %928 = vmatprep.subr.bf16.mxu0 %v4243_v19 }
  0x41   : > { %3935 = vmatpush3.bf16.msra.mxu1 %v4253_v11 }
  0x42   : > { %929 = vmatpush1.bf16.msra.mxu0 %v4245_v20  ;;  %3936 = vmatprep.subr.bf16.mxu1 %v4502_v6 }
  0x43   : > { %930 = vmatprep.subr.bf16.mxu0 %v4246_v21 }
  0x45   : > { %3937 = vmatpush3.bf16.msra.mxu1 %v4254_v12 }
  0x46   : > { %931 = vmatpush1.bf16.msra.mxu0 %v4248_v22  ;;  %3938 = vmatprep.subr.bf16.mxu1 %v4502_v6 }
  0x49   : > { %949 = vmatmul.mubr.bf16.vlgmr.msra.gmra.mxu0 %v4710_v25  ;;  %3939 = vmatpush3.bf16.msra.mxu1 %v4255_v13 }
  0x4a   : > { %958 = vmatprep.mubr.bf16.mxu0 %v4501_v8  ;;  %3940 = vmatprep.subr.bf16.mxu1 %v4502_v6 }
  0x4d   : > { %3941 = vmatpush3.bf16.msra.mxu1 %v4256_v14 }
  0x50   : > { %3943 = vmatmul.mubr.bf16.vlgmr.msra.gmra.mxu1 %v4710_v25 }
  0x51   : > { %959 = vmatmul.mubr.bf16.gmra.mxu0 %v4714_v28  ;;  %3946 = vmatprep.mubr.msk.bf16.mxu1 %vm4503_vm1, %v4502_v6 }
  0x52   : > { %968 = vmatprep.mubr.bf16.mxu0 %v4501_v8 }
  0x58   : > { %3947 = vmatmul.mubr.bf16.gmra.mxu1 %v4714_v28 }
  0x59   : > { %969 = vmatmul.mubr.bf16.gmra.mxu0 %v4718_v31  ;;  %3950 = vmatprep.mubr.msk.bf16.mxu1 %vm4503_vm1, %v4502_v6 }
  0x60   : > { %3951 = vmatmul.mubr.bf16.gmra.mxu1 %v4718_v31 }
 0x109   : > { %v950_v36 = vpop.f32.mrf.mxu0 }
 0x10a   : > { %v951_v40 = vadd.f32 %v950_v36, %v776_v37 }
 0x10b   : > { %v952_v38 = vpop.f32.mrf.mxu0 }
 0x10c   : > { %v953_v51 = vadd.f32 %v952_v38, %v4737_v46 }
 0x10d   : > { %v954_v39 = vpop.f32.mrf.mxu0 }
 0x10e   : > { %v955_v42 = vadd.f32 %v954_v39, %v776_v37 }
 0x10f   : > { %v956_v43 = vpop.f32.mrf.mxu0 }
 0x110   : > { %v4732_v44 = vpack.c.bf16 %v955_v42, %v951_v40  ;;  %v957_v48 = vadd.f32 %v956_v43, %v4737_v46  ;;  %v1013_v32 = vpop.f32.mrf.mxu1 }
 0x111   : > { %v960_v45 = vpop.f32.mrf.mxu0 }
 0x112   : > { %3958 = vmatprep.mubr.msk.bf16.mxu0 %vm1073_vm0, %v4732_v44  ;;  %v4746_v55 = vpack.c.bf16 %v957_v48, %v953_v51  ;;  %v961_v3 = vadd.f32 %v960_v45, %v776_v37  ;;  %v3944_v36 = vpop.f32.mrf.mxu1 }
 0x113   : > { %v962_v47 = vpop.f32.mrf.mxu0 }
 0x114   : > { %v963_v49 = vadd.f32 %v962_v47, %v4737_v46  ;;  %v1081_v2 = vsel %vm1073_vm0, %v4746_v55, 0  ;;  %v4764_v4 = vpack.c.bf16 %v961_v3, %v961_v3 }
 0x115   : > { %v964_v50 = vpop.f32.mrf.mxu0 }
 0x116   : > { %v4744_v52 = vpack.c.bf16 %v963_v49, %v963_v49  ;;  %v965_v53 = vadd.f32 %v964_v50, %v776_v37 }
 0x117   : > { %v966_v54 = vpop.f32.mrf.mxu0 }
 0x118   : > { %v967_v56 = vadd.f32 %v966_v54, %v4737_v46  ;;  %4130 = vmatprep.subr.msk.bf16.mxu0 %vm1073_vm0, %v4744_v52  ;;  %v1084_v57 = vsel %vm1073_vm0, %v4744_v52, 0  ;;  %v783_v54 = vsub.s32 2, %v4722_v33 }
 0x119   : > { %v970_v58 = vpop.f32.mrf.mxu0  ;;  %3955 = vmatpush3.bf16.xpose.msra.mxu0 %v1084_v57 }
 0x11a   : > { %v971_v59 = vadd.f32 %v970_v58, %v776_v37  ;;  %4131 = vmatprep.subr.msk.bf16.mxu0 %vm1073_vm0, %v4746_v55  ;;  %v4807_v58 = vrot.slane %v4726_v35, %v783_v54 }
 0x11b   : > { %v972_v60 = vpop.f32.mrf.mxu0 }
 0x11c   : > { %v4755_v61 = vpack.c.bf16 %v971_v59, %v965_v53  ;;  %v973_v62 = vadd.f32 %v972_v60, %v4737_v46  ;;  %v1014_v3 = vadd.f32 %v1013_v32, %v4807_v58 }
 0x11d   : > { %v974_v63 = vpop.f32.mrf.mxu0 }
 0x11e   : > { %v4758_v0 = vpack.c.bf16 %v973_v62, %v967_v56  ;;  %v4760_v1 = vadd.f32 %v974_v63, %v776_v37  ;;  %v1016_v37 = vpop.f32.mrf.mxu1 }
 0x11f   : > { %v4794_v16 = vpop.f32.mrf.mxu0  ;;  %v1017_v5 = vadd.f32 %v1016_v37, %v4807_v58 }
 0x120   : > { %v3945_v38 = vpop.f32.mrf.mxu1 }
 0x121   : > { %3957 = vmatpush3.bf16.xpose.msra.mxu0 %v1081_v2  ;;  %v4816_v9 = vpack.c.bf16 %v1017_v5, %v1014_v3 }
 0x122   : > { %v1021_v39 = vpop.f32.mrf.mxu1 }
 0x123   : > { %v1022_v2 = vadd.f32 %v1021_v39, %v4807_v58 }
 0x124   : > { %v3948_v40 = vpop.f32.mrf.mxu1 }
 0x125   : > { %v4814_v7 = vpack.c.bf16 %v1022_v2, %v1022_v2 }
 0x126   : > { %v1024_v10 = vpop.f32.mrf.mxu1 }
 0x127   : > { %4132 = vmatprep.subr.msk.bf16.mxu0 %vm1182_vm4, %v4814_v7  ;;  %v1184_v35 = vsel %vm1182_vm4, %v4814_v7, 0  ;;  %v1025_v12 = vadd.f32 %v1024_v10, %v4807_v58 }
 0x128   : > { %3959 = vmatmul.mubr.msk.bf16.vlgmr.msra.gmra.mxu0 %vm1073_vm0, %v4764_v4  ;;  %v3949_v11 = vpop.f32.mrf.mxu1 }
 0x129   : > { %3963 = vmatpush3.bf16.msra.mxu0 %v1184_v35 }
 0x12a   : > { %3964 = vmatprep.subr.bf16.mxu0 %v4816_v9  ;;  %v1029_v13 = vpop.f32.mrf.mxu1 }
 0x12b   : > { %v1030_v14 = vadd.f32 %v1029_v13, %v4807_v58 }
 0x12c   : > { %v3952_v15 = vpop.f32.mrf.mxu1 }
 0x12d   : > { %3965 = vmatpush3.bf16.msra.mxu0 %v4816_v9  ;;  %v4828_v17 = vpack.c.bf16 %v1030_v14, %v1025_v12 }
 0x1e8   : > { %v3960_v19 = vpop.f32.mrf.mxu0 }
 0x1e9   : > { %v1136_v20 = vmul.f32 0.17677669, %v3960_v19 }
 0x1ea   : > { %v1120_v21 = vpop.f32.mrf.mxu0 }
 0x1eb   : > { %v1134_v22 = vmul.f32 0.17677669, %v1120_v21  ;;  %v1139_v23 = vadd.f32 %v1136_v20, %v4796_v18 }
 0x1ec   : > { %v3961_v24 = vpop.f32.mrf.mxu0 }
 0x1ed   : > { %v1147_v25 = vsel %vm1140_vm3, %v1139_v23, -inf  ;;  %v1137_v26 = vadd.f32 %v1134_v22, %v4796_v18 }
 0x1ee   : > { %1148 = vmax.xlane.f32.xlu1 %v1147_v25  ;;  %v1123_v27 = vpop.f32.mrf.mxu0 }
 0x1ef   : > { %v1135_v28 = vmul.f32 0.17677669, %v1123_v27  ;;  %v1141_v29 = vsel %vm1140_vm3, %v1137_v26, -inf }
 0x1f0   : > { %1142 = vmax.xlane.f32.xlu0 %v1141_v29 }
 0x1f1   : > { %v1138_v30 = vadd.f32 %v1135_v28, %v4796_v18 }
 0x1f3   : > { %v1144_v31 = vsel %vm1140_vm3, %v1138_v30, -inf }
 0x1f4   : > { %1145 = vmax.xlane.f32.xlu0 %v1144_v31 }
 0x277   : > { %v1149_v42 = vpop.xlane.xlu1 %1148 }
 0x278   : > { %v1152_v43 = vsub.f32 %v1139_v23, %v1149_v42 }
 0x279   : > { %v1143_v45 = vpop.xlane.xlu0 %1142 }
 0x27a   : > { %v1150_v47 = vsub.f32 %v1137_v26, %v1143_v45  ;;  %v1157_v48 = vmul.f32 1.442695, %v1152_v43 }
 0x27c   : > { %v1153_v49 = vmul.f32 1.442695, %v1150_v47 }
 0x27d   : > { %v1146_v50 = vpop.xlane.xlu0 %1145 }
 0x27e   : > { %4305 = vpow2.f32 %v1153_v49  ;;  %v1151_v51 = vsub.f32 %v1138_v30, %v1146_v50 }
 0x27f   : > { %4307 = vpow2.f32 %v1157_v48 }
 0x280   : > { %v1155_v53 = vmul.f32 1.442695, %v1151_v51 }
 0x282   : > { %4309 = vpow2.f32 %v1155_v53 }
 0x28b   : > { %v4306_v56 = vpop.eup %4305 }
 0x28c   : > { %v1159_v57 = vsel %vm1140_vm3, %v4306_v56, 0.0  ;;  %v4308_v59 = vpop.eup %4307 }
 0x28d   : > { %1160 = vadd.xlane.f32.xlu1 %v1159_v57  ;;  %v1165_v62 = vsel %vm1140_vm3, %v4308_v59, 0.0 }
 0x28f   : > { %v4310_v60 = vpop.eup %4309 }
 0x290   : > { %v1162_v63 = vsel %vm1140_vm3, %v4310_v60, 0.0 }
 0x291   : > { %1166 = vadd.xlane.f32.xlu1 %v1165_v62  ;;  %1163 = vadd.xlane.f32.xlu0 %v1162_v63 }
 0x2a2   : > { %1242 = vrot.lane.b32.xlu1 %v4746_v55, %s4505_s14 }
 0x2a6   : > { %1236 = vrot.lane.b32.xlu1 %v4732_v44, %s4505_s14 }
 0x2a7   : > { %1244 = vrot.lane.b32.xlu0 %v4744_v52, %s4505_s14 }
 0x2aa   : > { %1238 = vrot.lane.b32.xlu1 %v4764_v4, %s4505_s14 }
 0x316   : > { %v1161_v19 = vpop.xlane.xlu1 %1160 }
 0x317   : > { %4311 = vrcp.f32 %v1161_v19 }
 0x31a   : > { %v1167_v20 = vpop.xlane.xlu1 %1166  ;;  %v1164_v21 = vpop.xlane.xlu0 %1163 }
 0x31b   : > { %4313 = vrcp.f32 %v1167_v20 }
 0x31c   : > { %4315 = vrcp.f32 %v1164_v21 }
 0x31e   : > { %v1245_v22 = vpop.permute.xlu0 %1244  ;;  %v1243_v26 = vpop.permute.xlu1 %1242 }
 0x31f   : > { %4133 = vmatprep.subr.msk.bf16.mxu0 %vm1073_vm0, %v1245_v22  ;;  %v1256_v36 = vsel %vm1073_vm0, %v1245_v22, 0  ;;  %v1253_v37 = vsel %vm1073_vm0, %v1243_v26, 0 }
 0x322   : > { %v1237_v32 = vpop.permute.xlu1 %1236 }
 0x324   : > { %v4312_v23 = vpop.eup %4311 }
 0x325   : > { %v1171_v28 = vmul.f32 %v4312_v23, %v4306_v56  ;;  %v4871_v23 = vpop.f32.mrf.mxu1 }
 0x326   : > { %v1239_v38 = vpop.permute.xlu1 %1238 }
 0x328   : > { %v4314_v24 = vpop.eup %4313 }
 0x329   : > { %v4316_v25 = vpop.eup %4315  ;;  %v1173_v27 = vmul.f32 %v4314_v24, %v4308_v59  ;;  %v3953_v24 = vpop.f32.mrf.mxu1 }
 0x32a   : > { %v1172_v29 = vmul.f32 %v4316_v25, %v4310_v60 }
 0x32b   : > { %v1175_v30 = vpack.c.bf16 %v1173_v27, %v1173_v27 }
 0x32c   : > { %v1174_v31 = vpack.c.bf16 %v1172_v29, %v1171_v28 }
 0x32e   : > { %3966 = vmatprep.mubr.msk.bf16.mxu0 %vm1140_vm3, %v1174_v31 }
 0x32f   : > { %3967 = vmatmul.mubr.msk.bf16.vlgmr.msra.gmra.mxu0 %vm1140_vm3, %v1175_v30 }
 0x330   : > { %3971 = vmatpush3.bf16.xpose.msra.mxu0 %v1256_v36  ;;  %3974 = vmatprep.mubr.msk.bf16.mxu0 %vm1073_vm0, %v1237_v32 }
 0x331   : > { %4134 = vmatprep.subr.msk.bf16.mxu0 %vm1073_vm0, %v1243_v26 }
 0x338   : > { %3973 = vmatpush3.bf16.xpose.msra.mxu0 %v1253_v37 }
 0x33f   : > { %3975 = vmatmul.mubr.msk.bf16.vlgmr.msra.gmra.mxu0 %vm1073_vm0, %v1239_v38 }
 0x3ef   : > { %v4844_v39 = vpop.f32.mrf.mxu0 }
 0x3f1   : > { %v4846_v40 = vpop.f32.mrf.mxu0 }
 0x3f3   : > { %v3969_v42 = vpop.f32.mrf.mxu0 }
 0x3f5   : > { %v4848_v43 = vpop.f32.mrf.mxu0 }
 0x3ff   : > { %v3976_v45 = vpop.f32.mrf.mxu0 }
 0x400   : > { %v1308_v48 = vmul.f32 0.17677669, %v3976_v45 }
 0x401   : > { %v1292_v47 = vpop.f32.mrf.mxu0 }
 0x402   : > { %v1306_v49 = vmul.f32 0.17677669, %v1292_v47  ;;  %v1311_v57 = vadd.f32 %v1308_v48, %v4796_v18 }
 0x403   : > { %v3977_v50 = vpop.f32.mrf.mxu0 }
 0x404   : > { %v1309_v51 = vadd.f32 %v1306_v49, %v4796_v18  ;;  %v1318_v60 = vsel %vm1140_vm3, %v1311_v57, -inf }
 0x405   : > { %v1295_v53 = vpop.f32.mrf.mxu0 }
 0x406   : > { %v1307_v54 = vmul.f32 0.17677669, %v1295_v53  ;;  %v1312_v56 = vsel %vm1140_vm3, %v1309_v51, -inf }
 0x407   : > { %1313 = vmax.xlane.f32.xlu0 %v1312_v56 }
 0x408   : > { %v1310_v59 = vadd.f32 %v1307_v54, %v4796_v18 }
 0x40a   : > { %v1315_v62 = vsel %vm1140_vm3, %v1310_v59, -inf }
 0x40b   : > { %1319 = vmax.xlane.f32.xlu0 %v1318_v60  ;;  %1316 = vmax.xlane.f32.xlu1 %v1315_v62 }
 0x490   : > { %v1314_v63 = vpop.xlane.xlu0 %1313 }
 0x491   : > { %v1321_v2 = vsub.f32 %v1309_v51, %v1314_v63 }
 0x493   : > { %v1324_v3 = vmul.f32 1.442695, %v1321_v2 }
 0x494   : > { %v1320_v5 = vpop.xlane.xlu0 %1319  ;;  %v1317_v35 = vpop.xlane.xlu1 %1316 }
 0x495   : > { %4317 = vpow2.f32 %v1324_v3  ;;  %v1323_v10 = vsub.f32 %v1311_v57, %v1320_v5  ;;  %v1322_v11 = vsub.f32 %v1310_v59, %v1317_v35 }
 0x497   : > { %v1328_v12 = vmul.f32 1.442695, %v1323_v10  ;;  %v1326_v13 = vmul.f32 1.442695, %v1322_v11 }
 0x499   : > { %4319 = vpow2.f32 %v1328_v12 }
 0x49a   : > { %4321 = vpow2.f32 %v1326_v13 }
 0x4a2   : > { %v4318_v14 = vpop.eup %4317 }
 0x4a3   : > { %v1330_v15 = vsel %vm1140_vm3, %v4318_v14, 0.0 }
 0x4a4   : > { %1331 = vadd.xlane.f32.xlu0 %v1330_v15 }
 0x4a6   : > { %v4320_v19 = vpop.eup %4319 }
 0x4a7   : > { %v4322_v20 = vpop.eup %4321  ;;  %v1336_v21 = vsel %vm1140_vm3, %v4320_v19, 0.0 }
 0x4a8   : > { %1337 = vadd.xlane.f32.xlu1 %v1336_v21  ;;  %v1333_v22 = vsel %vm1140_vm3, %v4322_v20, 0.0 }
 0x4a9   : > { %1334 = vadd.xlane.f32.xlu0 %v1333_v22 }
 0x4b9   : > { %1349 = vrot.lane.b32.xlu1 %v4816_v9, %s4505_s14 }
 0x4bd   : > { %1417 = vrot.lane.b32.xlu1 %v4744_v52, %s4506_s21 }
 0x4bf   : > { %1351 = vrot.lane.b32.xlu0 %v4814_v7, %s4505_s14 }
 0x4c1   : > { %1415 = vrot.lane.b32.xlu1 %v4746_v55, %s4506_s21 }
 0x4c3   : > { %1411 = vrot.lane.b32.xlu0 %v4732_v44, %s4506_s21 }
 0x4c5   : > { %1413 = vrot.lane.b32.xlu1 %v4764_v4, %s4506_s21 }
 0x52d   : > { %v1332_v25 = vpop.xlane.xlu0 %1331 }
 0x52e   : > { %4323 = vrcp.f32 %v1332_v25 }
 0x531   : > { %v1338_v26 = vpop.xlane.xlu1 %1337 }
 0x532   : > { %v1335_v27 = vpop.xlane.xlu0 %1334  ;;  %4325 = vrcp.f32 %v1338_v26 }
 0x533   : > { %4327 = vrcp.f32 %v1335_v27 }
 0x535   : > { %v1350_v29 = vpop.permute.xlu1 %1349 }
 0x536   : > { %v1352_v28 = vpop.permute.xlu0 %1351 }
 0x537   : > { %4135 = vmatprep.subr.msk.bf16.mxu1 %vm1182_vm4, %v1352_v28  ;;  %v1361_v30 = vsel %vm1182_vm4, %v1352_v28, 0 }
 0x538   : > { %3979 = vmatpush3.bf16.msra.mxu1 %v1361_v30 }
 0x539   : > { %3980 = vmatprep.subr.bf16.mxu1 %v1350_v29  ;;  %v1418_v31 = vpop.permute.xlu1 %1417 }
 0x53a   : > { %v1412_v49 = vpop.permute.xlu0 %1411  ;;  %v1429_v50 = vsel %vm1073_vm0, %v1418_v31, 0 }
 0x53b   : > { %v4324_v32 = vpop.eup %4323 }
 0x53c   : > { %3981 = vmatpush3.bf16.msra.mxu1 %v1350_v29  ;;  %v1342_v42 = vmul.f32 %v4324_v32, %v4318_v14 }
 0x53d   : > { %4136 = vmatprep.subr.msk.bf16.mxu1 %vm1073_vm0, %v1418_v31  ;;  %v1416_v51 = vpop.permute.xlu1 %1415 }
 0x53e   : > { %v1426_v53 = vsel %vm1073_vm0, %v1416_v51, 0 }
 0x53f   : > { %v4326_v36 = vpop.eup %4325 }
 0x540   : > { %v4328_v37 = vpop.eup %4327  ;;  %v1344_v38 = vmul.f32 %v4326_v36, %v4320_v19 }
 0x541   : > { %v1343_v45 = vmul.f32 %v4328_v37, %v4322_v20  ;;  %v1414_v54 = vpop.permute.xlu1 %1413 }
 0x542   : > { %v1346_v47 = vpack.c.bf16 %v1344_v38, %v1344_v38 }
 0x543   : > { %v1345_v48 = vpack.c.bf16 %v1343_v45, %v1342_v42 }
 0x545   : > { %3982 = vmatprep.mubr.msk.bf16.mxu1 %vm1140_vm3, %v1345_v48 }
 0x546   : > { %3983 = vmatmul.mubr.msk.bf16.vlgmr.msra.gmra.mxu1 %vm1140_vm3, %v1346_v47 }
 0x547   : > { %3987 = vmatpush3.bf16.xpose.msra.mxu1 %v1429_v50  ;;  %3990 = vmatprep.mubr.msk.bf16.mxu1 %vm1073_vm0, %v1412_v49 }
 0x548   : > { %4137 = vmatprep.subr.msk.bf16.mxu1 %vm1073_vm0, %v1416_v51 }
 0x54f   : > { %3989 = vmatpush3.bf16.xpose.msra.mxu1 %v1426_v53 }
 0x556   : > { %3991 = vmatmul.mubr.msk.bf16.vlgmr.msra.gmra.mxu1 %vm1073_vm0, %v1414_v54 }
 0x606   : > { %v4883_v56 = vpop.f32.mrf.mxu1 }
 0x608   : > { %v4885_v57 = vpop.f32.mrf.mxu1 }
 0x60a   : > { %v3985_v59 = vpop.f32.mrf.mxu1 }
 0x60c   : > { %v4887_v60 = vpop.f32.mrf.mxu1 }
 0x60d   : > { %v4180_v62 = vpack.i.bf16 %v4887_v60, %v4885_v57 }
 0x616   : > { %v3992_v63 = vpop.f32.mrf.mxu1 }
 0x617   : > { %v1481_v3 = vmul.f32 0.17677669, %v3992_v63 }
 0x618   : > { %v1465_v2 = vpop.f32.mrf.mxu1 }
 0x619   : > { %v1479_v5 = vmul.f32 0.17677669, %v1465_v2  ;;  %v1484_v14 = vadd.f32 %v1481_v3, %v4796_v18 }
 0x61a   : > { %v3993_v35 = vpop.f32.mrf.mxu1 }
 0x61b   : > { %v1482_v10 = vadd.f32 %v1479_v5, %v4796_v18  ;;  %v1491_v19 = vsel %vm1140_vm3, %v1484_v14, -inf }
 0x61c   : > { %v1468_v11 = vpop.f32.mrf.mxu1 }
 0x61d   : > { %v1480_v12 = vmul.f32 0.17677669, %v1468_v11  ;;  %v1485_v13 = vsel %vm1140_vm3, %v1482_v10, -inf }
 0x61e   : > { %1486 = vmax.xlane.f32.xlu0 %v1485_v13 }
 0x61f   : > { %v1483_v15 = vadd.f32 %v1480_v12, %v4796_v18 }
 0x621   : > { %v1488_v20 = vsel %vm1140_vm3, %v1483_v15, -inf }
 0x622   : > { %1492 = vmax.xlane.f32.xlu0 %v1491_v19  ;;  %1489 = vmax.xlane.f32.xlu1 %v1488_v20 }
 0x6a7   : > { %v1487_v21 = vpop.xlane.xlu0 %1486 }
 0x6a8   : > { %v1494_v22 = vsub.f32 %v1482_v10, %v1487_v21  ;;  %v1033_v10 = vadd.f32 %v4871_v23, %v4807_v58 }
 0x6aa   : > { %v1497_v24 = vmul.f32 1.442695, %v1494_v22  ;;  %v4922_v11 = vpack.c.bf16 %v1033_v10, %v1033_v10 }
 0x6ab   : > { %v1493_v25 = vpop.xlane.xlu0 %1492  ;;  %v1490_v26 = vpop.xlane.xlu1 %1489 }
 0x6ac   : > { %4329 = vpow2.f32 %v1497_v24  ;;  %v1496_v27 = vsub.f32 %v1484_v14, %v1493_v25  ;;  %v1495_v28 = vsub.f32 %v1483_v15, %v1490_v26  ;;  %v1923_v14 = vsel %vm1182_vm4, %v4922_v11, 0 }
 0x6ae   : > { %v1501_v29 = vmul.f32 1.442695, %v1496_v27  ;;  %v1499_v30 = vmul.f32 1.442695, %v1495_v28 }
 0x6b0   : > { %4331 = vpow2.f32 %v1501_v29 }
 0x6b1   : > { %4333 = vpow2.f32 %v1499_v30 }
 0x6b9   : > { %v4330_v31 = vpop.eup %4329 }
 0x6ba   : > { %v1503_v32 = vsel %vm1140_vm3, %v4330_v31, 0.0 }
 0x6bb   : > { %1504 = vadd.xlane.f32.xlu0 %v1503_v32 }
 0x6bd   : > { %v4332_v36 = vpop.eup %4331 }
 0x6be   : > { %v4334_v37 = vpop.eup %4333  ;;  %v1509_v38 = vsel %vm1140_vm3, %v4332_v36, 0.0 }
 0x6bf   : > { %1510 = vadd.xlane.f32.xlu1 %v1509_v38  ;;  %v1506_v42 = vsel %vm1140_vm3, %v4334_v37, 0.0 }
 0x6c0   : > { %1507 = vadd.xlane.f32.xlu0 %v1506_v42 }
 0x6d0   : > { %1520 = vrot.lane.b32.xlu1 %v4816_v9, %s4506_s21 }
 0x6d4   : > { %1588 = vrot.lane.b32.xlu1 %v4744_v52, %s4507_s22 }
 0x6d6   : > { %1522 = vrot.lane.b32.xlu0 %v4814_v7, %s4506_s21 }
 0x6d8   : > { %1586 = vrot.lane.b32.xlu1 %v4746_v55, %s4507_s22 }
 0x6da   : > { %1582 = vrot.lane.b32.xlu0 %v4732_v44, %s4507_s22 }
 0x6dc   : > { %1584 = vrot.lane.b32.xlu1 %v4764_v4, %s4507_s22 }
 0x744   : > { %v1505_v45 = vpop.xlane.xlu0 %1504 }
 0x745   : > { %4335 = vrcp.f32 %v1505_v45 }
 0x748   : > { %v1511_v47 = vpop.xlane.xlu1 %1510 }
 0x749   : > { %v1508_v48 = vpop.xlane.xlu0 %1507  ;;  %4337 = vrcp.f32 %v1511_v47 }
 0x74a   : > { %4339 = vrcp.f32 %v1508_v48 }
 0x74c   : > { %v1521_v52 = vpop.permute.xlu1 %1520 }
 0x74d   : > { %v1523_v49 = vpop.permute.xlu0 %1522 }
 0x74e   : > { %v1532_v50 = vsel %vm1182_vm4, %v1523_v49, 0  ;;  %4138 = vmatprep.subr.msk.bf16.mxu0 %vm1182_vm4, %v1523_v49 }
 0x74f   : > { %3995 = vmatpush3.bf16.msra.mxu0 %v1532_v50 }
 0x750   : > { %3996 = vmatprep.subr.bf16.mxu0 %v1521_v52  ;;  %v1589_v55 = vpop.permute.xlu1 %1588 }
 0x751   : > { %v1583_v3 = vpop.permute.xlu0 %1582  ;;  %v1600_v5 = vsel %vm1073_vm0, %v1589_v55, 0 }
 0x752   : > { %v4336_v44 = vpop.eup %4335 }
 0x753   : > { %3997 = vmatpush3.bf16.msra.mxu0 %v1521_v52  ;;  %v1515_v54 = vmul.f32 %v4336_v44, %v4330_v31 }
 0x754   : > { %4139 = vmatprep.subr.msk.bf16.mxu0 %vm1073_vm0, %v1589_v55  ;;  %v1587_v35 = vpop.permute.xlu1 %1586 }
 0x755   : > { %v1597_v12 = vsel %vm1073_vm0, %v1587_v35, 0 }
 0x756   : > { %v4338_v4 = vpop.eup %4337 }
 0x757   : > { %v4340_v51 = vpop.eup %4339  ;;  %v1517_v53 = vmul.f32 %v4338_v4, %v4332_v36 }
 0x758   : > { %v1516_v59 = vmul.f32 %v4340_v51, %v4334_v37  ;;  %v1585_v13 = vpop.permute.xlu1 %1584 }
 0x759   : > { %v1519_v63 = vpack.c.bf16 %v1517_v53, %v1517_v53 }
 0x75a   : > { %v1518_v2 = vpack.c.bf16 %v1516_v59, %v1515_v54 }
 0x75c   : > { %3998 = vmatprep.mubr.msk.bf16.mxu0 %vm1140_vm3, %v1518_v2 }
 0x75d   : > { %3999 = vmatmul.mubr.msk.bf16.vlgmr.msra.gmra.mxu0 %vm1140_vm3, %v1519_v63 }
 0x75e   : > { %4003 = vmatpush3.bf16.xpose.msra.mxu0 %v1600_v5  ;;  %4006 = vmatprep.mubr.msk.bf16.mxu0 %vm1073_vm0, %v1583_v3 }
 0x75f   : > { %4140 = vmatprep.subr.msk.bf16.mxu0 %vm1073_vm0, %v1587_v35  ;;  %v977_v35 = vadd.f32 %v4794_v16, %v4737_v46 }
 0x766   : > { %4005 = vmatpush3.bf16.xpose.msra.mxu0 %v1597_v12 }
 0x767   : > { %4144 = vmatprep.subr.msk.bf16.mxu0 %vm1182_vm4, %v4922_v11 }
 0x76d   : > { %4007 = vmatmul.mubr.msk.bf16.vlgmr.msra.gmra.mxu0 %vm1073_vm0, %v1585_v13 }
 0x76e   : > { %4027 = vmatpush3.bf16.msra.mxu0 %v1923_v14 }
 0x76f   : > { %4028 = vmatprep.subr.bf16.mxu0 %v4828_v17 }
 0x772   : > { %4029 = vmatpush3.bf16.msra.mxu0 %v4828_v17 }
 0x81d   : > { %v4932_v58 = vpop.f32.mrf.mxu0 }
 0x81f   : > { %v4934_v23 = vpop.f32.mrf.mxu0 }
 0x821   : > { %v4001_v15 = vpop.f32.mrf.mxu0 }
 0x823   : > { %v4936_v19 = vpop.f32.mrf.mxu0 }
 0x824   : > { %v4185_v20 = vpack.i.bf16 %v4936_v19, %v4934_v23 }
 0x82d   : > { %v4008_v21 = vpop.f32.mrf.mxu0 }
 0x82e   : > { %v1652_v24 = vmul.f32 0.17677669, %v4008_v21 }
 0x82f   : > { %v1636_v22 = vpop.f32.mrf.mxu0 }
 0x830   : > { %v1650_v25 = vmul.f32 0.17677669, %v1636_v22  ;;  %v1655_v31 = vadd.f32 %v1652_v24, %v4796_v18 }
 0x831   : > { %v4009_v26 = vpop.f32.mrf.mxu0 }
 0x832   : > { %v1653_v27 = vadd.f32 %v1650_v25, %v4796_v18  ;;  %v1662_v36 = vsel %vm1140_vm3, %v1655_v31, -inf  ;;  %v1822_v25 = vsel %vm1073_vm0, %v4758_v0, 0  ;;  %v4973_v26 = vpack.c.bf16 %v4760_v1, %v4760_v1 }
 0x833   : > { %v1639_v28 = vpop.f32.mrf.mxu0 }
 0x834   : > { %v1651_v29 = vmul.f32 0.17677669, %v1639_v28  ;;  %v1656_v30 = vsel %vm1140_vm3, %v1653_v27, -inf }
 0x835   : > { %1657 = vmax.xlane.f32.xlu0 %v1656_v30 }
 0x836   : > { %v1654_v32 = vadd.f32 %v1651_v29, %v4796_v18 }
 0x838   : > { %v1659_v37 = vsel %vm1140_vm3, %v1654_v32, -inf }
 0x839   : > { %1663 = vmax.xlane.f32.xlu0 %v1662_v36  ;;  %1660 = vmax.xlane.f32.xlu1 %v1659_v37 }
 0x8be   : > { %v1658_v38 = vpop.xlane.xlu0 %1657 }
 0x8bf   : > { %v1665_v42 = vsub.f32 %v1653_v27, %v1658_v38 }
 0x8c1   : > { %v1668_v45 = vmul.f32 1.442695, %v1665_v42 }
 0x8c2   : > { %v1664_v47 = vpop.xlane.xlu0 %1663  ;;  %v1661_v48 = vpop.xlane.xlu1 %1660 }
 0x8c3   : > { %4341 = vpow2.f32 %v1668_v45  ;;  %v1667_v49 = vsub.f32 %v1655_v31, %v1664_v47  ;;  %v1666_v52 = vsub.f32 %v1654_v32, %v1661_v48 }
 0x8c5   : > { %v1672_v50 = vmul.f32 1.442695, %v1667_v49  ;;  %v1670_v55 = vmul.f32 1.442695, %v1666_v52 }
 0x8c7   : > { %4343 = vpow2.f32 %v1672_v50 }
 0x8c8   : > { %4345 = vpow2.f32 %v1670_v55 }
 0x8d0   : > { %v4342_v44 = vpop.eup %4341 }
 0x8d1   : > { %v1674_v4 = vsel %vm1140_vm3, %v4342_v44, 0.0 }
 0x8d2   : > { %1675 = vadd.xlane.f32.xlu0 %v1674_v4 }
 0x8d4   : > { %v4344_v51 = vpop.eup %4343 }
 0x8d5   : > { %v4346_v53 = vpop.eup %4345  ;;  %v1680_v54 = vsel %vm1140_vm3, %v4344_v51, 0.0 }
 0x8d6   : > { %1681 = vadd.xlane.f32.xlu1 %v1680_v54  ;;  %v1677_v59 = vsel %vm1140_vm3, %v4346_v53, 0.0 }
 0x8d7   : > { %1678 = vadd.xlane.f32.xlu0 %v1677_v59 }
 0x8e7   : > { %1691 = vrot.lane.b32.xlu1 %v4816_v9, %s4507_s22  ;;  %v4957_v9 = vpack.c.bf16 %v977_v35, %v977_v35 }
 0x8e9   : > { %v1825_v24 = vsel %vm1073_vm0, %v4957_v9, 0 }
 0x8ed   : > { %1693 = vrot.lane.b32.xlu0 %v4814_v7, %s4507_s22 }
 0x95b   : > { %v1676_v63 = vpop.xlane.xlu0 %1675 }
 0x95c   : > { %4347 = vrcp.f32 %v1676_v63 }
 0x95f   : > { %v1682_v2 = vpop.xlane.xlu1 %1681 }
 0x960   : > { %v1679_v3 = vpop.xlane.xlu0 %1678  ;;  %4349 = vrcp.f32 %v1682_v2 }
 0x961   : > { %4351 = vrcp.f32 %v1679_v3 }
 0x963   : > { %v1692_v12 = vpop.permute.xlu1 %1691 }
 0x964   : > { %v1694_v5 = vpop.permute.xlu0 %1693 }
 0x965   : > { %v1703_v10 = vsel %vm1182_vm4, %v1694_v5, 0  ;;  %4141 = vmatprep.subr.msk.bf16.mxu1 %vm1182_vm4, %v1694_v5 }
 0x966   : > { %4011 = vmatpush3.bf16.msra.mxu1 %v1703_v10 }
 0x967   : > { %4012 = vmatprep.subr.bf16.mxu1 %v1692_v12 }
 0x969   : > { %v4348_v7 = vpop.eup %4347 }
 0x96a   : > { %4013 = vmatpush3.bf16.msra.mxu1 %v1692_v12  ;;  %v1686_v21 = vmul.f32 %v4348_v7, %v4342_v44 }
 0x96b   : > { %4142 = vmatprep.subr.msk.bf16.mxu1 %vm1073_vm0, %v4957_v9 }
 0x96d   : > { %v4350_v13 = vpop.eup %4349 }
 0x96e   : > { %v4352_v14 = vpop.eup %4351  ;;  %v1688_v15 = vmul.f32 %v4350_v13, %v4344_v51 }
 0x96f   : > { %v1687_v22 = vmul.f32 %v4352_v14, %v4346_v53 }
 0x970   : > { %v1690_v46 = vpack.c.bf16 %v1688_v15, %v1688_v15 }
 0x971   : > { %v1689_v16 = vpack.c.bf16 %v1687_v22, %v1686_v21 }
 0x973   : > { %4014 = vmatprep.mubr.msk.bf16.mxu1 %vm1140_vm3, %v1689_v16 }
 0x974   : > { %4015 = vmatmul.mubr.msk.bf16.vlgmr.msra.gmra.mxu1 %vm1140_vm3, %v1690_v46 }
 0x975   : > { %4019 = vmatpush3.bf16.xpose.msra.mxu1 %v1825_v24  ;;  %4022 = vmatprep.mubr.msk.bf16.mxu1 %vm1073_vm0, %v4755_v61 }
 0x976   : > { %4143 = vmatprep.subr.msk.bf16.mxu1 %vm1073_vm0, %v4758_v0 }
 0x97d   : > { %4021 = vmatpush3.bf16.xpose.msra.mxu1 %v1822_v25 }
 0x984   : > { %4023 = vmatmul.mubr.msk.bf16.vlgmr.msra.gmra.mxu1 %vm1073_vm0, %v4973_v26 }
 0xa34   : > { %v4977_v27 = vpop.f32.mrf.mxu1 }
 0xa36   : > { %v4979_v28 = vpop.f32.mrf.mxu1 }
 0xa38   : > { %v4017_v29 = vpop.f32.mrf.mxu1 }
 0xa3a   : > { %v4981_v30 = vpop.f32.mrf.mxu1 }
 0xa3b   : > { %v4190_v31 = vpack.i.bf16 %v4981_v30, %v4979_v28 }
 0xa44   : > { %v4024_v32 = vpop.f32.mrf.mxu1 }
 0xa45   : > { %v1877_v45 = vmul.f32 0.17677669, %v4024_v32 }
 0xa46   : > { %v1861_v36 = vpop.f32.mrf.mxu1 }
 0xa47   : > { %v1875_v37 = vmul.f32 0.17677669, %v1861_v36  ;;  %v1880_v50 = vadd.f32 %v1877_v45, %v4796_v18 }
 0xa48   : > { %v4025_v38 = vpop.f32.mrf.mxu1 }
 0xa49   : > { %v1878_v1 = vadd.f32 %v1875_v37, %v4796_v18  ;;  %v1887_v55 = vsel %vm1140_vm3, %v1880_v50, -inf }
 0xa4a   : > { %v1864_v42 = vpop.f32.mrf.mxu1 }
 0xa4b   : > { %v1876_v47 = vmul.f32 0.17677669, %v1864_v42  ;;  %v1881_v48 = vsel %vm1140_vm3, %v1878_v1, -inf }
 0xa4c   : > { %1882 = vmax.xlane.f32.xlu1 %v1881_v48 }
 0xa4d   : > { %v1879_v49 = vadd.f32 %v1876_v47, %v4796_v18 }
 0xa4f   : > { %v1884_v52 = vsel %vm1140_vm3, %v1879_v49, -inf }
 0xa50   : > { %1885 = vmax.xlane.f32.xlu0 %v1884_v52 }
 0xa54   : > { %1888 = vmax.xlane.f32.xlu0 %v1887_v55 }
 0xad5   : > { %v1883_v44 = vpop.xlane.xlu1 %1882 }
 0xad6   : > { %v1890_v4 = vsub.f32 %v1878_v1, %v1883_v44 }
 0xad8   : > { %v1893_v51 = vmul.f32 1.442695, %v1890_v4 }
 0xad9   : > { %v1886_v53 = vpop.xlane.xlu0 %1885 }
 0xada   : > { %4353 = vpow2.f32 %v1893_v51  ;;  %v1891_v54 = vsub.f32 %v1879_v49, %v1886_v53 }
 0xadc   : > { %v1895_v59 = vmul.f32 1.442695, %v1891_v54 }
 0xadd   : > { %v1889_v63 = vpop.xlane.xlu0 %1888 }
 0xade   : > { %4355 = vpow2.f32 %v1895_v59  ;;  %v1892_v2 = vsub.f32 %v1880_v50, %v1889_v63 }
 0xae0   : > { %v1897_v3 = vmul.f32 1.442695, %v1892_v2 }
 0xae2   : > { %4357 = vpow2.f32 %v1897_v3 }
 0xae7   : > { %v4354_v5 = vpop.eup %4353 }
 0xae8   : > { %v1899_v35 = vsel %vm1140_vm3, %v4354_v5, 0.0 }
 0xae9   : > { %1900 = vadd.xlane.f32.xlu1 %v1899_v35 }
 0xaeb   : > { %v4356_v10 = vpop.eup %4355 }
 0xaec   : > { %v1902_v12 = vsel %vm1140_vm3, %v4356_v10, 0.0 }
 0xaed   : > { %1903 = vadd.xlane.f32.xlu0 %v1902_v12 }
 0xaef   : > { %v4358_v7 = vpop.eup %4357 }
 0xaf0   : > { %v1905_v13 = vsel %vm1140_vm3, %v4358_v7, 0.0 }
 0xaf1   : > { %1906 = vadd.xlane.f32.xlu1 %v1905_v13 }
 0xb02   : > { %1981 = vrot.lane.b32.xlu1 %v4758_v0, %s4505_s14 }
 0xb03   : > { %1983 = vrot.lane.b32.xlu0 %v4957_v9, %s4505_s14 }
 0xb06   : > { %1975 = vrot.lane.b32.xlu1 %v4755_v61, %s4505_s14 }
 0xb0a   : > { %1977 = vrot.lane.b32.xlu1 %v4973_v26, %s4505_s14 }
 0xb72   : > { %v1901_v14 = vpop.xlane.xlu1 %1900 }
 0xb73   : > { %4359 = vrcp.f32 %v1901_v14 }
 0xb76   : > { %v1904_v15 = vpop.xlane.xlu0 %1903 }
 0xb77   : > { %4361 = vrcp.f32 %v1904_v15 }
 0xb7a   : > { %v1907_v21 = vpop.xlane.xlu1 %1906  ;;  %v1984_v22 = vpop.permute.xlu0 %1983 }
 0xb7b   : > { %4363 = vrcp.f32 %v1907_v21  ;;  %4145 = vmatprep.subr.msk.bf16.mxu0 %vm1073_vm0, %v1984_v22  ;;  %v1995_v1 = vsel %vm1073_vm0, %v1984_v22, 0 }
 0xb7e   : > { %v1982_v29 = vpop.permute.xlu1 %1981 }
 0xb7f   : > { %v1992_v45 = vsel %vm1073_vm0, %v1982_v29, 0 }
 0xb80   : > { %v4360_v46 = vpop.eup %4359 }
 0xb81   : > { %v1911_v24 = vmul.f32 %v4360_v46, %v4354_v5 }
 0xb82   : > { %v1976_v42 = vpop.permute.xlu1 %1975 }
 0xb84   : > { %v4362_v16 = vpop.eup %4361 }
 0xb85   : > { %v1912_v25 = vmul.f32 %v4362_v16, %v4356_v10 }
 0xb86   : > { %v1978_v47 = vpop.permute.xlu1 %1977 }
 0xb87   : > { %v1914_v32 = vpack.c.bf16 %v1912_v25, %v1911_v24 }
 0xb88   : > { %v4364_v36 = vpop.eup %4363 }
 0xb89   : > { %4030 = vmatprep.mubr.msk.bf16.mxu0 %vm1140_vm3, %v1914_v32  ;;  %v1913_v37 = vmul.f32 %v4364_v36, %v4358_v7 }
 0xb8b   : > { %v1915_v38 = vpack.c.bf16 %v1913_v37, %v1913_v37 }
 0xb8d   : > { %4031 = vmatmul.mubr.msk.bf16.vlgmr.msra.gmra.mxu0 %vm1140_vm3, %v1915_v38 }
 0xb8e   : > { %4035 = vmatpush3.bf16.xpose.msra.mxu0 %v1995_v1  ;;  %4038 = vmatprep.mubr.msk.bf16.mxu0 %vm1073_vm0, %v1976_v42 }
 0xb8f   : > { %4146 = vmatprep.subr.msk.bf16.mxu0 %vm1073_vm0, %v1982_v29 }
 0xb96   : > { %4037 = vmatpush3.bf16.xpose.msra.mxu0 %v1992_v45 }
 0xb9d   : > { %4039 = vmatmul.mubr.msk.bf16.vlgmr.msra.gmra.mxu0 %vm1073_vm0, %v1978_v47 }
 0xc4d   : > { %v5010_v48 = vpop.f32.mrf.mxu0 }
 0xc4f   : > { %v5012_v49 = vpop.f32.mrf.mxu0 }
 0xc51   : > { %v4033_v52 = vpop.f32.mrf.mxu0 }
 0xc53   : > { %v5014_v50 = vpop.f32.mrf.mxu0 }
 0xc5d   : > { %v4040_v55 = vpop.f32.mrf.mxu0 }
 0xc5e   : > { %v2047_v4 = vmul.f32 0.17677669, %v4040_v55 }
 0xc5f   : > { %v2031_v44 = vpop.f32.mrf.mxu0 }
 0xc60   : > { %v2045_v51 = vmul.f32 0.17677669, %v2031_v44  ;;  %v2050_v3 = vadd.f32 %v2047_v4, %v4796_v18 }
 0xc61   : > { %v4041_v53 = vpop.f32.mrf.mxu0 }
 0xc62   : > { %v2048_v54 = vadd.f32 %v2045_v51, %v4796_v18  ;;  %v2057_v35 = vsel %vm1140_vm3, %v2050_v3, -inf }
 0xc63   : > { %v2034_v59 = vpop.f32.mrf.mxu0 }
 0xc64   : > { %v2046_v63 = vmul.f32 0.17677669, %v2034_v59  ;;  %v2051_v2 = vsel %vm1140_vm3, %v2048_v54, -inf }
 0xc65   : > { %2052 = vmax.xlane.f32.xlu0 %v2051_v2 }
 0xc66   : > { %v2049_v5 = vadd.f32 %v2046_v63, %v4796_v18 }
 0xc68   : > { %v2054_v10 = vsel %vm1140_vm3, %v2049_v5, -inf }
 0xc69   : > { %2058 = vmax.xlane.f32.xlu0 %v2057_v35  ;;  %2055 = vmax.xlane.f32.xlu1 %v2054_v10 }
 0xcee   : > { %v2053_v12 = vpop.xlane.xlu0 %2052 }
 0xcef   : > { %v2060_v7 = vsub.f32 %v2048_v54, %v2053_v12 }
 0xcf1   : > { %v2063_v13 = vmul.f32 1.442695, %v2060_v7 }
 0xcf2   : > { %v2059_v14 = vpop.xlane.xlu0 %2058  ;;  %v2056_v15 = vpop.xlane.xlu1 %2055 }
 0xcf3   : > { %4365 = vpow2.f32 %v2063_v13  ;;  %v2062_v21 = vsub.f32 %v2050_v3, %v2059_v14  ;;  %v2061_v22 = vsub.f32 %v2049_v5, %v2056_v15 }
 0xcf5   : > { %v2067_v46 = vmul.f32 1.442695, %v2062_v21  ;;  %v2065_v16 = vmul.f32 1.442695, %v2061_v22 }
 0xcf7   : > { %4367 = vpow2.f32 %v2067_v46 }
 0xcf8   : > { %4369 = vpow2.f32 %v2065_v16 }
 0xd00   : > { %v4366_v24 = vpop.eup %4365 }
 0xd01   : > { %v2069_v25 = vsel %vm1140_vm3, %v4366_v24, 0.0 }
 0xd02   : > { %2070 = vadd.xlane.f32.xlu0 %v2069_v25 }
 0xd04   : > { %v4368_v29 = vpop.eup %4367 }
 0xd05   : > { %v4370_v32 = vpop.eup %4369  ;;  %v2075_v36 = vsel %vm1140_vm3, %v4368_v29, 0.0 }
 0xd06   : > { %2076 = vadd.xlane.f32.xlu1 %v2075_v36  ;;  %v2072_v37 = vsel %vm1140_vm3, %v4370_v32, 0.0 }
 0xd07   : > { %2073 = vadd.xlane.f32.xlu0 %v2072_v37 }
 0xd17   : > { %2088 = vrot.lane.b32.xlu1 %v4828_v17, %s4505_s14 }
 0xd1b   : > { %2156 = vrot.lane.b32.xlu1 %v4957_v9, %s4506_s21 }
 0xd1d   : > { %2090 = vrot.lane.b32.xlu0 %v4922_v11, %s4505_s14 }
 0xd1f   : > { %2154 = vrot.lane.b32.xlu1 %v4758_v0, %s4506_s21 }
 0xd21   : > { %2150 = vrot.lane.b32.xlu0 %v4755_v61, %s4506_s21 }
 0xd23   : > { %2152 = vrot.lane.b32.xlu1 %v4973_v26, %s4506_s21 }
 0xd8b   : > { %v2071_v38 = vpop.xlane.xlu0 %2070 }
 0xd8c   : > { %4371 = vrcp.f32 %v2071_v38 }
 0xd8f   : > { %v2077_v1 = vpop.xlane.xlu1 %2076 }
 0xd90   : > { %v2074_v42 = vpop.xlane.xlu0 %2073  ;;  %4373 = vrcp.f32 %v2077_v1 }
 0xd91   : > { %4375 = vrcp.f32 %v2074_v42 }
 0xd93   : > { %v2089_v47 = vpop.permute.xlu1 %2088 }
 0xd94   : > { %v2091_v45 = vpop.permute.xlu0 %2090 }
 0xd95   : > { %v2100_v52 = vsel %vm1182_vm4, %v2091_v45, 0  ;;  %4147 = vmatprep.subr.msk.bf16.mxu1 %vm1182_vm4, %v2091_v45 }
 0xd96   : > { %4043 = vmatpush3.bf16.msra.mxu1 %v2100_v52 }
 0xd97   : > { %4044 = vmatprep.subr.bf16.mxu1 %v2089_v47  ;;  %v2157_v55 = vpop.permute.xlu1 %2156 }
 0xd98   : > { %v2151_v3 = vpop.permute.xlu0 %2150  ;;  %v2168_v5 = vsel %vm1073_vm0, %v2157_v55, 0 }
 0xd99   : > { %v4372_v44 = vpop.eup %4371 }
 0xd9a   : > { %4045 = vmatpush3.bf16.msra.mxu1 %v2089_v47  ;;  %v2081_v54 = vmul.f32 %v4372_v44, %v4366_v24 }
 0xd9b   : > { %4148 = vmatprep.subr.msk.bf16.mxu1 %vm1073_vm0, %v2157_v55  ;;  %v2155_v35 = vpop.permute.xlu1 %2154 }
 0xd9c   : > { %v2165_v10 = vsel %vm1073_vm0, %v2155_v35, 0 }
 0xd9d   : > { %v4374_v4 = vpop.eup %4373 }
 0xd9e   : > { %v4376_v51 = vpop.eup %4375  ;;  %v2083_v53 = vmul.f32 %v4374_v4, %v4368_v29 }
 0xd9f   : > { %v2082_v59 = vmul.f32 %v4376_v51, %v4370_v32  ;;  %v2153_v12 = vpop.permute.xlu1 %2152 }
 0xda0   : > { %v2085_v63 = vpack.c.bf16 %v2083_v53, %v2083_v53 }
 0xda1   : > { %v2084_v2 = vpack.c.bf16 %v2082_v59, %v2081_v54 }
 0xda3   : > { %4046 = vmatprep.mubr.msk.bf16.mxu1 %vm1140_vm3, %v2084_v2 }
 0xda4   : > { %4047 = vmatmul.mubr.msk.bf16.vlgmr.msra.gmra.mxu1 %vm1140_vm3, %v2085_v63 }
 0xda5   : > { %4051 = vmatpush3.bf16.xpose.msra.mxu1 %v2168_v5  ;;  %4054 = vmatprep.mubr.msk.bf16.mxu1 %vm1073_vm0, %v2151_v3 }
 0xda6   : > { %4149 = vmatprep.subr.msk.bf16.mxu1 %vm1073_vm0, %v2155_v35 }
 0xdad   : > { %4053 = vmatpush3.bf16.xpose.msra.mxu1 %v2165_v10 }
 0xdb4   : > { %4055 = vmatmul.mubr.msk.bf16.vlgmr.msra.gmra.mxu1 %vm1073_vm0, %v2153_v12 }
 0xe64   : > { %v5047_v7 = vpop.f32.mrf.mxu1 }
 0xe66   : > { %v5049_v13 = vpop.f32.mrf.mxu1 }
 0xe68   : > { %v4049_v14 = vpop.f32.mrf.mxu1 }
 0xe6a   : > { %v5051_v15 = vpop.f32.mrf.mxu1 }
 0xe6b   : > { %v4210_v21 = vpack.i.bf16 %v5047_v7, %v5051_v15  ;;  %v4257_v15 = vld [vmem:[%s4621_s18 + $0x38] sm:$0xff]  }
 0xe74   : > { %v4056_v22 = vpop.f32.mrf.mxu1 }
 0xe75   : > { %v2220_v16 = vmul.f32 0.17677669, %v4056_v22 }
 0xe76   : > { %v2204_v46 = vpop.f32.mrf.mxu1 }
 0xe77   : > { %v2218_v24 = vmul.f32 0.17677669, %v2204_v46  ;;  %v2223_v38 = vadd.f32 %v2220_v16, %v4796_v18 }
 0xe78   : > { %v4057_v25 = vpop.f32.mrf.mxu1 }
 0xe79   : > { %v2221_v29 = vadd.f32 %v2218_v24, %v4796_v18  ;;  %v2230_v42 = vsel %vm1140_vm3, %v2223_v38, -inf }
 0xe7a   : > { %v2207_v32 = vpop.f32.mrf.mxu1 }
 0xe7b   : > { %v2219_v36 = vmul.f32 0.17677669, %v2207_v32  ;;  %v2224_v37 = vsel %vm1140_vm3, %v2221_v29, -inf }
 0xe7c   : > { %2225 = vmax.xlane.f32.xlu0 %v2224_v37 }
 0xe7d   : > { %v2222_v1 = vadd.f32 %v2219_v36, %v4796_v18 }
 0xe7f   : > { %v2227_v45 = vsel %vm1140_vm3, %v2222_v1, -inf }
 0xe80   : > { %2231 = vmax.xlane.f32.xlu0 %v2230_v42  ;;  %2228 = vmax.xlane.f32.xlu1 %v2227_v45 }
 0xf05   : > { %v2226_v47 = vpop.xlane.xlu0 %2225 }
 0xf06   : > { %v2233_v52 = vsub.f32 %v2221_v29, %v2226_v47 }
 0xf08   : > { %v2236_v55 = vmul.f32 1.442695, %v2233_v52 }
 0xf09   : > { %v2232_v44 = vpop.xlane.xlu0 %2231  ;;  %v2229_v4 = vpop.xlane.xlu1 %2228 }
 0xf0a   : > { %4377 = vpow2.f32 %v2236_v55  ;;  %v2235_v51 = vsub.f32 %v2223_v38, %v2232_v44  ;;  %v2234_v53 = vsub.f32 %v2222_v1, %v2229_v4 }
 0xf0c   : > { %v2240_v54 = vmul.f32 1.442695, %v2235_v51  ;;  %v2238_v59 = vmul.f32 1.442695, %v2234_v53 }
 0xf0e   : > { %4379 = vpow2.f32 %v2240_v54 }
 0xf0f   : > { %4381 = vpow2.f32 %v2238_v59 }
 0xf17   : > { %v4378_v63 = vpop.eup %4377 }
 0xf18   : > { %v2242_v2 = vsel %vm1140_vm3, %v4378_v63, 0.0 }
 0xf19   : > { %2243 = vadd.xlane.f32.xlu0 %v2242_v2 }
 0xf1b   : > { %v4380_v3 = vpop.eup %4379 }
 0xf1c   : > { %v4382_v5 = vpop.eup %4381  ;;  %v2248_v35 = vsel %vm1140_vm3, %v4380_v3, 0.0 }
 0xf1d   : > { %2249 = vadd.xlane.f32.xlu1 %v2248_v35  ;;  %v2245_v10 = vsel %vm1140_vm3, %v4382_v5, 0.0 }
 0xf1e   : > { %2246 = vadd.xlane.f32.xlu0 %v2245_v10 }
 0xf2e   : > { %2259 = vrot.lane.b32.xlu1 %v4828_v17, %s4506_s21 }
 0xf32   : > { %2327 = vrot.lane.b32.xlu1 %v4957_v9, %s4507_s22 }
 0xf34   : > { %2261 = vrot.lane.b32.xlu0 %v4922_v11, %s4506_s21 }
 0xf36   : > { %2325 = vrot.lane.b32.xlu1 %v4758_v0, %s4507_s22 }
 0xf38   : > { %2321 = vrot.lane.b32.xlu0 %v4755_v61, %s4507_s22 }
 0xf3a   : > { %2323 = vrot.lane.b32.xlu1 %v4973_v26, %s4507_s22 }
 0xfa2   : > { %v2244_v12 = vpop.xlane.xlu0 %2243 }
 0xfa3   : > { %4383 = vrcp.f32 %v2244_v12 }
 0xfa6   : > { %v2250_v14 = vpop.xlane.xlu1 %2249 }
 0xfa7   : > { %v2247_v22 = vpop.xlane.xlu0 %2246  ;;  %4385 = vrcp.f32 %v2250_v14 }
 0xfa8   : > { %4387 = vrcp.f32 %v2247_v22 }
 0xfaa   : > { %v2260_v9 = vpop.permute.xlu1 %2259 }
 0xfab   : > { %v2262_v46 = vpop.permute.xlu0 %2261 }
 0xfac   : > { %v2271_v16 = vsel %vm1182_vm4, %v2262_v46, 0  ;;  %4150 = vmatprep.subr.msk.bf16.mxu0 %vm1182_vm4, %v2262_v46 }
 0xfad   : > { %4059 = vmatpush3.bf16.msra.mxu0 %v2271_v16 }
 0xfae   : > { %4060 = vmatprep.subr.bf16.mxu0 %v2260_v9  ;;  %v2328_v0 = vpop.permute.xlu1 %2327 }
 0xfaf   : > { %v2322_v38 = vpop.permute.xlu0 %2321  ;;  %v2339_v1 = vsel %vm1073_vm0, %v2328_v0, 0 }
 0xfb0   : > { %v4384_v61 = vpop.eup %4383 }
 0xfb1   : > { %4061 = vmatpush3.bf16.msra.mxu0 %v2260_v9  ;;  %v2254_v29 = vmul.f32 %v4384_v61, %v4378_v63 }
 0xfb2   : > { %4151 = vmatprep.subr.msk.bf16.mxu0 %vm1073_vm0, %v2328_v0  ;;  %v2326_v42 = vpop.permute.xlu1 %2325 }
 0xfb3   : > { %v2336_v45 = vsel %vm1073_vm0, %v2326_v42, 0 }
 0xfb4   : > { %v4386_v26 = vpop.eup %4385 }
 0xfb5   : > { %v4388_v24 = vpop.eup %4387  ;;  %v2256_v25 = vmul.f32 %v4386_v26, %v4380_v3 }
 0xfb6   : > { %v2255_v32 = vmul.f32 %v4388_v24, %v4382_v5  ;;  %v2324_v47 = vpop.permute.xlu1 %2323 }
 0xfb7   : > { %v2258_v36 = vpack.c.bf16 %v2256_v25, %v2256_v25 }
 0xfb8   : > { %v2257_v37 = vpack.c.bf16 %v2255_v32, %v2254_v29 }
 0xfba   : > { %4062 = vmatprep.mubr.msk.bf16.mxu0 %vm1140_vm3, %v2257_v37 }
 0xfbb   : > { %4063 = vmatmul.mubr.msk.bf16.vlgmr.msra.gmra.mxu0 %vm1140_vm3, %v2258_v36 }
 0xfbc   : > { %4067 = vmatpush3.bf16.xpose.msra.mxu0 %v2339_v1  ;;  %4070 = vmatprep.mubr.msk.bf16.mxu0 %vm1073_vm0, %v2322_v38 }
 0xfbd   : > { %4152 = vmatprep.subr.msk.bf16.mxu0 %vm1073_vm0, %v2326_v42 }
 0xfc4   : > { %4069 = vmatpush3.bf16.xpose.msra.mxu0 %v2336_v45  ;;  %v4195_v45 = vpack.i.bf16 %v5049_v13, %v4883_v56 }
 0xfcb   : > { %4071 = vmatmul.mubr.msk.bf16.vlgmr.msra.gmra.mxu0 %vm1073_vm0, %v2324_v47  ;;  %v4259_v47 = vld [vmem:[%s4621_s18 + $0x28] sm:$0xff]  }
 0xfcc   : > { %2910 = vmatprep.mubr.bf16.mxu0 %v4501_v8 }
0x107b   : > { %v5087_v52 = vpop.f32.mrf.mxu0 }
0x107d   : > { %v2307_v55 = vpop.f32.mrf.mxu0 }
0x107f   : > { %v4065_v44 = vpop.f32.mrf.mxu0 }
0x1081   : > { %v5089_v4 = vpop.f32.mrf.mxu0 }
0x1082   : > { %v4215_v51 = vpack.i.bf16 %v5087_v52, %v5089_v4  ;;  %v4450_v52 = vld [vmem:[#allocation2 + $0x28] sm:$0xff] }
0x108b   : > { %v4072_v53 = vpop.f32.mrf.mxu0 }
0x108c   : > { %v2391_v59 = vmul.f32 0.17677669, %v4072_v53  ;;  %v4261_v53 = vld [vmem:[%s4621_s18 + $0x18] sm:$0xff]  }
0x108d   : > { %v2375_v54 = vpop.f32.mrf.mxu0 }
0x108e   : > { %v2389_v63 = vmul.f32 0.17677669, %v2375_v54  ;;  %v2394_v12 = vadd.f32 %v2391_v59, %v4796_v18  ;;  %v4262_v59 = vld [vmem:[%s4621_s18 + $0x10] sm:$0xff]  }
0x108f   : > { %v4073_v2 = vpop.f32.mrf.mxu0 }
0x1090   : > { %v2392_v3 = vadd.f32 %v2389_v63, %v4796_v18  ;;  %v2401_v22 = vsel %vm1140_vm3, %v2394_v12, -inf }
0x1091   : > { %v2378_v5 = vpop.f32.mrf.mxu0 }
0x1092   : > { %v2390_v35 = vmul.f32 0.17677669, %v2378_v5  ;;  %v2395_v10 = vsel %vm1140_vm3, %v2392_v3, -inf }
0x1093   : > { %2396 = vmax.xlane.f32.xlu0 %v2395_v10 }
0x1094   : > { %v2393_v14 = vadd.f32 %v2390_v35, %v4796_v18  ;;  %v4263_v35 = vld [vmem:[%s4621_s18 + $0x8] sm:$0xff]  }
0x1096   : > { %v2398_v46 = vsel %vm1140_vm3, %v2393_v14, -inf }
0x1097   : > { %2402 = vmax.xlane.f32.xlu0 %v2401_v22  ;;  %2399 = vmax.xlane.f32.xlu1 %v2398_v46 }
0x111c   : > { %v2397_v9 = vpop.xlane.xlu0 %2396 }
0x111d   : > { %v2404_v16 = vsub.f32 %v2392_v3, %v2397_v9 }
0x111f   : > { %v2407_v0 = vmul.f32 1.442695, %v2404_v16 }
0x1120   : > { %v2403_v61 = vpop.xlane.xlu0 %2402  ;;  %v2400_v26 = vpop.xlane.xlu1 %2399 }
0x1121   : > { %4389 = vpow2.f32 %v2407_v0  ;;  %v2406_v24 = vsub.f32 %v2394_v12, %v2403_v61  ;;  %v2405_v25 = vsub.f32 %v2393_v14, %v2400_v26  ;;  %v4264_v0 = vld [vmem:[%s4621_s18] sm:$0xff]  }
0x1123   : > { %v2411_v29 = vmul.f32 1.442695, %v2406_v24  ;;  %v2409_v32 = vmul.f32 1.442695, %v2405_v25 }
0x1125   : > { %4391 = vpow2.f32 %v2411_v29 }
0x1126   : > { %4393 = vpow2.f32 %v2409_v32 }
0x112e   : > { %v4390_v36 = vpop.eup %4389 }
0x112f   : > { %v2413_v18 = vsel %vm1140_vm3, %v4390_v36, 0.0 }
0x1130   : > { %2414 = vadd.xlane.f32.xlu0 %v2413_v18 }
0x1132   : > { %v4392_v37 = vpop.eup %4391 }
0x1133   : > { %v4394_v38 = vpop.eup %4393  ;;  %v2419_v1 = vsel %vm1140_vm3, %v4392_v37, 0.0 }
0x1134   : > { %2420 = vadd.xlane.f32.xlu1 %v2419_v1  ;;  %v2416_v42 = vsel %vm1140_vm3, %v4394_v38, 0.0 }
0x1135   : > { %2417 = vadd.xlane.f32.xlu0 %v2416_v42 }
0x1145   : > { %2430 = vrot.lane.b32.xlu1 %v4828_v17, %s4507_s22  ;;  %v4200_v17 = vpack.i.bf16 %v2307_v55, %v4932_v58  ;;  %v4260_v55 = vld [vmem:[%s4621_s18 + $0x20] sm:$0xff]  }
0x1149   : > { %4181 = vrot.lane.b32.xlu1 %v4180_v62, %s4507_s22 }
0x114b   : > { %2432 = vrot.lane.b32.xlu0 %v4922_v11, %s4507_s22 }
0x114d   : > { %4186 = vrot.lane.b32.xlu1 %v4185_v20, %s4506_s21 }
0x114f   : > { %4191 = vrot.lane.b32.xlu0 %v4190_v31, %s4505_s14 }
0x1151   : > { %4196 = vrot.lane.b32.xlu1 %v4195_v45, %s4507_s22 }
0x1153   : > { %4201 = vrot.lane.b32.xlu0 %v4200_v17, %s4506_s21  ;;  %v4449_v17 = vld [vmem:[#allocation2 + $0x10] sm:$0xff] }
0x1157   : > { %4211 = vrot.lane.b32.xlu0 %v4210_v21, %s4507_s22  ;;  %v4258_v21 = vld [vmem:[%s4621_s18 + $0x30] sm:$0xff]   ;;  %s5477_s22 = sld [smem:[#allocation16_spill]] (!%p3778_p5) }
0x11b9   : > { %v2415_v57 = vpop.xlane.xlu0 %2414 }
0x11ba   : > { %4395 = vrcp.f32 %v2415_v57 }
0x11bd   : > { %v2421_v60 = vpop.xlane.xlu1 %2420 }
0x11be   : > { %v2418_v56 = vpop.xlane.xlu0 %2417  ;;  %4397 = vrcp.f32 %v2421_v60 }
0x11bf   : > { %4399 = vrcp.f32 %v2418_v56 }
0x11c1   : > { %v2431_v58 = vpop.permute.xlu1 %2430 }
0x11c2   : > { %v2433_v62 = vpop.permute.xlu0 %2432 }
0x11c3   : > { %v2442_v11 = vsel %vm1182_vm4, %v2433_v62, 0  ;;  %4153 = vmatprep.subr.msk.bf16.mxu1 %vm1182_vm4, %v2433_v62 }
0x11c4   : > { %4075 = vmatpush3.bf16.msra.mxu1 %v2442_v11 }
0x11c5   : > { %4076 = vmatprep.subr.bf16.mxu1 %v2431_v58  ;;  %v4182_v44 = vpop.permute.xlu1 %4181 }
0x11c6   : > { %v4184_v63 = vunpack.i.h.bf16 %v4182_v44  ;;  %v4183_v2 = vunpack.i.l.bf16 %v4182_v44  ;;  %v4192_v10 = vpop.permute.xlu0 %4191 }
0x11c7   : > { %v4396_v23 = vpop.eup %4395  ;;  %v4194_v9 = vunpack.i.h.bf16 %v4192_v10  ;;  %v4193_v16 = vunpack.i.l.bf16 %v4192_v10 }
0x11c8   : > { %4077 = vmatpush3.bf16.msra.mxu1 %v2431_v58  ;;  %v2425_v30 = vmul.f32 %v4396_v23, %v4390_v36  ;;  %v1790_v12 = vsel %vm1073_vm0, %v4848_v43, %v4184_v63  ;;  %v1789_v14 = vsel %vm1073_vm0, %v4846_v40, %v4183_v2 }
0x11c9   : > { %4082 = vmatprep.subr.bf16.mxu1 %v4502_v6  ;;  %v4187_v54 = vpop.permute.xlu1 %4186 }
0x11ca   : > { %v4189_v3 = vunpack.i.h.bf16 %v4187_v54  ;;  %v4188_v5 = vunpack.i.l.bf16 %v4187_v54  ;;  %v4202_v60 = vpop.permute.xlu0 %4201 }
0x11cb   : > { %v4398_v19 = vpop.eup %4397 }
0x11cc   : > { %v4400_v20 = vpop.eup %4399  ;;  %v2427_v28 = vmul.f32 %v4398_v19, %v4392_v37  ;;  %v1793_v22 = vsel %vm1792_vm5, %v1789_v14, %v4188_v5  ;;  %v1794_v46 = vsel %vm1792_vm5, %v1790_v12, %v4189_v3  ;;  %v4204_v19 = vunpack.i.h.bf16 %v4202_v60 }
0x11cd   : > { %v2426_v31 = vmul.f32 %v4400_v20, %v4394_v38  ;;  %v1797_v61 = vsel %vm1796_vm6, %v1793_v22, %v4193_v16  ;;  %v1798_v26 = vsel %vm1796_vm6, %v1794_v46, %v4194_v9  ;;  %v5171_v38 = vld [vmem:[%s5471_s17] ss:$0 sm:$0xff]  ;;  %v4203_v20 = vunpack.i.l.bf16 %v4202_v60  ;;  %v4451_v9 = vld [vmem:[#allocation2 + $0x8] sm:$0xff]  ;;  %v4267_v60 = vld [vmem:[%s4649_s20 + $0x74] ss:$8 sps:$4 sm:$0xff]  }
0x11ce   : > { %v2429_v7 = vpack.c.bf16 %v2427_v28, %v2427_v28  ;;  %v2537_v43 = vpack.c.bf16 %v1798_v26, %v1797_v61  ;;  %v4212_v11 = vpop.permute.xlu0 %4211  ;;  %2878 = vmatprep.subr.bf16.mxu0 %v4267_v60  ;;  %v4300_v60 = vld [vmem:[%s4660_s13 + $0x10] sm:$0xff]  }
0x11cf   : > { %v2428_v13 = vpack.c.bf16 %v2426_v31, %v2425_v30 }
0x11d1   : > { %4078 = vmatprep.mubr.msk.bf16.mxu1 %vm1140_vm3, %v2428_v13  ;;  %v4213_v13 = vunpack.i.l.bf16 %v4212_v11 }
0x11d2   : > { %4079 = vmatmul.mubr.msk.bf16.vlgmr.msra.gmra.mxu1 %vm1140_vm3, %v2429_v7  ;;  %v4214_v7 = vunpack.i.h.bf16 %v4212_v11  ;;  %v4273_v11 = vld [vmem:[%s4649_s20 + $0x54] ss:$8 sps:$4 sm:$0xff]  }
0x11d3   : > { %4083 = vmatpush3.bf16.msra.mxu1 %v4257_v15  ;;  %4098 = vmatprep.mubr.msk.bf16.mxu1 %vm4503_vm1, %v4502_v6  ;;  %v2529_v3 = vsel %vm1073_vm0, %v5014_v50, %v4213_v13  ;;  %v4283_v13 = vld [vmem:[%s4649_s20 + $0x10] ss:$8 sps:$4 sm:$0xff]  }
0x11d4   : > { %4084 = vmatprep.subr.bf16.mxu1 %v4502_v6  ;;  %v2530_v2 = vsel %vm1073_vm0, %v5010_v48, %v4214_v7  ;;  %v4285_v7 = vld [vmem:[%s4649_s20 + $0x14] ss:$8 sps:$4 sm:$0xff]  }
0x11d7   : > { %4085 = vmatpush3.bf16.msra.mxu1 %v4258_v21 }
0x11d8   : > { %4086 = vmatprep.subr.bf16.mxu1 %v4502_v6 }
0x11db   : > { %4087 = vmatpush3.bf16.msra.mxu1 %v4259_v47 }
0x11dc   : > { %4088 = vmatprep.subr.bf16.mxu1 %v4502_v6 }
0x11df   : > { %4089 = vmatpush3.bf16.msra.mxu1 %v4260_v55 }
0x11e0   : > { %4090 = vmatprep.subr.bf16.mxu1 %v4502_v6 }
0x11e3   : > { %4091 = vmatpush3.bf16.msra.mxu1 %v4261_v53 }
0x11e4   : > { %4092 = vmatprep.subr.bf16.mxu1 %v4502_v6 }
0x11e7   : > { %4093 = vmatpush3.bf16.msra.mxu1 %v4262_v59 }
0x11e8   : > { %4094 = vmatprep.subr.bf16.mxu1 %v4502_v6 }
0x11eb   : > { %4095 = vmatpush3.bf16.msra.mxu1 %v4263_v35 }
0x11ec   : > { %4096 = vmatprep.subr.bf16.mxu1 %v4502_v6 }
0x11ef   : > { %4097 = vmatpush3.bf16.msra.mxu1 %v4264_v0 }
0x11f2   : > { %4099 = vmatmul.mubr.bf16.vlgmr.msra.gmra.mxu1 %v2537_v43  ;;  %v4452_v43 = vld [vmem:[#allocation2] sm:$0xff] }
0x11f3   : > { %4102 = vmatprep.mubr.msk.bf16.mxu1 %vm4503_vm1, %v4502_v6 }
0x1292   : > { %v4080_v40 = vpop.f32.mrf.mxu1 }
0x1294   : > { %v2478_v24 = vpop.f32.mrf.mxu1 }
0x1295   : > { %v4205_v25 = vpack.i.bf16 %v2478_v24, %v4977_v27 }
0x1296   : > { %v4081_v29 = vpop.f32.mrf.mxu1 }
0x1297   : > { %4206 = vrot.lane.b32.xlu1 %v4205_v25, %s4505_s14 }
0x1298   : > { %v2481_v32 = vpop.f32.mrf.mxu1 }
0x1299   : > { %v4220_v36 = vpack.i.bf16 %v4080_v40, %v2481_v32 }
0x129b   : > { %4216 = vrot.lane.b32.xlu1 %v4215_v51, %s4506_s21  ;;  %4221 = vrot.lane.b32.xlu0 %v4220_v36, %s4505_s14  ;;  %v4197_v51 = vpop.permute.xlu1 %4196 }
0x129c   : > { %v4199_v56 = vunpack.i.h.bf16 %v4197_v51  ;;  %v4198_v62 = vunpack.i.l.bf16 %v4197_v51 }
0x129e   : > { %v2528_v58 = vsel %vm1073_vm0, %v5012_v49, %v4199_v56  ;;  %v1791_v23 = vsel %vm1073_vm0, %v4844_v39, %v4198_v62  ;;  %v4265_v56 = vld [vmem:[%s4649_s20 + $0x70] ss:$8 sps:$4 sm:$0xff]   ;;  %v4268_v62 = vld [vmem:[%s4649_s20 + $0x60] ss:$8 sps:$4 sm:$0xff]  }
0x129f   : > { %v1795_v15 = vsel %vm1792_vm5, %v1791_v23, %v4203_v20  ;;  %v2531_v21 = vsel %vm1792_vm5, %v2528_v58, %v4204_v19  ;;  %2879 = vmatpush1.bf16.msra.mxu0 %v4265_v56  ;;  %v4271_v58 = vld [vmem:[%s4649_s20 + $0x50] ss:$8 sps:$4 sm:$0xff]   ;;  %v4274_v23 = vld [vmem:[%s4649_s20 + $0x40] ss:$8 sps:$4 sm:$0xff]   ;;  %v4276_v19 = vld [vmem:[%s4649_s20 + $0x44] ss:$8 sps:$4 sm:$0xff]  }
0x12a0   : > { %v4279_v20 = vld [vmem:[%s4649_s20 + $0x34] ss:$8 sps:$4 sm:$0xff]   ;;  %v4301_v56 = vld [vmem:[%s4660_s13 + $0x48] sm:$0xff]  }
0x12b2   : > { %v2645_v18 = vpop.f32.mrf.mxu1 }
0x12b3   : > { %v2646_v45 = vadd.f32 %v5171_v38, %v2645_v18 }
0x12b4   : > { %v4100_v37 = vpop.f32.mrf.mxu1 }
0x12b5   : > { %v2668_v4 = vadd.f32 %v4450_v52, %v2646_v45  ;;  %v4453_v37 = vld [vmem:[#allocation2 + $0x18] sm:$0xff]  ;;  %v4454_v52 = vld [vmem:[#allocation2 + $0x20] sm:$0xff] }
0x12b6   : > { %v2648_v27 = vpop.f32.mrf.mxu1 }
0x12b7   : > { %v2649_v1 = vadd.f32 %v5171_v38, %v2648_v27 }
0x12b8   : > { %v4101_v42 = vpop.f32.mrf.mxu1 }
0x12b9   : > { %v5175_v57 = vadd.f32 %v4449_v17, %v2649_v1 }
0x12bb   : > { %2678 = vadd.xlane.f32.xlu0 %v5175_v57 }
0x12bf   : > { %2676 = vadd.xlane.f32.xlu1 %v2668_v4 }
0x1309   : > { %v4207_v28 = vpop.permute.xlu1 %4206 }
0x130a   : > { %v4209_v30 = vunpack.i.h.bf16 %v4207_v28  ;;  %v4208_v31 = vunpack.i.l.bf16 %v4207_v28  ;;  %v4277_v28 = vld [vmem:[%s4649_s20 + $0x30] ss:$8 sps:$4 sm:$0xff]  }
0x130c   : > { %v1799_v47 = vsel %vm1796_vm6, %v1795_v15, %v4208_v31  ;;  %v2534_v55 = vsel %vm1796_vm6, %v2531_v21, %v4209_v30  ;;  %v4282_v30 = vld [vmem:[%s4649_s20 + $0x24] ss:$8 sps:$4 sm:$0xff]   ;;  %v4280_v31 = vld [vmem:[%s4649_s20 + $0x20] ss:$8 sps:$4 sm:$0xff]  }
0x130d   : > { %v4222_v44 = vpop.permute.xlu0 %4221  ;;  %v4217_v49 = vpop.permute.xlu1 %4216  ;;  %v2538_v53 = vpack.c.bf16 %v2534_v55, %v1799_v47  ;;  %v4288_v15 = vld [vmem:[%s4649_s20 + $0x4] ss:$8 sps:$4 sm:$0xff]   ;;  %v4286_v21 = vld [vmem:[%s4649_s20] ss:$8 sps:$4 sm:$0xff]  }
0x130e   : > { %v4224_v54 = vunpack.i.h.bf16 %v4222_v44  ;;  %v4223_v39 = vunpack.i.l.bf16 %v4222_v44  ;;  %v4219_v59 = vunpack.i.h.bf16 %v4217_v49  ;;  %v4218_v63 = vunpack.i.l.bf16 %v4217_v49 }
0x130f   : > { %4103 = vmatmul.mubr.bf16.gmra.mxu1 %v2538_v53 }
0x1310   : > { %v2533_v5 = vsel %vm1792_vm5, %v2530_v2, %v4219_v59  ;;  %v2532_v35 = vsel %vm1792_vm5, %v2529_v3, %v4218_v63  ;;  %4106 = vmatprep.mubr.msk.bf16.mxu1 %vm4503_vm1, %v4502_v6 }
0x1311   : > { %v2535_v10 = vsel %vm1796_vm6, %v2532_v35, %v4223_v39  ;;  %v2536_v12 = vsel %vm1796_vm6, %v2533_v5, %v4224_v54 }
0x1312   : > { %v2539_v14 = vpack.c.bf16 %v2536_v12, %v2535_v10 }
0x1317   : > { %4107 = vmatmul.mubr.bf16.gmra.mxu1 %v2539_v14 }
0x1344   : > { %v2679_v24 = vpop.xlane.xlu0 %2678 }
0x1345   : > { %v2690_v36 = vmul.f32 0.0078125, %v2679_v24  ;;  %v5260_v24 = vld [vmem:[%s5473_s0] ss:$0 sm:$0xff] }
0x1347   : > { %v5206_v17 = vsub.f32 %v5175_v57, %v2690_v36  ;;  %v4270_v57 = vld [vmem:[%s4649_s20 + $0x64] ss:$8 sps:$4 sm:$0xff]  }
0x1348   : > { %v2677_v16 = vpop.xlane.xlu1 %2676  ;;  %2880 = vmatprep.subr.bf16.mxu0 %v4270_v57  ;;  %v4302_v57 = vld [vmem:[%s4660_s13 + $0x8] sm:$0xff]  }
0x1349   : > { %v2689_v26 = vmul.f32 0.0078125, %v2677_v16  ;;  %2881 = vmatpush1.bf16.msra.mxu0 %v4268_v62  ;;  %v4303_v62 = vld [vmem:[%s4660_s13 + $0x40] sm:$0xff]  }
0x134a   : > { %2882 = vmatprep.subr.bf16.mxu0 %v4273_v11  ;;  %v4304_v11 = vld [vmem:[%s4660_s13] sm:$0xff]  }
0x134b   : > { %v5202_v18 = vsub.f32 %v2668_v4, %v2689_v26 }
0x134d   : > { %v2701_v4 = vmul.f32 %v5202_v18, %v5202_v18  ;;  %2883 = vmatpush1.bf16.msra.mxu0 %v4271_v58 }
0x134e   : > { %2884 = vmatprep.subr.bf16.mxu0 %v4276_v19 }
0x1351   : > { %2885 = vmatpush1.bf16.msra.mxu0 %v4274_v23 }
0x1352   : > { %2886 = vmatprep.subr.bf16.mxu0 %v4279_v20 }
0x1355   : > { %2887 = vmatpush1.bf16.msra.mxu0 %v4277_v28 }
0x1356   : > { %2888 = vmatprep.subr.bf16.mxu0 %v4282_v30 }
0x1359   : > { %2889 = vmatpush1.bf16.msra.mxu0 %v4280_v31 }
0x135a   : > { %2890 = vmatprep.subr.bf16.mxu0 %v4285_v7 }
0x135d   : > { %2891 = vmatpush1.bf16.msra.mxu0 %v4283_v13 }
0x135e   : > { %2892 = vmatprep.subr.bf16.mxu0 %v4288_v15 }
0x1361   : > { %2893 = vmatpush1.bf16.msra.mxu0 %v4286_v21 }
0x13cf   : > { %v2653_v22 = vpop.f32.mrf.mxu1 }
0x13d0   : > { %v2654_v48 = vadd.f32 %v5171_v38, %v2653_v22 }
0x13d1   : > { %v4104_v46 = vpop.f32.mrf.mxu1 }
0x13d2   : > { %v5197_v50 = vadd.f32 %v4451_v9, %v2654_v48 }
0x13d3   : > { %v2656_v0 = vpop.f32.mrf.mxu1 }
0x13d4   : > { %v2657_v61 = vadd.f32 %v5171_v38, %v2656_v0  ;;  %2680 = vadd.xlane.f32.xlu0 %v5197_v50 }
0x13d5   : > { %v4105_v6 = vpop.f32.mrf.mxu1 }
0x13d6   : > { %v2671_v40 = vadd.f32 %v4452_v43, %v2657_v61  ;;  %v5251_v6 = vld [vmem:[%s5472_s15] ss:$0 sm:$0xff] }
0x13d7   : > { %v2661_v25 = vpop.f32.mrf.mxu1 }
0x13d8   : > { %v2662_v29 = vadd.f32 %v5171_v38, %v2661_v25  ;;  %2682 = vadd.xlane.f32.xlu0 %v2671_v40 }
0x13d9   : > { %v4108_v32 = vpop.f32.mrf.mxu1 }
0x13da   : > { %v2672_v27 = vadd.f32 %v4453_v37, %v2662_v29  ;;  %v4290_v37 = vld [vmem:[%s4660_s13 + $0x38] sm:$0xff]  }
0x13db   : > { %v2664_v1 = vpop.f32.mrf.mxu1 }
0x13dc   : > { %v2665_v42 = vadd.f32 %v5171_v38, %v2664_v1  ;;  %2684 = vadd.xlane.f32.xlu1 %v2672_v27  ;;  %v2702_v38 = vmul.f32 %v5206_v17, %v5206_v17  ;;  %v4292_v1 = vld [vmem:[%s4660_s13 + $0x30] sm:$0xff]  }
0x13dd   : > { %v4109_v45 = vpop.f32.mrf.mxu1 }
0x13de   : > { %v2673_v51 = vadd.f32 %v4454_v52, %v2665_v42  ;;  %v4293_v42 = vld [vmem:[%s4660_s13 + $0x68] sm:$0xff]   ;;  %v4296_v52 = vld [vmem:[%s4660_s13 + $0x20] sm:$0xff]  }
0x13df   : > { %v4294_v45 = vld [vmem:[%s4660_s13 + $0x28] sm:$0xff]  }
0x13e0   : > { %2707 = vadd.xlane.f32.xlu1 %v2701_v4  ;;  %2686 = vadd.xlane.f32.xlu0 %v2673_v51  ;;  %v4298_v4 = vld [vmem:[%s4660_s13 + $0x18] sm:$0xff]  }
0x13e4   : > { %2709 = vadd.xlane.f32.xlu0 %v2702_v38  ;;  %v4299_v38 = vld [vmem:[%s4660_s13 + $0x50] sm:$0xff]  }
0x145d   : > { %v2681_v47 = vpop.xlane.xlu0 %2680 }
0x145e   : > { %v2691_v55 = vmul.f32 0.0078125, %v2681_v47 }
0x1460   : > { %v5229_v44 = vsub.f32 %v5197_v50, %v2691_v55 }
0x1461   : > { %v2683_v49 = vpop.xlane.xlu0 %2682 }
0x1462   : > { %v2692_v53 = vmul.f32 0.0078125, %v2683_v49  ;;  %v2703_v54 = vmul.f32 %v5229_v44, %v5229_v44 }
0x1464   : > { %v5233_v39 = vsub.f32 %v2671_v40, %v2692_v53  ;;  %2711 = vadd.xlane.f32.xlu1 %v2703_v54 }
0x1465   : > { %v2685_v59 = vpop.xlane.xlu1 %2684 }
0x1466   : > { %v2693_v63 = vmul.f32 0.0078125, %v2685_v59  ;;  %v2704_v2 = vmul.f32 %v5233_v39, %v5233_v39 }
0x1468   : > { %v5237_v3 = vsub.f32 %v2672_v27, %v2693_v63  ;;  %2713 = vadd.xlane.f32.xlu0 %v2704_v2  ;;  %v4291_v27 = vld [vmem:[%s4660_s13 + $0x70] sm:$0xff]  }
0x1469   : > { %v2708_v5 = vpop.xlane.xlu1 %2707  ;;  %v2687_v35 = vpop.xlane.xlu0 %2686 }
0x146a   : > { %v2719_v10 = vmul.f32 0.0078125, %v2708_v5  ;;  %v2694_v12 = vmul.f32 0.0078125, %v2687_v35  ;;  %v2705_v14 = vmul.f32 %v5237_v3, %v5237_v3 }
0x146c   : > { %v2725_v22 = vadd.f32 1e-05, %v2719_v10  ;;  %v5241_v48 = vsub.f32 %v2673_v51, %v2694_v12  ;;  %2715 = vadd.xlane.f32.xlu1 %v2705_v14  ;;  %v4297_v51 = vld [vmem:[%s4660_s13 + $0x58] sm:$0xff]  }
0x146d   : > { %v2710_v46 = vpop.xlane.xlu0 %2709 }
0x146e   : > { %4401 = vrsqrt.f32 %v2725_v22  ;;  %v2720_v9 = vmul.f32 0.0078125, %v2710_v46  ;;  %v2706_v50 = vmul.f32 %v5241_v48, %v5241_v48 }
0x1470   : > { %v2726_v16 = vadd.f32 1e-05, %v2720_v9  ;;  %2717 = vadd.xlane.f32.xlu0 %v2706_v50  ;;  %v2786_v50 = vld [vmem:[%s4655_s16] sm:$0x3] }
0x1472   : > { %4403 = vrsqrt.f32 %v2726_v16 }
0x147b   : > { %v4402_v0 = vpop.eup %4401 }
0x147c   : > { %v2737_v61 = vmul.f32 %v4402_v0, %v5202_v18  ;;  %v4289_v18 = vld [vmem:[%s4660_s13 + $0x78] sm:$0xff]  }
0x147d   : > { %3883 = vmatprep.subr.bf16.mxu1 %v4289_v18 }
0x147e   : > { %v2749_v40 = vmul.f32 %v5251_v6, %v2737_v61  ;;  %3884 = vmatpush3.bf16.msra.mxu1 %v4290_v37 }
0x147f   : > { %v4404_v26 = vpop.eup %4403  ;;  %3885 = vmatprep.subr.bf16.mxu1 %v4291_v27 }
0x1480   : > { %v2738_v43 = vmul.f32 %v4404_v26, %v5206_v17  ;;  %v5264_v29 = vadd.f32 %v5260_v24, %v2749_v40  ;;  %v4295_v17 = vld [vmem:[%s4660_s13 + $0x60] sm:$0xff]  }
0x1482   : > { %v2750_v25 = vmul.f32 %v5251_v6, %v2738_v43  ;;  %3886 = vmatpush3.bf16.msra.mxu1 %v4292_v1 }
0x1483   : > { %3887 = vmatprep.subr.bf16.mxu1 %v4293_v42 }
0x1484   : > { %v5267_v32 = vadd.f32 %v5260_v24, %v2750_v25 }
0x1486   : > { %v2767_v36 = vpack.c.bf16 %v5267_v32, %v5264_v29  ;;  %3888 = vmatpush3.bf16.msra.mxu1 %v4294_v45 }
0x1487   : > { %3889 = vmatprep.subr.bf16.mxu1 %v4295_v17 }
0x1488   : > { %2911 = vmatmul.mubr.bf16.vlgmr.msra.gmra.mxu0 %v2767_v36 }
0x1489   : > { %2920 = vmatprep.mubr.bf16.mxu0 %v4501_v8 }
0x148a   : > { %3890 = vmatpush3.bf16.msra.mxu1 %v4296_v52 }
0x148b   : > { %3891 = vmatprep.subr.bf16.mxu1 %v4297_v51 }
0x148e   : > { %3892 = vmatpush3.bf16.msra.mxu1 %v4298_v4 }
0x148f   : > { %3893 = vmatprep.subr.bf16.mxu1 %v4299_v38 }
0x1492   : > { %3894 = vmatpush3.bf16.msra.mxu1 %v4300_v60 }
0x1493   : > { %3895 = vmatprep.subr.bf16.mxu1 %v4301_v56 }
0x1496   : > { %3896 = vmatpush3.bf16.msra.mxu1 %v4302_v57 }
0x1497   : > { %3897 = vmatprep.subr.bf16.mxu1 %v4303_v62 }
0x149a   : > { %3898 = vmatpush3.bf16.msra.mxu1 %v4304_v11 }
0x14ed   : > { %v2712_v58 = vpop.xlane.xlu1 %2711 }
0x14ee   : > { %v2721_v23 = vmul.f32 0.0078125, %v2712_v58 }
0x14f0   : > { %v2727_v19 = vadd.f32 1e-05, %v2721_v23 }
0x14f1   : > { %v2714_v20 = vpop.xlane.xlu0 %2713 }
0x14f2   : > { %4405 = vrsqrt.f32 %v2727_v19  ;;  %v2722_v28 = vmul.f32 0.0078125, %v2714_v20 }
0x14f4   : > { %v2728_v30 = vadd.f32 1e-05, %v2722_v28 }
0x14f5   : > { %v2716_v31 = vpop.xlane.xlu1 %2715 }
0x14f6   : > { %4407 = vrsqrt.f32 %v2728_v30  ;;  %v2723_v7 = vmul.f32 0.0078125, %v2716_v31 }
0x14f8   : > { %v2729_v13 = vadd.f32 1e-05, %v2723_v7 }
0x14f9   : > { %v2718_v15 = vpop.xlane.xlu0 %2717 }
0x14fa   : > { %4409 = vrsqrt.f32 %v2729_v13  ;;  %v2724_v21 = vmul.f32 0.0078125, %v2718_v15 }
0x14fc   : > { %v2730_v47 = vadd.f32 1e-05, %v2724_v21 }
0x14fe   : > { %4411 = vrsqrt.f32 %v2730_v47 }
0x14ff   : > { %v4406_v55 = vpop.eup %4405 }
0x1500   : > { %v2739_v49 = vmul.f32 %v4406_v55, %v5229_v44 }
0x1502   : > { %v2751_v59 = vmul.f32 %v5251_v6, %v2739_v49 }
0x1503   : > { %v4408_v53 = vpop.eup %4407 }
0x1504   : > { %v2740_v54 = vmul.f32 %v4408_v53, %v5233_v39  ;;  %v5293_v5 = vadd.f32 %v5260_v24, %v2751_v59 }
0x1506   : > { %v2752_v63 = vmul.f32 %v5251_v6, %v2740_v54 }
0x1507   : > { %v4410_v2 = vpop.eup %4409 }
0x1508   : > { %v5296_v35 = vadd.f32 %v5260_v24, %v2752_v63  ;;  %v2741_v10 = vmul.f32 %v4410_v2, %v5237_v3 }
0x150a   : > { %v2768_v44 = vpack.c.bf16 %v5296_v35, %v5293_v5  ;;  %v2753_v14 = vmul.f32 %v5251_v6, %v2741_v10 }
0x150b   : > { %v4412_v12 = vpop.eup %4411 }
0x150c   : > { %2921 = vmatmul.mubr.bf16.gmra.mxu0 %v2768_v44  ;;  %v2742_v39 = vmul.f32 %v4412_v12, %v5241_v48  ;;  %v5306_v46 = vadd.f32 %v5260_v24, %v2753_v14  ;;  %v5316_v48 = vrot.slane %v2786_v50, %v775_v34 }
0x150d   : > { %2930 = vmatprep.mubr.bf16.mxu0 %v4501_v8  ;;  %v5320_v8 = vrot.slane %v2786_v50, %v779_v41 }
0x150e   : > { %v2754_v22 = vmul.f32 %v5251_v6, %v2742_v39 }
0x1510   : > { %v5309_v9 = vadd.f32 %v5260_v24, %v2754_v22 }
0x1512   : > { %v2769_v3 = vpack.c.bf16 %v5309_v9, %v5306_v46 }
0x1514   : > { %2931 = vmatmul.mubr.bf16.gmra.mxu0 %v2769_v3 }
0x1548   : > { %v2912_v16 = vpop.f32.mrf.mxu0 }
0x1549   : > { %v2913_v0 = vadd.f32 %v2912_v16, %v5316_v48 }
0x154a   : > { %v2914_v61 = vpop.f32.mrf.mxu0 }
0x154b   : > { %v2953_v6 = vmul.f32 0.044715, %v2913_v0  ;;  %v2915_v26 = vadd.f32 %v2914_v61, %v5320_v8  ;;  %v2941_v21 = vmul.f32 0.5, %v2913_v0 }
0x154c   : > { %v2916_v43 = vpop.f32.mrf.mxu0 }
0x154d   : > { %v2965_v40 = vmul.f32 %v2953_v6, %v2913_v0  ;;  %v2954_v24 = vmul.f32 0.044715, %v2915_v26  ;;  %v2917_v25 = vadd.f32 %v2916_v43, %v5316_v48  ;;  %v2942_v7 = vmul.f32 0.5, %v2915_v26 }
0x154e   : > { %v2918_v36 = vpop.f32.mrf.mxu0 }
0x154f   : > { %v2977_v18 = vmul.f32 %v2965_v40, %v2913_v0  ;;  %v2966_v34 = vmul.f32 %v2954_v24, %v2915_v26  ;;  %v2955_v37 = vmul.f32 0.044715, %v2917_v25  ;;  %v2919_v33 = vadd.f32 %v2918_v36, %v5320_v8 }
0x1550   : > { %v2943_v30 = vmul.f32 0.5, %v2917_v25 }
0x1551   : > { %v2989_v41 = vadd.f32 %v2977_v18, %v2913_v0  ;;  %v2978_v27 = vmul.f32 %v2966_v34, %v2915_v26  ;;  %v2967_v1 = vmul.f32 %v2955_v37, %v2917_v25  ;;  %v2956_v42 = vmul.f32 0.044715, %v2919_v33 }
0x1552   : > { %v2944_v13 = vmul.f32 0.5, %v2919_v33 }
0x1553   : > { %v3001_v45 = vmul.f32 0.7978846, %v2989_v41  ;;  %v2979_v17 = vmul.f32 %v2967_v1, %v2917_v25  ;;  %v2990_v52 = vadd.f32 %v2978_v27, %v2915_v26  ;;  %v2968_v51 = vmul.f32 %v2956_v42, %v2919_v33 }
0x1555   : > { %v2991_v4 = vadd.f32 %v2979_v17, %v2917_v25  ;;  %v3002_v38 = vmul.f32 0.7978846, %v2990_v52  ;;  %v2980_v60 = vmul.f32 %v2968_v51, %v2919_v33  ;;  %4413 = vtanh.f32 %v3001_v45 }
0x1557   : > { %v3003_v56 = vmul.f32 0.7978846, %v2991_v4  ;;  %v2992_v57 = vadd.f32 %v2980_v60, %v2919_v33  ;;  %4415 = vtanh.f32 %v3002_v38 }
0x1559   : > { %4417 = vtanh.f32 %v3003_v56  ;;  %v3004_v62 = vmul.f32 0.7978846, %v2992_v57 }
0x155b   : > { %4419 = vtanh.f32 %v3004_v62 }
0x1562   : > { %v4414_v11 = vpop.eup %4413 }
0x1563   : > { %v3025_v31 = vadd.f32 1.0, %v4414_v11 }
0x1564   : > { %v4416_v58 = vpop.eup %4415 }
0x1565   : > { %v3026_v20 = vadd.f32 1.0, %v4416_v58  ;;  %v3037_v53 = vmul.f32 %v3025_v31, %v2941_v21 }
0x1566   : > { %v4418_v23 = vpop.eup %4417 }
0x1567   : > { %v3027_v19 = vadd.f32 1.0, %v4418_v23  ;;  %v3038_v55 = vmul.f32 %v3026_v20, %v2942_v7 }
0x1568   : > { %v4420_v28 = vpop.eup %4419 }
0x1569   : > { %v3028_v15 = vadd.f32 1.0, %v4420_v28  ;;  %v3039_v47 = vmul.f32 %v3027_v19, %v2943_v30 }
0x156b   : > { %v3040_v49 = vmul.f32 %v3028_v15, %v2944_v13  ;;  %v3049_v59 = vpack.c.bf16 %v3039_v47, %v3037_v53 }
0x156d   : > { %v3050_v54 = vpack.c.bf16 %v3040_v49, %v3038_v55 }
0x156f   : > { %3222 = vmatprep.mubr.bf16.mxu1 %v3050_v54 }
0x1570   : > { %3223 = vmatmul.mubr.bf16.vlgmr.msra.gmra.mxu1 %v3049_v59 }
0x15cc   : > { %v2922_v63 = vpop.f32.mrf.mxu0 }
0x15cd   : > { %v5327_v2 = vadd.f32 %v2922_v63, %v5316_v48 }
0x15ce   : > { %v2924_v10 = vpop.f32.mrf.mxu0 }
0x15cf   : > { %v2957_v44 = vmul.f32 0.044715, %v5327_v2  ;;  %v5331_v12 = vadd.f32 %v2924_v10, %v5320_v8 }
0x15d0   : > { %v2926_v39 = vpop.f32.mrf.mxu0 }
0x15d1   : > { %v2969_v14 = vmul.f32 %v2957_v44, %v5327_v2  ;;  %v2958_v22 = vmul.f32 0.044715, %v5331_v12  ;;  %v2927_v3 = vadd.f32 %v2926_v39, %v5316_v48 }
0x15d2   : > { %v2928_v50 = vpop.f32.mrf.mxu0 }
0x15d3   : > { %v2981_v16 = vmul.f32 %v2969_v14, %v5327_v2  ;;  %v2970_v0 = vmul.f32 %v2958_v22, %v5331_v12  ;;  %v2959_v61 = vmul.f32 0.044715, %v2927_v3  ;;  %v2929_v6 = vadd.f32 %v2928_v50, %v5320_v8 }
0x15d4   : > { %v2932_v26 = vpop.f32.mrf.mxu0  ;;  %v2947_v14 = vmul.f32 0.5, %v2927_v3  ;;  %v2946_v50 = vmul.f32 0.5, %v5331_v12 }
0x15d5   : > { %v2982_v43 = vmul.f32 %v2970_v0, %v5331_v12  ;;  %v2971_v40 = vmul.f32 %v2959_v61, %v2927_v3  ;;  %v2960_v24 = vmul.f32 0.044715, %v2929_v6  ;;  %v5341_v25 = vadd.f32 %v2932_v26, %v5316_v48 }
0x15d6   : > { %v2934_v36 = vpop.f32.mrf.mxu0  ;;  %v2993_v18 = vadd.f32 %v2981_v16, %v5327_v2  ;;  %v2948_v16 = vmul.f32 0.5, %v2929_v6  ;;  %v2945_v61 = vmul.f32 0.5, %v5327_v2 }
0x15d7   : > { %v2983_v34 = vmul.f32 %v2971_v40, %v2927_v3  ;;  %v2972_v37 = vmul.f32 %v2960_v24, %v2929_v6  ;;  %v2961_v33 = vmul.f32 0.044715, %v5341_v25  ;;  %v5346_v41 = vadd.f32 %v2934_v36, %v5320_v8 }
0x15d8   : > { %v2936_v27 = vpop.f32.mrf.mxu0  ;;  %v2994_v1 = vadd.f32 %v2982_v43, %v5331_v12  ;;  %v3005_v42 = vmul.f32 0.7978846, %v2993_v18 }
0x15d9   : > { %v2984_v45 = vmul.f32 %v2972_v37, %v2929_v6  ;;  %v2973_v17 = vmul.f32 %v2961_v33, %v5341_v25  ;;  %v2962_v52 = vmul.f32 0.044715, %v5346_v41  ;;  %v2937_v51 = vadd.f32 %v2936_v27, %v5316_v48 }
0x15da   : > { %v2938_v4 = vpop.f32.mrf.mxu0  ;;  %v3006_v38 = vmul.f32 0.7978846, %v2994_v1  ;;  %v2995_v60 = vadd.f32 %v2983_v34, %v2927_v3  ;;  %v2950_v3 = vmul.f32 0.5, %v5346_v41 }
0x15db   : > { %v2985_v56 = vmul.f32 %v2973_v17, %v5341_v25  ;;  %v2974_v57 = vmul.f32 %v2962_v52, %v5346_v41  ;;  %v2963_v62 = vmul.f32 0.044715, %v2937_v51  ;;  %v2939_v11 = vadd.f32 %v2938_v4, %v5320_v8 }
0x15dc   : > { %v2996_v58 = vadd.f32 %v2984_v45, %v2929_v6  ;;  %4421 = vtanh.f32 %v3006_v38  ;;  %v3007_v23 = vmul.f32 0.7978846, %v2995_v60  ;;  %v2951_v2 = vmul.f32 0.5, %v2937_v51 }
0x15dd   : > { %v2986_v19 = vmul.f32 %v2974_v57, %v5346_v41  ;;  %v2975_v20 = vmul.f32 %v2963_v62, %v2937_v51  ;;  %v2964_v28 = vmul.f32 0.044715, %v2939_v11  ;;  %4423 = vtanh.f32 %v3005_v42 }
0x15de   : > { %v3008_v30 = vmul.f32 0.7978846, %v2996_v58  ;;  %4425 = vtanh.f32 %v3007_v23  ;;  %v2997_v48 = vadd.f32 %v2985_v56, %v5341_v25  ;;  %v2952_v12 = vmul.f32 0.5, %v2939_v11 }
0x15df   : > { %v2987_v31 = vmul.f32 %v2975_v20, %v2937_v51  ;;  %v2976_v7 = vmul.f32 %v2964_v28, %v2939_v11  ;;  %v2998_v13 = vadd.f32 %v2986_v19, %v5346_v41  ;;  %v2949_v4 = vmul.f32 0.5, %v5341_v25  ;;  %v3759_v41 = vld [vmem:[%s706_s30] ss:$0 sm:$0xff] }
0x15e0   : > { %4427 = vtanh.f32 %v3008_v30  ;;  %v3009_v15 = vmul.f32 0.7978846, %v2997_v48 }
0x15e1   : > { %v2988_v21 = vmul.f32 %v2976_v7, %v2939_v11  ;;  %v3010_v8 = vmul.f32 0.7978846, %v2998_v13  ;;  %v2999_v47 = vadd.f32 %v2987_v31, %v2937_v51 }
0x15e3   : > { %v3000_v55 = vadd.f32 %v2988_v21, %v2939_v11  ;;  %4429 = vtanh.f32 %v3010_v8  ;;  %v3011_v49 = vmul.f32 0.7978846, %v2999_v47 }
0x15e4   : > { %4431 = vtanh.f32 %v3009_v15 }
0x15e5   : > { %v3012_v53 = vmul.f32 0.7978846, %v3000_v55  ;;  %4433 = vtanh.f32 %v3011_v49 }
0x15e7   : > { %4435 = vtanh.f32 %v3012_v53 }
0x15e9   : > { %v4422_v54 = vpop.eup %4421 }
0x15ea   : > { %v4424_v59 = vpop.eup %4423  ;;  %v3030_v10 = vadd.f32 1.0, %v4422_v54 }
0x15eb   : > { %v4426_v63 = vpop.eup %4425  ;;  %v3029_v22 = vadd.f32 1.0, %v4424_v59 }
0x15ec   : > { %v3031_v44 = vadd.f32 1.0, %v4426_v63  ;;  %v3042_v40 = vmul.f32 %v3030_v10, %v2946_v50 }
0x15ed   : > { %v4428_v39 = vpop.eup %4427  ;;  %v3041_v18 = vmul.f32 %v3029_v22, %v2945_v61 }
0x15ee   : > { %v3032_v0 = vadd.f32 1.0, %v4428_v39  ;;  %v3043_v26 = vmul.f32 %v3031_v44, %v2947_v14 }
0x15f0   : > { %v4430_v43 = vpop.eup %4429  ;;  %v3044_v24 = vmul.f32 %v3032_v0, %v2948_v16  ;;  %v3051_v33 = vpack.c.bf16 %v3043_v26, %v3041_v18 }
0x15f1   : > { %v4432_v36 = vpop.eup %4431  ;;  %v3034_v27 = vadd.f32 1.0, %v4430_v43 }
0x15f2   : > { %v4434_v34 = vpop.eup %4433  ;;  %v3052_v37 = vpack.c.bf16 %v3044_v24, %v3042_v40  ;;  %v3033_v45 = vadd.f32 1.0, %v4432_v36 }
0x15f3   : > { %v3035_v1 = vadd.f32 1.0, %v4434_v34  ;;  %v3046_v17 = vmul.f32 %v3034_v27, %v2950_v3 }
0x15f4   : > { %v4436_v42 = vpop.eup %4435  ;;  %3230 = vmatprep.mubr.bf16.mxu1 %v3052_v37  ;;  %v3045_v56 = vmul.f32 %v3033_v45, %v2949_v4 }
0x15f5   : > { %3231 = vmatmul.mubr.bf16.gmra.mxu1 %v3051_v33  ;;  %v3036_v6 = vadd.f32 1.0, %v4436_v42  ;;  %v3047_v38 = vmul.f32 %v3035_v1, %v2951_v2 }
0x15f7   : > { %v3048_v52 = vmul.f32 %v3036_v6, %v2952_v12  ;;  %v3053_v57 = vpack.c.bf16 %v3047_v38, %v3045_v56  ;;  %v3776_v56 = vld [vmem:[%s709_s27] ss:$0 sm:$0xff]  ;;  %s5474_s27 = sld [smem:[#allocation15_spill]] (!%p3778_p5) }
0x15f9   : > { %v3054_v60 = vpack.c.bf16 %v3048_v52, %v3046_v17 }
0x15fb   : > { %3238 = vmatprep.mubr.bf16.mxu1 %v3054_v60 }
0x15fd   : > { %3239 = vmatmul.mubr.bf16.gmra.mxu1 %v3053_v57 }
0x1630   : > { %v3899_v62 = vpop.f32.mrf.mxu1 }
0x1632   : > { %v3900_v11 = vpop.f32.mrf.mxu1 }
0x1633   : > { %v3901_v58 = vadd.f32 %v3900_v11, %v3899_v62  ;;  %v3777_v62 = vld [vmem:[%s712_s7] ss:$0 sm:$0xff] }
0x1634   : > { %v3902_v51 = vpop.f32.mrf.mxu1 }
0x1635   : > { %v3225_v23 = vadd.f32 %v3901_v58, %v3759_v41 }
0x1636   : > { %v3903_v19 = vpop.f32.mrf.mxu1 }
0x1637   : > { %v3904_v20 = vadd.f32 %v3903_v19, %v3902_v51  ;;  %v3247_v25 = vadd.f32 %v3225_v23, %v5264_v29 }
0x1639   : > { %v3228_v28 = vadd.f32 %v3904_v20, %v3759_v41  ;;  %3255 = vadd.xlane.f32.xlu1 %v3247_v25 }
0x163b   : > { %v3248_v30 = vadd.f32 %v3228_v28, %v5267_v32 }
0x163d   : > { %3257 = vadd.xlane.f32.xlu0 %v3248_v30 }
0x16b5   : > { %v3905_v48 = vpop.f32.mrf.mxu1 }
0x16b7   : > { %v3906_v31 = vpop.f32.mrf.mxu1 }
0x16b8   : > { %v3907_v7 = vadd.f32 %v3906_v31, %v3905_v48 }
0x16b9   : > { %v3908_v13 = vpop.f32.mrf.mxu1 }
0x16ba   : > { %v3233_v15 = vadd.f32 %v3907_v7, %v3759_v41 }
0x16bb   : > { %v3909_v21 = vpop.f32.mrf.mxu1 }
0x16bc   : > { %v3910_v8 = vadd.f32 %v3909_v21, %v3908_v13  ;;  %v3249_v47 = vadd.f32 %v3233_v15, %v5293_v5 }
0x16bd   : > { %v3911_v55 = vpop.f32.mrf.mxu1 }
0x16be   : > { %v3236_v49 = vadd.f32 %v3910_v8, %v3759_v41  ;;  %3259 = vadd.xlane.f32.xlu1 %v3249_v47 }
0x16bf   : > { %v3912_v53 = vpop.f32.mrf.mxu1 }
0x16c0   : > { %v3913_v54 = vadd.f32 %v3912_v53, %v3911_v55  ;;  %v3250_v29 = vadd.f32 %v3236_v49, %v5296_v35 }
0x16c1   : > { %v3914_v59 = vpop.f32.mrf.mxu1 }
0x16c2   : > { %v3241_v63 = vadd.f32 %v3913_v54, %v3759_v41  ;;  %3261 = vadd.xlane.f32.xlu0 %v3250_v29  ;;  %v3256_v10 = vpop.xlane.xlu1 %3255 }
0x16c3   : > { %v3915_v32 = vpop.f32.mrf.mxu1  ;;  %v3267_v39 = vmul.f32 0.0078125, %v3256_v10 }
0x16c4   : > { %v3916_v44 = vadd.f32 %v3915_v32, %v3914_v59  ;;  %v3251_v14 = vadd.f32 %v3241_v63, %v5306_v46 }
0x16c5   : > { %v3273_v50 = vsub.f32 %v3247_v25, %v3267_v39 }
0x16c6   : > { %v3244_v22 = vadd.f32 %v3916_v44, %v3759_v41  ;;  %3263 = vadd.xlane.f32.xlu1 %v3251_v14  ;;  %v3258_v5 = vpop.xlane.xlu0 %3257 }
0x16c7   : > { %v3268_v16 = vmul.f32 0.0078125, %v3258_v5  ;;  %v3279_v61 = vmul.f32 %v3273_v50, %v3273_v50 }
0x16c8   : > { %v3252_v0 = vadd.f32 %v3244_v22, %v5309_v9 }
0x16c9   : > { %v3274_v26 = vsub.f32 %v3248_v30, %v3268_v16 }
0x16ca   : > { %3265 = vadd.xlane.f32.xlu0 %v3252_v0  ;;  %3285 = vadd.xlane.f32.xlu1 %v3279_v61 }
0x16cb   : > { %v3280_v35 = vmul.f32 %v3274_v26, %v3274_v26 }
0x16ce   : > { %3287 = vadd.xlane.f32.xlu0 %v3280_v35 }
0x1747   : > { %v3260_v43 = vpop.xlane.xlu1 %3259 }
0x1748   : > { %v3269_v40 = vmul.f32 0.0078125, %v3260_v43 }
0x174a   : > { %v3275_v24 = vsub.f32 %v3249_v47, %v3269_v40 }
0x174b   : > { %v3262_v36 = vpop.xlane.xlu0 %3261 }
0x174c   : > { %v3270_v18 = vmul.f32 0.0078125, %v3262_v36  ;;  %v3281_v34 = vmul.f32 %v3275_v24, %v3275_v24 }
0x174e   : > { %v3276_v46 = vsub.f32 %v3250_v29, %v3270_v18  ;;  %3289 = vadd.xlane.f32.xlu1 %v3281_v34 }
0x174f   : > { %v3264_v37 = vpop.xlane.xlu1 %3263 }
0x1750   : > { %v3271_v33 = vmul.f32 0.0078125, %v3264_v37  ;;  %v3282_v27 = vmul.f32 %v3276_v46, %v3276_v46 }
0x1752   : > { %v3277_v1 = vsub.f32 %v3251_v14, %v3271_v33  ;;  %3291 = vadd.xlane.f32.xlu0 %v3282_v27 }
0x1753   : > { %v3266_v9 = vpop.xlane.xlu0 %3265  ;;  %v3286_v42 = vpop.xlane.xlu1 %3285 }
0x1754   : > { %v3272_v3 = vmul.f32 0.0078125, %v3266_v9  ;;  %v3297_v12 = vmul.f32 0.0078125, %v3286_v42  ;;  %v3283_v6 = vmul.f32 %v3277_v1, %v3277_v1 }
0x1756   : > { %v3278_v2 = vsub.f32 %v3252_v0, %v3272_v3  ;;  %v3303_v45 = vadd.f32 1e-05, %v3297_v12  ;;  %3293 = vadd.xlane.f32.xlu1 %v3283_v6 }
0x1757   : > { %v3288_v17 = vpop.xlane.xlu0 %3287 }
0x1758   : > { %4437 = vrsqrt.f32 %v3303_v45  ;;  %v3298_v52 = vmul.f32 0.0078125, %v3288_v17  ;;  %v3284_v4 = vmul.f32 %v3278_v2, %v3278_v2 }
0x175a   : > { %v3304_v38 = vadd.f32 1e-05, %v3298_v52  ;;  %3295 = vadd.xlane.f32.xlu0 %v3284_v4 }
0x175c   : > { %4439 = vrsqrt.f32 %v3304_v38 }
0x1765   : > { %v4438_v60 = vpop.eup %4437 }
0x1766   : > { %v3315_v57 = vmul.f32 %v4438_v60, %v3273_v50 }
0x1768   : > { %v3327_v41 = vmul.f32 %v3776_v56, %v3315_v57 }
0x1769   : > { %v4440_v11 = vpop.eup %4439 }
0x176a   : > { %v3339_v58 = vadd.f32 %v3777_v62, %v3327_v41  ;;  %v3316_v51 = vmul.f32 %v4440_v11, %v3274_v26 }
0x176c   : > { %3345 = vst [vmem:[#allocation2 + $0x28] sm:$0xff] %v3339_v58  ;;  %v3328_v23 = vmul.f32 %v3776_v56, %v3316_v51 }
0x176e   : > { %v3340_v19 = vadd.f32 %v3777_v62, %v3328_v23 }
0x1770   : > { %3346 = vst [vmem:[#allocation2 + $0x10] sm:$0xff] %v3340_v19 }
0x17d7   : > { %v3290_v20 = vpop.xlane.xlu1 %3289 }
0x17d8   : > { %v3299_v25 = vmul.f32 0.0078125, %v3290_v20 }
0x17da   : > { %v3305_v28 = vadd.f32 1e-05, %v3299_v25 }
0x17db   : > { %v3292_v30 = vpop.xlane.xlu0 %3291 }
0x17dc   : > { %4441 = vrsqrt.f32 %v3305_v28  ;;  %v3300_v48 = vmul.f32 0.0078125, %v3292_v30 }
0x17de   : > { %v3306_v31 = vadd.f32 1e-05, %v3300_v48 }
0x17df   : > { %v3294_v7 = vpop.xlane.xlu1 %3293 }
0x17e0   : > { %4443 = vrsqrt.f32 %v3306_v31  ;;  %v3301_v13 = vmul.f32 0.0078125, %v3294_v7 }
0x17e2   : > { %v3307_v15 = vadd.f32 1e-05, %v3301_v13 }
0x17e3   : > { %v3296_v21 = vpop.xlane.xlu0 %3295 }
0x17e4   : > { %4445 = vrsqrt.f32 %v3307_v15  ;;  %v3302_v8 = vmul.f32 0.0078125, %v3296_v21 }
0x17e6   : > { %v3308_v47 = vadd.f32 1e-05, %v3302_v8 }
0x17e8   : > { %4447 = vrsqrt.f32 %v3308_v47 }
0x17e9   : > { %v4442_v55 = vpop.eup %4441 }
0x17ea   : > { %v3317_v49 = vmul.f32 %v4442_v55, %v3275_v24 }
0x17ec   : > { %v3329_v53 = vmul.f32 %v3776_v56, %v3317_v49 }
0x17ed   : > { %v4444_v54 = vpop.eup %4443 }
0x17ee   : > { %v3341_v29 = vadd.f32 %v3777_v62, %v3329_v53  ;;  %v3318_v59 = vmul.f32 %v4444_v54, %v3276_v46 }
0x17f0   : > { %3347 = vst [vmem:[#allocation2 + $0x8] sm:$0xff] %v3341_v29  ;;  %v3330_v63 = vmul.f32 %v3776_v56, %v3318_v59 }
0x17f1   : > { %v4446_v32 = vpop.eup %4445 }
0x17f2   : > { %v3342_v10 = vadd.f32 %v3777_v62, %v3330_v63  ;;  %v3319_v44 = vmul.f32 %v4446_v32, %v3277_v1 }
0x17f4   : > { %3348 = vst [vmem:[#allocation2] sm:$0xff] %v3342_v10  ;;  %v3331_v39 = vmul.f32 %v3776_v56, %v3319_v44 }
0x17f5   : > { %v4448_v14 = vpop.eup %4447 }
0x17f6   : > { %v3343_v22 = vadd.f32 %v3777_v62, %v3331_v39  ;;  %v3320_v50 = vmul.f32 %v4448_v14, %v3278_v2 }
0x17f8   : > { %3349 = vst [vmem:[#allocation2 + $0x18] sm:$0xff] %v3343_v22  ;;  %v3332_v5 = vmul.f32 %v3776_v56, %v3320_v50  ;;  %3354 = sbr.rel (%p3778_p5) target bundleno = 6653 (0x19fd), region = 96 }
0x17fa   : > { %v3344_v16 = vadd.f32 %v3777_v62, %v3332_v5 }
0x17fc   : > { %3350 = vst [vmem:[#allocation2 + $0x20] sm:$0xff] %v3344_v16 }
0x17fd   : > { %v3356_v0 = vrot.slane %v3342_v10, 7  ;;  %vm3358_vm7 = vcmask 1040384   ;;  %vm3362_vm8 = vcmask 1041408   ;;  %v4455_v35 = vld [vmem:[%s5474_s27 + $0x38] sm:$0xff]   ;;  %v4508_v43 = vmov 0.0   ;;  %v4456_v40 = vld [vmem:[%s5474_s27 + $0x30] sm:$0xff]  }
0x17fe   : > { %4110 = vmatprep.subr.bf16.mxu0 %v4508_v43  ;;  %v4457_v37 = vld [vmem:[%s5474_s27 + $0x28] sm:$0xff]   ;;  %v4458_v33 = vld [vmem:[%s5474_s27 + $0x20] sm:$0xff]   ;;  %vm4509_vm9 = vmmov 0   ;;  %v4459_v27 = vld [vmem:[%s5474_s27 + $0x18] sm:$0xff]  }
0x17ff   : > { %v3359_v61 = vsel %vm3358_vm7, %v3339_v58, %v3356_v0  ;;  %4111 = vmatpush3.bf16.msra.mxu0 %v4455_v35  ;;  %4126 = vmatprep.mubr.msk.bf16.mxu0 %vm4509_vm9, %v4508_v43  ;;  %v4460_v1 = vld [vmem:[%s5474_s27 + $0x10] sm:$0xff]   ;;  %v4461_v9 = vld [vmem:[%s5474_s27 + $0x8] sm:$0xff]   ;;  %v4462_v42 = vld [vmem:[%s5474_s27] sm:$0xff]  }
0x1800   : > { %v3363_v26 = vsel %vm3362_vm8, %v3359_v61, 0.0  ;;  %4112 = vmatprep.subr.bf16.mxu0 %v4508_v43  ;;  %v3779_v45 = vld [vmem:[%s5475_s1] ss:$0 sm:$0xff] }
0x1801   : > { %3364 = vadd.xlane.f32.xlu0 %v3363_v26  ;;  %v3780_v52 = vld [vmem:[%s5476_s26] ss:$0 sm:$0xff] }
0x1802   : > { %v3781_v56 = vld [vmem:[%s5477_s22] ss:$0 sm:$0xff] }
0x1803   : > { %4113 = vmatpush3.bf16.msra.mxu0 %v4456_v40 }
0x1804   : > { %4114 = vmatprep.subr.bf16.mxu0 %v4508_v43 }
0x1807   : > { %4115 = vmatpush3.bf16.msra.mxu0 %v4457_v37 }
0x1808   : > { %4116 = vmatprep.subr.bf16.mxu0 %v4508_v43 }
0x180b   : > { %4117 = vmatpush3.bf16.msra.mxu0 %v4458_v33 }
0x180c   : > { %4118 = vmatprep.subr.bf16.mxu0 %v4508_v43 }
0x180f   : > { %4119 = vmatpush3.bf16.msra.mxu0 %v4459_v27 }
0x1810   : > { %4120 = vmatprep.subr.bf16.mxu0 %v4508_v43 }
0x1813   : > { %4121 = vmatpush3.bf16.msra.mxu0 %v4460_v1 }
0x1814   : > { %4122 = vmatprep.subr.bf16.mxu0 %v4508_v43 }
0x1817   : > { %4123 = vmatpush3.bf16.msra.mxu0 %v4461_v9 }
0x1818   : > { %4124 = vmatprep.subr.bf16.mxu0 %v4508_v43 }
0x181b   : > { %4125 = vmatpush3.bf16.msra.mxu0 %v4462_v42 }
0x188a   : > { %v3365_v24 = vpop.xlane.xlu0 %3364 }
0x188b   : > { %v3366_v36 = vmul.f32 0.0078125, %v3365_v24 }
0x188d   : > { %v3367_v18 = vsub.f32 %v3359_v61, %v3366_v36 }
0x188f   : > { %v3368_v34 = vmul.f32 %v3367_v18, %v3367_v18 }
0x1891   : > { %v3369_v46 = vsel %vm3362_vm8, %v3368_v34, 0.0 }
0x1892   : > { %3370 = vadd.xlane.f32.xlu0 %v3369_v46 }
0x191b   : > { %v3371_v3 = vpop.xlane.xlu0 %3370 }
0x191c   : > { %v3372_v12 = vmul.f32 0.0078125, %v3371_v3 }
0x191e   : > { %v3373_v6 = vadd.f32 1e-05, %v3372_v12 }
0x1920   : > { %4463 = vrsqrt.f32 %v3373_v6 }
0x192d   : > { %v4464_v2 = vpop.eup %4463 }
0x192e   : > { %v3375_v17 = vmul.f32 %v4464_v2, %v3367_v18 }
0x1930   : > { %v3382_v4 = vmul.f32 %v3779_v45, %v3375_v17 }
0x1932   : > { %v3389_v38 = vadd.f32 %v3780_v52, %v3382_v4 }
0x1934   : > { %v3390_v60 = vpack.c.bf16 %v3389_v38, %v3389_v38 }
0x1936   : > { %4127 = vmatmul.mubr.bf16.vlgmr.msra.gmra.mxu0 %v3390_v60 }
0x19f6   : > { %v3496_v57 = vpop.f32.mrf.mxu0 }
0x19f7   : > { %v3497_v62 = vadd.f32 %v3781_v56, %v3496_v57 }
0x19f8   : > { %v4128_v41 = vpop.f32.mrf.mxu0 }
0x19f9   : > { %3502 = vst [vmem:[#allocation4] sm:$0x3] %v3497_v62 }
0x19fa   : > { %v3499_v11 = vpop.f32.mrf.mxu0 }
0x19fc   : > { %v4129_v58 = vpop.f32.mrf.mxu0 }
0x19fd PF: > { %p4160_p6 = scmp.eq.s32.totalorder %s4607_s25, 1  ;;  %s4510_s18 = smov [#allocation4]  }
0x19fe   : > { %s3510_s19 = sshll.u32 %s4510_s18, 4  ;;  %s3511_s19 = int_to_ptr.vmem [resolvable:$true] %s3510_s19 }
0x19ff   : > { %s4465_s17 = scalar_lea.vmem %s3511_s19, 32  ;;  %p4472_p10 = scmp.lt.s32.totalorder %s3511_s19, %s3511_s19 }
0x1a00   : > { %p4466_p7 = scmp.ne.s32.totalorder %s3511_s19, %s4465_s17  ;;  %p4473_p11 = scmp.lt.s32.totalorder %s4465_s17, %s4465_s17 }
0x1a02   : > { %p4467_p8 = pnand %p4466_p7, %p4160_p6  ;;  %p4474_p12 = por %p4473_p11, %p4472_p10 }
0x1a04   : > { %p4468_p9 = pneg %p4467_p8 }
0x1a06   : > { %p4475_p13 = pnand %p4474_p12, %p4468_p9 }
0x1a08   : > { %4478 = shalt.err (!%p4475_p13)
}
0x1a09   : > { %s5478_s15 = sld [smem:[#allocation17_spill]] }
0x1a0f   : > { %4157 = dma.vmem_to_hbm [thread:$0]  (%p4160_p6), %s3511_s19, 32, %s5478_s15, [#allocation5]  }
0x1a10   : > { %4494 = dma.done.wait (%p4160_p6), [#allocation5], 32  }
0x1a11   : > { %4496 = vsyncadd (%p4160_p6), [#allocation5], 4294967264 }
0x1a12 PF: > { %s5479_s2 = sld [smem:[#allocation7_spill]] }
0x1a18   : > { %s28_s24 = sadd.s32 1, %s5479_s2  }
0x1a19   : > { %p25_p0 = scmp.ge.s32.totalorder %s28_s24, 4  }
0x1a1b   :  { %27 = sbr.rel (!%p25_p0) target bundleno = 12 (0xc), region = 156 }
0x1a20   :  { %3523 = vsyncpa [#allocation5], 1 }
0x1a21   :  { %3525 = vsyncpa [#allocation5 + $0x1], 1 }

</bundles_post_ra>
